<compile_context>
chip_gen: v7x
topology: tpu7x:2x2x1
jax: 0.10.0
libtpu: 0.0.40
codegen_flags: <defaults>
</compile_context>

<pallas_src>
import jax
import jax.numpy as jnp
from jax import lax
from jax.experimental import pallas as pl
from jax.experimental.pallas import tpu as pltpu


def _silu(v):
    return v * jax.nn.sigmoid(v)


def egnn_encoder_kernel(h_ref, x_ref, st_ref, src_ref, tgt_ref, tgtr_ref, eattr_ref,
                        we1_ref, we2_ref, wx1_ref, wh1_ref, wh2_ref,
                        wvec_ref, bvec_ref,
                        h_out_ref, x_out_ref):
    N, H = h_ref.shape
    E = src_ref.shape[0]
    L = we1_ref.shape[0]

    eattr = eattr_ref[...]                                   # [E, 1] f32

    # ---- loop-invariant one-hot / selection matrices (built once) ----------
    # Stacked gather one-hot: rows [0:E] select source ("j"), rows [E:2E] select
    # target ("i").  bf16 is exact for 0/1 and runs at native MXU rate.
    iota_2en = lax.broadcasted_iota(jnp.int32, (2 * E, N), 1)
    gather_oh = (st_ref[...] == iota_2en).astype(jnp.bfloat16)     # [2E, N]

    # f32 difference matrix (+1 at src, -1 at tgt): x_diff = diff_oh @ x exactly.
    iota_en = lax.broadcasted_iota(jnp.int32, (E, N), 1)
    diff_oh = ((src_ref[...] == iota_en).astype(jnp.float32)
               - (tgt_ref[...] == iota_en).astype(jnp.float32))    # [E, N]

    # Scatter one-hot built directly in [N, E] layout -> no XLU transpose.
    iota_ne = lax.broadcasted_iota(jnp.int32, (N, E), 0)
    scat_eq = (tgtr_ref[...] == iota_ne)
    scat_oh_bf = scat_eq.astype(jnp.bfloat16)                      # [N, E]
    scat_oh_f32 = scat_eq.astype(jnp.float32)                      # [N, E]

    def layer_body(l, carry):
        h, x = carry                    # [N, H] f32, [N, 3] f32
        we1 = we1_ref[l]                # [2H+2, H] bf16 : [we1_hi; we1_hj; we1_r; we1_a]
        we2 = we2_ref[l]                # [H, H]    bf16
        wx1 = wx1_ref[l]                # [H, H]    bf16
        wh1 = wh1_ref[l]                # [2H, H]   bf16 : [wh1_h; wh1_m]
        wh2 = wh2_ref[l]                # [H, H]    bf16
        wv = wvec_ref[l]                # [2, H] f32 : winf^T | wx2^T (VPU reductions)
        bv = bvec_ref[l]                # [7, H] f32 : be1|be2|bx1|bh1|bh2|binf|bx2

        # --- gathers ---------------------------------------------------------
        # h gather: one stacked bf16 matmul for both endpoints.
        h_ij = jnp.dot(gather_oh, h.astype(jnp.bfloat16),
                       preferred_element_type=jnp.float32)          # [2E, H]
        h_j = h_ij[:E]
        h_i = h_ij[E:]
        # x gather/diff: exact f32 selection (positions never touch bf16).
        x_diff = jnp.dot(diff_oh, x, preferred_element_type=jnp.float32,
                         precision=lax.Precision.HIGHEST)            # [E, 3]
        r_ij = jnp.sqrt(jnp.sum(x_diff * x_diff, axis=-1, keepdims=True))  # [E, 1]

        # --- phi_e: fused K=2H+2 bf16 matmul -> SiLU -> Linear -> SiLU --------
        e_in = jnp.concatenate([h_i, h_j, r_ij, eattr],
                               axis=-1).astype(jnp.bfloat16)          # [E, 2H+2]
        e1 = _silu(jnp.dot(e_in, we1, preferred_element_type=jnp.float32)
                   + bv[0:1])                                          # [E, H] f32
        m_ij = _silu(jnp.dot(e1.astype(jnp.bfloat16), we2,
                             preferred_element_type=jnp.float32) + bv[1:2])  # [E, H]

        # --- phi_x: Linear(H,H) -> SiLU -> Linear(H,1) (lane reduction) -------
        wx_h = _silu(jnp.dot(m_ij.astype(jnp.bfloat16), wx1,
                             preferred_element_type=jnp.float32) + bv[2:3])
        W_ij = jnp.sum(wx_h * wv[1:2], axis=-1, keepdims=True) + bv[6:7, 0:1]  # [E, 1]

        # --- phi_inf: Linear(H,1) -> Sigmoid (lane reduction) -----------------
        inf_ij = jax.nn.sigmoid(jnp.sum(m_ij * wv[0:1], axis=-1, keepdims=True)
                                + bv[5:6, 0:1])                        # [E, 1]

        # --- scatter-add ('add' aggregation) ----------------------------------
        m_msg = (m_ij * inf_ij).astype(jnp.bfloat16)                   # [E, H]
        m_agg = jnp.dot(scat_oh_bf, m_msg,
                        preferred_element_type=jnp.float32)            # [N, H]
        x_new = x + jnp.dot(scat_oh_f32, W_ij * x_diff,
                            preferred_element_type=jnp.float32,
                            precision=lax.Precision.HIGHEST)           # [N, 3]

        # --- phi_h: fused K=2H bf16 matmul -> SiLU -> Linear; residual --------
        hm = jnp.concatenate([h, m_agg], axis=-1).astype(jnp.bfloat16)  # [N, 2H]
        hh = _silu(jnp.dot(hm, wh1, preferred_element_type=jnp.float32) + bv[3:4])
        h_new = h + jnp.dot(hh.astype(jnp.bfloat16), wh2,
                            preferred_element_type=jnp.float32) + bv[4:5]
        return (h_new, x_new)

    h_fin, x_fin = lax.fori_loop(0, L, layer_body, (h_ref[...], x_ref[...]),
                                 unroll=True)
    h_out_ref[...] = h_fin
    x_out_ref[...] = x_fin


def pack_layer_params(layer_params):
    """Stack per-layer weights; matmul weights are packed as bf16, biases / VPU
    reduction rows stay f32."""
    H = layer_params[0]['we2'].shape[0]
    bf = jnp.bfloat16
    w_e1 = jnp.stack([jnp.concatenate(
        [p['we1_hi'], p['we1_hj'], p['we1_r'], p['we1_a']], axis=0)
        for p in layer_params]).astype(bf)                       # [L, 2H+2, H]
    w_e2 = jnp.stack([p['we2'] for p in layer_params]).astype(bf)   # [L, H, H]
    w_x1 = jnp.stack([p['wx1'] for p in layer_params]).astype(bf)   # [L, H, H]
    w_h1 = jnp.stack([jnp.concatenate([p['wh1_h'], p['wh1_m']], axis=0)
                      for p in layer_params]).astype(bf)            # [L, 2H, H]
    w_h2 = jnp.stack([p['wh2'] for p in layer_params]).astype(bf)   # [L, H, H]
    wvec = jnp.stack([jnp.concatenate([p['winf'].T, p['wx2'].T], axis=0)
                      for p in layer_params])                       # [L, 2, H] f32
    bvec = jnp.stack([jnp.concatenate(
        [p['be1'], p['be2'], p['bx1'], p['bh1'], p['bh2'],
         jnp.full((1, H), p['binf'][0, 0]),
         jnp.full((1, H), p['bx2'][0, 0])], axis=0)
        for p in layer_params])                                     # [L, 7, H] f32
    return (w_e1, w_e2, w_x1, w_h1, w_h2, wvec, bvec)


def egnn_encoder_forward(h0, x0, edge_index, edge_attr, packed_params):
    """All ConvEGNN layers in one pallas_call; returns (h, x)."""
    N, H = h0.shape
    E = edge_index.shape[1]
    src_c = edge_index[0].reshape(E, 1).astype(jnp.int32)
    tgt_c = edge_index[1].reshape(E, 1).astype(jnp.int32)
    st_c = jnp.concatenate([src_c, tgt_c], axis=0)            # [2E, 1] stacked gather ids
    tgt_r = edge_index[1].reshape(1, E).astype(jnp.int32)     # row layout for scatter one-hot
    inputs = (h0, x0, st_c, src_c, tgt_c, tgt_r, edge_attr) + tuple(packed_params)
    vmem = pl.BlockSpec(memory_space=pltpu.MemorySpace.VMEM)
    h_out, x_out = pl.pallas_call(
        egnn_encoder_kernel,
        out_shape=(jax.ShapeDtypeStruct((N, H), jnp.float32),
                   jax.ShapeDtypeStruct((N, 3), jnp.float32)),
        in_specs=[vmem] * len(inputs),
        out_specs=(vmem, vmem),
        compiler_params=pltpu.CompilerParams(vmem_limit_bytes=64 * 1024 * 1024),
    )(*inputs)
    return h_out, x_out


def init_layer_params(key, H, scale=0.1):
    ks = jax.random.split(key, 18)
    w = lambda k, shape: scale * jax.random.normal(k, shape, jnp.float32)
    return dict(
        we1_hi=w(ks[0], (H, H)), we1_hj=w(ks[1], (H, H)),
        we1_r=w(ks[2], (1, H)), we1_a=w(ks[3], (1, H)), be1=w(ks[4], (1, H)),
        we2=w(ks[5], (H, H)), be2=w(ks[6], (1, H)),
        winf=w(ks[7], (H, 1)), binf=w(ks[8], (1, 1)),
        wx1=w(ks[9], (H, H)), bx1=w(ks[10], (1, H)),
        wx2=w(ks[11], (H, 1)), bx2=w(ks[12], (1, 1)),
        wh1_h=w(ks[13], (H, H)), wh1_m=w(ks[14], (H, H)), bh1=w(ks[15], (1, H)),
        wh2=w(ks[16], (H, H)), bh2=w(ks[17], (1, H)),
    )


def conv_egnn_ref(h, x, src, tgt, edge_attr, p):
    """Pure-JAX reference of ConvEGNN.forward (PyG source_to_target flow)."""
    N = h.shape[0]
    x_diff = x[src] - x[tgt]
    r_ij = jnp.linalg.norm(x_diff, axis=-1, keepdims=True)
    h_j, h_i = h[src], h[tgt]
    we1 = jnp.concatenate([p['we1_hi'], p['we1_hj'], p['we1_r'], p['we1_a']], axis=0)
    e_in = jnp.concatenate([h_i, h_j, r_ij, edge_attr], axis=-1)
    e1 = jax.nn.silu(e_in @ we1 + p['be1'])
    m_ij = jax.nn.silu(e1 @ p['we2'] + p['be2'])
    W_ij = jax.nn.silu(m_ij @ p['wx1'] + p['bx1']) @ p['wx2'] + p['bx2']
    inf_ij = jax.nn.sigmoid(m_ij @ p['winf'] + p['binf'])
    x_new = x + jax.ops.segment_sum(W_ij * x_diff, tgt, num_segments=N)
    m_agg = jax.ops.segment_sum(m_ij * inf_ij, tgt, num_segments=N)
    wh1 = jnp.concatenate([p['wh1_h'], p['wh1_m']], axis=0)
    hh = jax.nn.silu(jnp.concatenate([h, m_agg], axis=-1) @ wh1 + p['bh1'])
    h_new = h + (hh @ p['wh2'] + p['bh2'])
    return h_new, x_new


if __name__ == "__main__":
    N, E, H, n_layers = 16, 48, 32, 2
    key = jax.random.PRNGKey(0)
    k = jax.random.split(key, 8)

    atomic_numbers = jax.random.randint(k[0], (N,), 0, 100)          # int "Z"
    pos = jax.random.normal(k[1], (N, 3), jnp.float32)               # batch.pos
    edge_index = jax.random.randint(k[2], (2, E), 0, N)              # batch.edge_index
    edge_attr = jax.random.normal(k[3], (E, 1), jnp.float32)         # batch.edge_attr

    # nn.Embedding(100, H, padding_idx=0): deterministic table, row 0 zeroed.
    emb_table = 0.1 * jax.random.normal(k[4], (100, H), jnp.float32)
    emb_table = emb_table.at[0].set(0.0)

    layer_params = [init_layer_params(jax.random.fold_in(key, 100 + l), H)
                    for l in range(n_layers)]
    packed_params = pack_layer_params(layer_params)

    # Embedding lookup is plain-JAX glue (gather); the hot path is in the kernel.
    h0 = jnp.take(emb_table, atomic_numbers, axis=0)                 # [N, H]
    x0 = pos                                                         # [N, 3]

    # Fused kernel: all layers in one pallas_call.
    h_ker, x_ker = egnn_encoder_forward(h0, x0, edge_index, edge_attr, packed_params)
    jax.block_until_ready((h_ker, x_ker))

    # Pure-JAX reference (layer by layer, f32 weights).
    src = edge_index[0].astype(jnp.int32)
    tgt = edge_index[1].astype(jnp.int32)
    h_ref, x_ref = h0, x0
    for l in range(n_layers):
        h_ref, x_ref = conv_egnn_ref(h_ref, x_ref, src, tgt, edge_attr,
                                     layer_params[l])

    assert jnp.all(jnp.isfinite(h_ker)) and jnp.all(jnp.isfinite(x_ker))
    assert jnp.allclose(h_ker, h_ref, atol=2e-2, rtol=2e-2)
    assert jnp.allclose(x_ker, x_ref, atol=2e-2, rtol=2e-2)

    # TODO(synk): the original forward mutates and returns the PyG `batch`
    # object (MessagePassing plumbing); here we return (h, x), which carries
    # the same data.
    print("KERNEL_OK")
</pallas_src>

<mosaic_0001>
module attributes {stable_mosaic.version = 11 : i64} {
  func.func @egnn_encoder_kernel(%arg0: memref<16x32xf32, #tpu.memory_space<vmem>>, %arg1: memref<16x3xf32, #tpu.memory_space<vmem>>, %arg2: memref<96x1xi32, #tpu.memory_space<vmem>>, %arg3: memref<48x1xi32, #tpu.memory_space<vmem>>, %arg4: memref<48x1xi32, #tpu.memory_space<vmem>>, %arg5: memref<1x48xi32, #tpu.memory_space<vmem>>, %arg6: memref<48x1xf32, #tpu.memory_space<vmem>>, %arg7: memref<2x66x32xbf16, #tpu.memory_space<vmem>>, %arg8: memref<2x32x32xbf16, #tpu.memory_space<vmem>>, %arg9: memref<2x32x32xbf16, #tpu.memory_space<vmem>>, %arg10: memref<2x64x32xbf16, #tpu.memory_space<vmem>>, %arg11: memref<2x32x32xbf16, #tpu.memory_space<vmem>>, %arg12: memref<2x2x32xf32, #tpu.memory_space<vmem>>, %arg13: memref<2x7x32xf32, #tpu.memory_space<vmem>>, %arg14: memref<16x32xf32, #tpu.memory_space<vmem>>, %arg15: memref<16x3xf32, #tpu.memory_space<vmem>>) attributes {dimension_semantics = [], scalar_prefetch = 0 : i64, scratch_operands = 0 : i64, tpu.core_type = #tpu.core_type<tc>} {
    %c0 = arith.constant 0 : index
    %c0_0 = arith.constant 0 : index
    %0 = vector.load %arg6[%c0, %c0_0] : memref<48x1xf32, #tpu.memory_space<vmem>>, vector<48x1xf32>
    %1 = tpu.iota {dimensions = array<i32: 1>} : vector<96x16xi32>
    %c0_1 = arith.constant 0 : index
    %c0_2 = arith.constant 0 : index
    %2 = vector.load %arg2[%c0_1, %c0_2] : memref<96x1xi32, #tpu.memory_space<vmem>>, vector<96x1xi32>
    %3 = vector.broadcast %2 : vector<96x1xi32> to vector<96x16xi32>
    %4 = arith.cmpi eq, %3, %1 : vector<96x16xi32>
    %5 = arith.extui %4 : vector<96x16xi1> to vector<96x16xi32>
    %6 = arith.sitofp %5 : vector<96x16xi32> to vector<96x16xf32>
    %7 = arith.truncf %6 : vector<96x16xf32> to vector<96x16xbf16>
    %8 = tpu.iota {dimensions = array<i32: 1>} : vector<48x16xi32>
    %c0_3 = arith.constant 0 : index
    %c0_4 = arith.constant 0 : index
    %9 = vector.load %arg3[%c0_3, %c0_4] : memref<48x1xi32, #tpu.memory_space<vmem>>, vector<48x1xi32>
    %10 = vector.broadcast %9 : vector<48x1xi32> to vector<48x16xi32>
    %11 = arith.cmpi eq, %10, %8 : vector<48x16xi32>
    %12 = arith.extui %11 : vector<48x16xi1> to vector<48x16xi32>
    %13 = arith.sitofp %12 : vector<48x16xi32> to vector<48x16xf32>
    %c0_5 = arith.constant 0 : index
    %c0_6 = arith.constant 0 : index
    %14 = vector.load %arg4[%c0_5, %c0_6] : memref<48x1xi32, #tpu.memory_space<vmem>>, vector<48x1xi32>
    %15 = vector.broadcast %14 : vector<48x1xi32> to vector<48x16xi32>
    %16 = arith.cmpi eq, %15, %8 : vector<48x16xi32>
    %17 = arith.extui %16 : vector<48x16xi1> to vector<48x16xi32>
    %18 = arith.sitofp %17 : vector<48x16xi32> to vector<48x16xf32>
    %19 = arith.subf %13, %18 : vector<48x16xf32>
    %20 = tpu.iota {dimensions = array<i32: 0>} : vector<16x48xi32>
    %c0_7 = arith.constant 0 : index
    %c0_8 = arith.constant 0 : index
    %21 = vector.load %arg5[%c0_7, %c0_8] : memref<1x48xi32, #tpu.memory_space<vmem>>, vector<1x48xi32>
    %22 = vector.broadcast %21 : vector<1x48xi32> to vector<16x48xi32>
    %23 = arith.cmpi eq, %22, %20 : vector<16x48xi32>
    %24 = arith.extui %23 : vector<16x48xi1> to vector<16x48xi32>
    %25 = arith.sitofp %24 : vector<16x48xi32> to vector<16x48xf32>
    %26 = arith.truncf %25 : vector<16x48xf32> to vector<16x48xbf16>
    %27 = arith.extui %23 : vector<16x48xi1> to vector<16x48xi32>
    %28 = arith.sitofp %27 : vector<16x48xi32> to vector<16x48xf32>
    %c0_9 = arith.constant 0 : index
    %c0_10 = arith.constant 0 : index
    %29 = vector.load %arg0[%c0_9, %c0_10] : memref<16x32xf32, #tpu.memory_space<vmem>>, vector<16x32xf32>
    %c0_11 = arith.constant 0 : index
    %c0_12 = arith.constant 0 : index
    %30 = vector.load %arg1[%c0_11, %c0_12] : memref<16x3xf32, #tpu.memory_space<vmem>>, vector<16x3xf32>
    %c0_i32 = arith.constant 0 : i32
    %31 = arith.index_cast %c0_i32 : i32 to index
    %c0_13 = arith.constant 0 : index
    %c0_14 = arith.constant 0 : index
    %32 = vector.load %arg7[%31, %c0_13, %c0_14] : memref<2x66x32xbf16, #tpu.memory_space<vmem>>, vector<1x66x32xbf16>
    %33 = vector.shape_cast %32 : vector<1x66x32xbf16> to vector<66x32xbf16>
    %34 = arith.index_cast %c0_i32 : i32 to index
    %c0_15 = arith.constant 0 : index
    %c0_16 = arith.constant 0 : index
    %35 = vector.load %arg8[%34, %c0_15, %c0_16] : memref<2x32x32xbf16, #tpu.memory_space<vmem>>, vector<1x32x32xbf16>
    %36 = vector.shape_cast %35 : vector<1x32x32xbf16> to vector<32x32xbf16>
    %37 = arith.index_cast %c0_i32 : i32 to index
    %c0_17 = arith.constant 0 : index
    %c0_18 = arith.constant 0 : index
    %38 = vector.load %arg9[%37, %c0_17, %c0_18] : memref<2x32x32xbf16, #tpu.memory_space<vmem>>, vector<1x32x32xbf16>
    %39 = vector.shape_cast %38 : vector<1x32x32xbf16> to vector<32x32xbf16>
    %40 = arith.index_cast %c0_i32 : i32 to index
    %c0_19 = arith.constant 0 : index
    %c0_20 = arith.constant 0 : index
    %41 = vector.load %arg10[%40, %c0_19, %c0_20] : memref<2x64x32xbf16, #tpu.memory_space<vmem>>, vector<1x64x32xbf16>
    %42 = vector.shape_cast %41 : vector<1x64x32xbf16> to vector<64x32xbf16>
    %43 = arith.index_cast %c0_i32 : i32 to index
    %c0_21 = arith.constant 0 : index
    %c0_22 = arith.constant 0 : index
    %44 = vector.load %arg11[%43, %c0_21, %c0_22] : memref<2x32x32xbf16, #tpu.memory_space<vmem>>, vector<1x32x32xbf16>
    %45 = vector.shape_cast %44 : vector<1x32x32xbf16> to vector<32x32xbf16>
    %46 = arith.index_cast %c0_i32 : i32 to index
    %c0_23 = arith.constant 0 : index
    %c0_24 = arith.constant 0 : index
    %47 = vector.load %arg12[%46, %c0_23, %c0_24] : memref<2x2x32xf32, #tpu.memory_space<vmem>>, vector<1x2x32xf32>
    %48 = vector.shape_cast %47 : vector<1x2x32xf32> to vector<2x32xf32>
    %49 = arith.index_cast %c0_i32 : i32 to index
    %c0_25 = arith.constant 0 : index
    %c0_26 = arith.constant 0 : index
    %50 = vector.load %arg13[%49, %c0_25, %c0_26] : memref<2x7x32xf32, #tpu.memory_space<vmem>>, vector<1x7x32xf32>
    %51 = vector.shape_cast %50 : vector<1x7x32xf32> to vector<7x32xf32>
    %52 = arith.truncf %29 : vector<16x32xf32> to vector<16x32xbf16>
    %cst = arith.constant dense<0.000000e+00> : vector<96x32xf32>
    %53 = tpu.matmul %7, %52, %cst {dimension_numbers = #tpu.dot_dimension_numbers<[1], [0], [0], [1], [0, 0, 1, 1], [], []>} : vector<96x16xbf16>, vector<16x32xbf16>, vector<96x32xf32> -> vector<96x32xf32>
    %54 = vector.extract_strided_slice %53 {offsets = [0, 0], sizes = [48, 32], strides = [1, 1]} : vector<96x32xf32> to vector<48x32xf32>
    %55 = vector.extract_strided_slice %53 {offsets = [48, 0], sizes = [48, 32], strides = [1, 1]} : vector<96x32xf32> to vector<48x32xf32>
    %cst_27 = arith.constant dense<0.000000e+00> : vector<48x3xf32>
    %56 = tpu.matmul %19, %30, %cst_27 {dimension_numbers = #tpu.dot_dimension_numbers<[1], [0], [0], [1], [0, 0, 1, 1], [], []>, precision = #tpu.contract_precision<fp32>} : vector<48x16xf32>, vector<16x3xf32>, vector<48x3xf32> -> vector<48x3xf32>
    %57 = arith.mulf %56, %56 : vector<48x3xf32>
    %cst_28 = arith.constant dense<0.000000e+00> : vector<48xf32>
    %58 = vector.multi_reduction <add>, %57, %cst_28 [1] : vector<48x3xf32> to vector<48xf32>
    %59 = vector.shape_cast %58 : vector<48xf32> to vector<48x1xf32>
    %60 = math.sqrt %59 : vector<48x1xf32>
    %61 = tpu.concatenate %55, %54, %60, %0 in 1 : vector<48x32xf32>, vector<48x32xf32>, vector<48x1xf32>, vector<48x1xf32> -> vector<48x66xf32>
    %62 = arith.truncf %61 : vector<48x66xf32> to vector<48x66xbf16>
    %cst_29 = arith.constant dense<0.000000e+00> : vector<48x32xf32>
    %63 = tpu.matmul %62, %33, %cst_29 {dimension_numbers = #tpu.dot_dimension_numbers<[1], [0], [0], [1], [0, 0, 1, 1], [], []>} : vector<48x66xbf16>, vector<66x32xbf16>, vector<48x32xf32> -> vector<48x32xf32>
    %64 = vector.extract_strided_slice %51 {offsets = [0, 0], sizes = [1, 32], strides = [1, 1]} : vector<7x32xf32> to vector<1x32xf32>
    %65 = vector.broadcast %64 : vector<1x32xf32> to vector<48x32xf32>
    %66 = arith.addf %63, %65 : vector<48x32xf32>
    %67 = arith.negf %66 : vector<48x32xf32>
    %68 = math.exp %67 : vector<48x32xf32>
    %cst_30 = arith.constant 1.000000e+00 : f32
    %69 = vector.broadcast %cst_30 : f32 to vector<48x32xf32>
    %70 = arith.addf %69, %68 : vector<48x32xf32>
    %71 = arith.divf %69, %70 : vector<48x32xf32>
    %72 = arith.mulf %66, %71 : vector<48x32xf32>
    %73 = arith.truncf %72 : vector<48x32xf32> to vector<48x32xbf16>
    %cst_31 = arith.constant dense<0.000000e+00> : vector<48x32xf32>
    %74 = tpu.matmul %73, %36, %cst_31 {dimension_numbers = #tpu.dot_dimension_numbers<[1], [0], [0], [1], [0, 0, 1, 1], [], []>} : vector<48x32xbf16>, vector<32x32xbf16>, vector<48x32xf32> -> vector<48x32xf32>
    %75 = vector.extract_strided_slice %51 {offsets = [1, 0], sizes = [1, 32], strides = [1, 1]} : vector<7x32xf32> to vector<1x32xf32>
    %76 = vector.broadcast %75 : vector<1x32xf32> to vector<48x32xf32>
    %77 = arith.addf %74, %76 : vector<48x32xf32>
    %78 = arith.negf %77 : vector<48x32xf32>
    %79 = math.exp %78 : vector<48x32xf32>
    %cst_32 = arith.constant 1.000000e+00 : f32
    %80 = vector.broadcast %cst_32 : f32 to vector<48x32xf32>
    %81 = arith.addf %80, %79 : vector<48x32xf32>
    %82 = arith.divf %80, %81 : vector<48x32xf32>
    %83 = arith.mulf %77, %82 : vector<48x32xf32>
    %84 = arith.truncf %83 : vector<48x32xf32> to vector<48x32xbf16>
    %cst_33 = arith.constant dense<0.000000e+00> : vector<48x32xf32>
    %85 = tpu.matmul %84, %39, %cst_33 {dimension_numbers = #tpu.dot_dimension_numbers<[1], [0], [0], [1], [0, 0, 1, 1], [], []>} : vector<48x32xbf16>, vector<32x32xbf16>, vector<48x32xf32> -> vector<48x32xf32>
    %86 = vector.extract_strided_slice %51 {offsets = [2, 0], sizes = [1, 32], strides = [1, 1]} : vector<7x32xf32> to vector<1x32xf32>
    %87 = vector.broadcast %86 : vector<1x32xf32> to vector<48x32xf32>
    %88 = arith.addf %85, %87 : vector<48x32xf32>
    %89 = arith.negf %88 : vector<48x32xf32>
    %90 = math.exp %89 : vector<48x32xf32>
    %cst_34 = arith.constant 1.000000e+00 : f32
    %91 = vector.broadcast %cst_34 : f32 to vector<48x32xf32>
    %92 = arith.addf %91, %90 : vector<48x32xf32>
    %93 = arith.divf %91, %92 : vector<48x32xf32>
    %94 = arith.mulf %88, %93 : vector<48x32xf32>
    %95 = vector.extract_strided_slice %48 {offsets = [1, 0], sizes = [1, 32], strides = [1, 1]} : vector<2x32xf32> to vector<1x32xf32>
    %96 = vector.broadcast %95 : vector<1x32xf32> to vector<48x32xf32>
    %97 = arith.mulf %94, %96 : vector<48x32xf32>
    %cst_35 = arith.constant dense<0.000000e+00> : vector<48xf32>
    %98 = vector.multi_reduction <add>, %97, %cst_35 [1] : vector<48x32xf32> to vector<48xf32>
    %99 = vector.shape_cast %98 : vector<48xf32> to vector<48x1xf32>
    %100 = vector.extract_strided_slice %51 {offsets = [6, 0], sizes = [1, 1], strides = [1, 1]} : vector<7x32xf32> to vector<1x1xf32>
    %101 = vector.broadcast %100 : vector<1x1xf32> to vector<48x1xf32>
    %102 = arith.addf %99, %101 : vector<48x1xf32>
    %103 = vector.extract_strided_slice %48 {offsets = [0, 0], sizes = [1, 32], strides = [1, 1]} : vector<2x32xf32> to vector<1x32xf32>
    %104 = vector.broadcast %103 : vector<1x32xf32> to vector<48x32xf32>
    %105 = arith.mulf %83, %104 : vector<48x32xf32>
    %cst_36 = arith.constant dense<0.000000e+00> : vector<48xf32>
    %106 = vector.multi_reduction <add>, %105, %cst_36 [1] : vector<48x32xf32> to vector<48xf32>
    %107 = vector.shape_cast %106 : vector<48xf32> to vector<48x1xf32>
    %108 = vector.extract_strided_slice %51 {offsets = [5, 0], sizes = [1, 1], strides = [1, 1]} : vector<7x32xf32> to vector<1x1xf32>
    %109 = vector.broadcast %108 : vector<1x1xf32> to vector<48x1xf32>
    %110 = arith.addf %107, %109 : vector<48x1xf32>
    %111 = arith.negf %110 : vector<48x1xf32>
    %112 = math.exp %111 : vector<48x1xf32>
    %cst_37 = arith.constant 1.000000e+00 : f32
    %113 = vector.broadcast %cst_37 : f32 to vector<48x1xf32>
    %114 = arith.addf %113, %112 : vector<48x1xf32>
    %115 = arith.divf %113, %114 : vector<48x1xf32>
    %116 = vector.broadcast %115 : vector<48x1xf32> to vector<48x32xf32>
    %117 = arith.mulf %83, %116 : vector<48x32xf32>
    %118 = arith.truncf %117 : vector<48x32xf32> to vector<48x32xbf16>
    %cst_38 = arith.constant dense<0.000000e+00> : vector<16x32xf32>
    %119 = tpu.matmul %26, %118, %cst_38 {dimension_numbers = #tpu.dot_dimension_numbers<[1], [0], [0], [1], [0, 0, 1, 1], [], []>} : vector<16x48xbf16>, vector<48x32xbf16>, vector<16x32xf32> -> vector<16x32xf32>
    %120 = vector.broadcast %102 : vector<48x1xf32> to vector<48x3xf32>
    %121 = arith.mulf %120, %56 : vector<48x3xf32>
    %cst_39 = arith.constant dense<0.000000e+00> : vector<16x3xf32>
    %122 = tpu.matmul %28, %121, %cst_39 {dimension_numbers = #tpu.dot_dimension_numbers<[1], [0], [0], [1], [0, 0, 1, 1], [], []>, precision = #tpu.contract_precision<fp32>} : vector<16x48xf32>, vector<48x3xf32>, vector<16x3xf32> -> vector<16x3xf32>
    %123 = arith.addf %30, %122 : vector<16x3xf32>
    %124 = tpu.concatenate %29, %119 in 1 : vector<16x32xf32>, vector<16x32xf32> -> vector<16x64xf32>
    %125 = arith.truncf %124 : vector<16x64xf32> to vector<16x64xbf16>
    %cst_40 = arith.constant dense<0.000000e+00> : vector<16x32xf32>
    %126 = tpu.matmul %125, %42, %cst_40 {dimension_numbers = #tpu.dot_dimension_numbers<[1], [0], [0], [1], [0, 0, 1, 1], [], []>} : vector<16x64xbf16>, vector<64x32xbf16>, vector<16x32xf32> -> vector<16x32xf32>
    %127 = vector.extract_strided_slice %51 {offsets = [3, 0], sizes = [1, 32], strides = [1, 1]} : vector<7x32xf32> to vector<1x32xf32>
    %128 = vector.broadcast %127 : vector<1x32xf32> to vector<16x32xf32>
    %129 = arith.addf %126, %128 : vector<16x32xf32>
    %130 = arith.negf %129 : vector<16x32xf32>
    %131 = math.exp %130 : vector<16x32xf32>
    %cst_41 = arith.constant 1.000000e+00 : f32
    %132 = vector.broadcast %cst_41 : f32 to vector<16x32xf32>
    %133 = arith.addf %132, %131 : vector<16x32xf32>
    %134 = arith.divf %132, %133 : vector<16x32xf32>
    %135 = arith.mulf %129, %134 : vector<16x32xf32>
    %136 = arith.truncf %135 : vector<16x32xf32> to vector<16x32xbf16>
    %cst_42 = arith.constant dense<0.000000e+00> : vector<16x32xf32>
    %137 = tpu.matmul %136, %45, %cst_42 {dimension_numbers = #tpu.dot_dimension_numbers<[1], [0], [0], [1], [0, 0, 1, 1], [], []>} : vector<16x32xbf16>, vector<32x32xbf16>, vector<16x32xf32> -> vector<16x32xf32>
    %138 = arith.addf %29, %137 : vector<16x32xf32>
    %139 = vector.extract_strided_slice %51 {offsets = [4, 0], sizes = [1, 32], strides = [1, 1]} : vector<7x32xf32> to vector<1x32xf32>
    %140 = vector.broadcast %139 : vector<1x32xf32> to vector<16x32xf32>
    %141 = arith.addf %138, %140 : vector<16x32xf32>
    %c1_i32 = arith.constant 1 : i32
    %142 = arith.index_cast %c1_i32 : i32 to index
    %c0_43 = arith.constant 0 : index
    %c0_44 = arith.constant 0 : index
    %143 = vector.load %arg7[%142, %c0_43, %c0_44] : memref<2x66x32xbf16, #tpu.memory_space<vmem>>, vector<1x66x32xbf16>
    %144 = vector.shape_cast %143 : vector<1x66x32xbf16> to vector<66x32xbf16>
    %145 = arith.index_cast %c1_i32 : i32 to index
    %c0_45 = arith.constant 0 : index
    %c0_46 = arith.constant 0 : index
    %146 = vector.load %arg8[%145, %c0_45, %c0_46] : memref<2x32x32xbf16, #tpu.memory_space<vmem>>, vector<1x32x32xbf16>
    %147 = vector.shape_cast %146 : vector<1x32x32xbf16> to vector<32x32xbf16>
    %148 = arith.index_cast %c1_i32 : i32 to index
    %c0_47 = arith.constant 0 : index
    %c0_48 = arith.constant 0 : index
    %149 = vector.load %arg9[%148, %c0_47, %c0_48] : memref<2x32x32xbf16, #tpu.memory_space<vmem>>, vector<1x32x32xbf16>
    %150 = vector.shape_cast %149 : vector<1x32x32xbf16> to vector<32x32xbf16>
    %151 = arith.index_cast %c1_i32 : i32 to index
    %c0_49 = arith.constant 0 : index
    %c0_50 = arith.constant 0 : index
    %152 = vector.load %arg10[%151, %c0_49, %c0_50] : memref<2x64x32xbf16, #tpu.memory_space<vmem>>, vector<1x64x32xbf16>
    %153 = vector.shape_cast %152 : vector<1x64x32xbf16> to vector<64x32xbf16>
    %154 = arith.index_cast %c1_i32 : i32 to index
    %c0_51 = arith.constant 0 : index
    %c0_52 = arith.constant 0 : index
    %155 = vector.load %arg11[%154, %c0_51, %c0_52] : memref<2x32x32xbf16, #tpu.memory_space<vmem>>, vector<1x32x32xbf16>
    %156 = vector.shape_cast %155 : vector<1x32x32xbf16> to vector<32x32xbf16>
    %157 = arith.index_cast %c1_i32 : i32 to index
    %c0_53 = arith.constant 0 : index
    %c0_54 = arith.constant 0 : index
    %158 = vector.load %arg12[%157, %c0_53, %c0_54] : memref<2x2x32xf32, #tpu.memory_space<vmem>>, vector<1x2x32xf32>
    %159 = vector.shape_cast %158 : vector<1x2x32xf32> to vector<2x32xf32>
    %160 = arith.index_cast %c1_i32 : i32 to index
    %c0_55 = arith.constant 0 : index
    %c0_56 = arith.constant 0 : index
    %161 = vector.load %arg13[%160, %c0_55, %c0_56] : memref<2x7x32xf32, #tpu.memory_space<vmem>>, vector<1x7x32xf32>
    %162 = vector.shape_cast %161 : vector<1x7x32xf32> to vector<7x32xf32>
    %163 = arith.truncf %141 : vector<16x32xf32> to vector<16x32xbf16>
    %cst_57 = arith.constant dense<0.000000e+00> : vector<96x32xf32>
    %164 = tpu.matmul %7, %163, %cst_57 {dimension_numbers = #tpu.dot_dimension_numbers<[1], [0], [0], [1], [0, 0, 1, 1], [], []>} : vector<96x16xbf16>, vector<16x32xbf16>, vector<96x32xf32> -> vector<96x32xf32>
    %165 = vector.extract_strided_slice %164 {offsets = [0, 0], sizes = [48, 32], strides = [1, 1]} : vector<96x32xf32> to vector<48x32xf32>
    %166 = vector.extract_strided_slice %164 {offsets = [48, 0], sizes = [48, 32], strides = [1, 1]} : vector<96x32xf32> to vector<48x32xf32>
    %cst_58 = arith.constant dense<0.000000e+00> : vector<48x3xf32>
    %167 = tpu.matmul %19, %123, %cst_58 {dimension_numbers = #tpu.dot_dimension_numbers<[1], [0], [0], [1], [0, 0, 1, 1], [], []>, precision = #tpu.contract_precision<fp32>} : vector<48x16xf32>, vector<16x3xf32>, vector<48x3xf32> -> vector<48x3xf32>
    %168 = arith.mulf %167, %167 : vector<48x3xf32>
    %cst_59 = arith.constant dense<0.000000e+00> : vector<48xf32>
    %169 = vector.multi_reduction <add>, %168, %cst_59 [1] : vector<48x3xf32> to vector<48xf32>
    %170 = vector.shape_cast %169 : vector<48xf32> to vector<48x1xf32>
    %171 = math.sqrt %170 : vector<48x1xf32>
    %172 = tpu.concatenate %166, %165, %171, %0 in 1 : vector<48x32xf32>, vector<48x32xf32>, vector<48x1xf32>, vector<48x1xf32> -> vector<48x66xf32>
    %173 = arith.truncf %172 : vector<48x66xf32> to vector<48x66xbf16>
    %cst_60 = arith.constant dense<0.000000e+00> : vector<48x32xf32>
    %174 = tpu.matmul %173, %144, %cst_60 {dimension_numbers = #tpu.dot_dimension_numbers<[1], [0], [0], [1], [0, 0, 1, 1], [], []>} : vector<48x66xbf16>, vector<66x32xbf16>, vector<48x32xf32> -> vector<48x32xf32>
    %175 = vector.extract_strided_slice %162 {offsets = [0, 0], sizes = [1, 32], strides = [1, 1]} : vector<7x32xf32> to vector<1x32xf32>
    %176 = vector.broadcast %175 : vector<1x32xf32> to vector<48x32xf32>
    %177 = arith.addf %174, %176 : vector<48x32xf32>
    %178 = arith.negf %177 : vector<48x32xf32>
    %179 = math.exp %178 : vector<48x32xf32>
    %cst_61 = arith.constant 1.000000e+00 : f32
    %180 = vector.broadcast %cst_61 : f32 to vector<48x32xf32>
    %181 = arith.addf %180, %179 : vector<48x32xf32>
    %182 = arith.divf %180, %181 : vector<48x32xf32>
    %183 = arith.mulf %177, %182 : vector<48x32xf32>
    %184 = arith.truncf %183 : vector<48x32xf32> to vector<48x32xbf16>
    %cst_62 = arith.constant dense<0.000000e+00> : vector<48x32xf32>
    %185 = tpu.matmul %184, %147, %cst_62 {dimension_numbers = #tpu.dot_dimension_numbers<[1], [0], [0], [1], [0, 0, 1, 1], [], []>} : vector<48x32xbf16>, vector<32x32xbf16>, vector<48x32xf32> -> vector<48x32xf32>
    %186 = vector.extract_strided_slice %162 {offsets = [1, 0], sizes = [1, 32], strides = [1, 1]} : vector<7x32xf32> to vector<1x32xf32>
    %187 = vector.broadcast %186 : vector<1x32xf32> to vector<48x32xf32>
    %188 = arith.addf %185, %187 : vector<48x32xf32>
    %189 = arith.negf %188 : vector<48x32xf32>
    %190 = math.exp %189 : vector<48x32xf32>
    %cst_63 = arith.constant 1.000000e+00 : f32
    %191 = vector.broadcast %cst_63 : f32 to vector<48x32xf32>
    %192 = arith.addf %191, %190 : vector<48x32xf32>
    %193 = arith.divf %191, %192 : vector<48x32xf32>
    %194 = arith.mulf %188, %193 : vector<48x32xf32>
    %195 = arith.truncf %194 : vector<48x32xf32> to vector<48x32xbf16>
    %cst_64 = arith.constant dense<0.000000e+00> : vector<48x32xf32>
    %196 = tpu.matmul %195, %150, %cst_64 {dimension_numbers = #tpu.dot_dimension_numbers<[1], [0], [0], [1], [0, 0, 1, 1], [], []>} : vector<48x32xbf16>, vector<32x32xbf16>, vector<48x32xf32> -> vector<48x32xf32>
    %197 = vector.extract_strided_slice %162 {offsets = [2, 0], sizes = [1, 32], strides = [1, 1]} : vector<7x32xf32> to vector<1x32xf32>
    %198 = vector.broadcast %197 : vector<1x32xf32> to vector<48x32xf32>
    %199 = arith.addf %196, %198 : vector<48x32xf32>
    %200 = arith.negf %199 : vector<48x32xf32>
    %201 = math.exp %200 : vector<48x32xf32>
    %cst_65 = arith.constant 1.000000e+00 : f32
    %202 = vector.broadcast %cst_65 : f32 to vector<48x32xf32>
    %203 = arith.addf %202, %201 : vector<48x32xf32>
    %204 = arith.divf %202, %203 : vector<48x32xf32>
    %205 = arith.mulf %199, %204 : vector<48x32xf32>
    %206 = vector.extract_strided_slice %159 {offsets = [1, 0], sizes = [1, 32], strides = [1, 1]} : vector<2x32xf32> to vector<1x32xf32>
    %207 = vector.broadcast %206 : vector<1x32xf32> to vector<48x32xf32>
    %208 = arith.mulf %205, %207 : vector<48x32xf32>
    %cst_66 = arith.constant dense<0.000000e+00> : vector<48xf32>
    %209 = vector.multi_reduction <add>, %208, %cst_66 [1] : vector<48x32xf32> to vector<48xf32>
    %210 = vector.shape_cast %209 : vector<48xf32> to vector<48x1xf32>
    %211 = vector.extract_strided_slice %162 {offsets = [6, 0], sizes = [1, 1], strides = [1, 1]} : vector<7x32xf32> to vector<1x1xf32>
    %212 = vector.broadcast %211 : vector<1x1xf32> to vector<48x1xf32>
    %213 = arith.addf %210, %212 : vector<48x1xf32>
    %214 = vector.extract_strided_slice %159 {offsets = [0, 0], sizes = [1, 32], strides = [1, 1]} : vector<2x32xf32> to vector<1x32xf32>
    %215 = vector.broadcast %214 : vector<1x32xf32> to vector<48x32xf32>
    %216 = arith.mulf %194, %215 : vector<48x32xf32>
    %cst_67 = arith.constant dense<0.000000e+00> : vector<48xf32>
    %217 = vector.multi_reduction <add>, %216, %cst_67 [1] : vector<48x32xf32> to vector<48xf32>
    %218 = vector.shape_cast %217 : vector<48xf32> to vector<48x1xf32>
    %219 = vector.extract_strided_slice %162 {offsets = [5, 0], sizes = [1, 1], strides = [1, 1]} : vector<7x32xf32> to vector<1x1xf32>
    %220 = vector.broadcast %219 : vector<1x1xf32> to vector<48x1xf32>
    %221 = arith.addf %218, %220 : vector<48x1xf32>
    %222 = arith.negf %221 : vector<48x1xf32>
    %223 = math.exp %222 : vector<48x1xf32>
    %cst_68 = arith.constant 1.000000e+00 : f32
    %224 = vector.broadcast %cst_68 : f32 to vector<48x1xf32>
    %225 = arith.addf %224, %223 : vector<48x1xf32>
    %226 = arith.divf %224, %225 : vector<48x1xf32>
    %227 = vector.broadcast %226 : vector<48x1xf32> to vector<48x32xf32>
    %228 = arith.mulf %194, %227 : vector<48x32xf32>
    %229 = arith.truncf %228 : vector<48x32xf32> to vector<48x32xbf16>
    %cst_69 = arith.constant dense<0.000000e+00> : vector<16x32xf32>
    %230 = tpu.matmul %26, %229, %cst_69 {dimension_numbers = #tpu.dot_dimension_numbers<[1], [0], [0], [1], [0, 0, 1, 1], [], []>} : vector<16x48xbf16>, vector<48x32xbf16>, vector<16x32xf32> -> vector<16x32xf32>
    %231 = vector.broadcast %213 : vector<48x1xf32> to vector<48x3xf32>
    %232 = arith.mulf %231, %167 : vector<48x3xf32>
    %cst_70 = arith.constant dense<0.000000e+00> : vector<16x3xf32>
    %233 = tpu.matmul %28, %232, %cst_70 {dimension_numbers = #tpu.dot_dimension_numbers<[1], [0], [0], [1], [0, 0, 1, 1], [], []>, precision = #tpu.contract_precision<fp32>} : vector<16x48xf32>, vector<48x3xf32>, vector<16x3xf32> -> vector<16x3xf32>
    %234 = arith.addf %123, %233 : vector<16x3xf32>
    %235 = tpu.concatenate %141, %230 in 1 : vector<16x32xf32>, vector<16x32xf32> -> vector<16x64xf32>
    %236 = arith.truncf %235 : vector<16x64xf32> to vector<16x64xbf16>
    %cst_71 = arith.constant dense<0.000000e+00> : vector<16x32xf32>
    %237 = tpu.matmul %236, %153, %cst_71 {dimension_numbers = #tpu.dot_dimension_numbers<[1], [0], [0], [1], [0, 0, 1, 1], [], []>} : vector<16x64xbf16>, vector<64x32xbf16>, vector<16x32xf32> -> vector<16x32xf32>
    %238 = vector.extract_strided_slice %162 {offsets = [3, 0], sizes = [1, 32], strides = [1, 1]} : vector<7x32xf32> to vector<1x32xf32>
    %239 = vector.broadcast %238 : vector<1x32xf32> to vector<16x32xf32>
    %240 = arith.addf %237, %239 : vector<16x32xf32>
    %241 = arith.negf %240 : vector<16x32xf32>
    %242 = math.exp %241 : vector<16x32xf32>
    %cst_72 = arith.constant 1.000000e+00 : f32
    %243 = vector.broadcast %cst_72 : f32 to vector<16x32xf32>
    %244 = arith.addf %243, %242 : vector<16x32xf32>
    %245 = arith.divf %243, %244 : vector<16x32xf32>
    %246 = arith.mulf %240, %245 : vector<16x32xf32>
    %247 = arith.truncf %246 : vector<16x32xf32> to vector<16x32xbf16>
    %cst_73 = arith.constant dense<0.000000e+00> : vector<16x32xf32>
    %248 = tpu.matmul %247, %156, %cst_73 {dimension_numbers = #tpu.dot_dimension_numbers<[1], [0], [0], [1], [0, 0, 1, 1], [], []>} : vector<16x32xbf16>, vector<32x32xbf16>, vector<16x32xf32> -> vector<16x32xf32>
    %249 = arith.addf %141, %248 : vector<16x32xf32>
    %250 = vector.extract_strided_slice %162 {offsets = [4, 0], sizes = [1, 32], strides = [1, 1]} : vector<7x32xf32> to vector<1x32xf32>
    %251 = vector.broadcast %250 : vector<1x32xf32> to vector<16x32xf32>
    %252 = arith.addf %249, %251 : vector<16x32xf32>
    %c2_i32 = arith.constant 2 : i32
    %c0_74 = arith.constant 0 : index
    %c0_75 = arith.constant 0 : index
    %253 = vector.load %arg14[%c0_74, %c0_75] : memref<16x32xf32, #tpu.memory_space<vmem>>, vector<16x32xf32>
    tpu.vector_store %arg14[%c0_74, %c0_75], %252 {strides = array<i32>} : memref<16x32xf32, #tpu.memory_space<vmem>>, vector<16x32xf32>,
    %c0_76 = arith.constant 0 : index
    %c0_77 = arith.constant 0 : index
    %254 = vector.load %arg15[%c0_76, %c0_77] : memref<16x3xf32, #tpu.memory_space<vmem>>, vector<16x3xf32>
    tpu.vector_store %arg15[%c0_76, %c0_77], %234 {strides = array<i32>} : memref<16x3xf32, #tpu.memory_space<vmem>>, vector<16x3xf32>,
    return
  }
}

</mosaic_0001>

<bundles_post_ra>
// kernel: tpu_custom_call.1
= control target key start
LH: loop header
LB: loop body
LE: loop exit
PB: predicated region body
PF: predicated region fallthrough
CT: control target
= control target key end

     0   :  { %21 = vsyncpa [#allocation3], 0  ;;  %s8340_s0 = inlined_call_operand.hbm [shape: f32[16,32], index: 0, kind: input, shape index: {}]   ;;  %s8341_s1 = inlined_call_operand.hbm [shape: f32[16,3], index: 1, kind: input, shape index: {}]   ;;  %s8342_s2 = inlined_call_operand.hbm [shape: s32[96,1], index: 2, kind: input, shape index: {}]   ;;  %s8343_s3 = inlined_call_operand.hbm [shape: s32[48,1], index: 3, kind: input, shape index: {}]   ;;  %s8344_s4 = inlined_call_operand.hbm [shape: s32[48,1], index: 4, kind: input, shape index: {}]   ;;  %s8345_s5 = inlined_call_operand.hbm [shape: s32[1,48], index: 5, kind: input, shape index: {}]   ;;  %s8346_s6 = inlined_call_operand.hbm [shape: f32[48,1], index: 6, kind: input, shape index: {}]   ;;  %s8347_s7 = inlined_call_operand.hbm [shape: bf16[2,66,32], index: 7, kind: input, shape index: {}]   ;;  %s8348_s8 = inlined_call_operand.hbm [shape: bf16[2,32,32], index: 8, kind: input, shape index: {}]   ;;  %s8349_s9 = inlined_call_operand.hbm [shape: bf16[2,32,32], index: 9, kind: input, shape index: {}]   ;;  %s8350_s10 = inlined_call_operand.hbm [shape: bf16[2,64,32], index: 10, kind: input, shape index: {}]   ;;  %s8351_s11 = inlined_call_operand.hbm [shape: bf16[2,32,32], index: 11, kind: input, shape index: {}]   ;;  %s8352_s12 = inlined_call_operand.hbm [shape: f32[2,2,32], index: 12, kind: input, shape index: {}]   ;;  %s8353_s13 = inlined_call_operand.hbm [shape: f32[2,7,32], index: 13, kind: input, shape index: {}]   ;;  %s8354_s14 = inlined_call_operand.hbm [shape: f32[16,32], index: 14, kind: output, shape index: {0}]   ;;  %s8355_s15 = inlined_call_operand.hbm [shape: f32[16,3], index: 15, kind: output, shape index: {1}]  }
   0x1   :  { %22 = vsyncpa [#allocation6], 0 }
   0x2   :  { %23 = vsyncpa [#allocation9], 0 }
   0x3   :  { %24 = vsyncpa [#allocation12], 0 }
   0x4   :  { %25 = vsyncpa [#allocation15], 0 }
   0x5   :  { %26 = vsyncpa [#allocation18], 0 }
   0x6   :  { %27 = vsyncpa [#allocation21], 0 }
   0x7   :  { %28 = vsyncpa [#allocation24], 0 }
   0x8   :  { %29 = vsyncpa [#allocation4], 0 }
   0x9   :  { %30 = vsyncpa [#allocation27], 0  ;;  %s7014_s18 = smov [#allocation5]   ;;  %s7015_s20 = smov [#allocation8]  }
   0xa   :  { %s48_s19 = sshll.u32 %s7014_s18, 4  ;;  %s72_s21 = sshll.u32 %s7015_s20, 4  ;;  %s49_s19 = int_to_ptr.vmem [resolvable:$true] %s48_s19  ;;  %s7120_s21 = int_to_ptr.vmem [resolvable:$true] %s72_s21 }
   0xb   :  { %s6642_s24 = scalar_lea.hbm %s8341_s1, 256 }
   0xc   :  { %p6643_p0 = scmp.ne.s32.totalorder %s8341_s1, %s6642_s24  ;;  %p6646_p1 = scmp.lt.u32.totalorder %s6642_s24, %s8341_s1 }
   0xe   :  { %p6648_p2 = pnand %p6646_p1, %p6643_p0 }
  0x10   :  { %6651 = shalt.err (!%p6648_p2)
}
  0x11   :  { %s6652_s29 = scalar_lea.vmem %s49_s19, 256  ;;  %p6657_p4 = scmp.lt.s32.totalorder %s49_s19, %s49_s19 }
  0x12   :  { %p6653_p3 = scmp.ne.s32.totalorder %s49_s19, %s6652_s29  ;;  %p6658_p5 = scmp.lt.s32.totalorder %s6652_s29, %s6652_s29 }
  0x14   :  { %p6659_p6 = por %p6658_p5, %p6657_p4 }
  0x16   :  { %p6660_p7 = pnand %p6659_p6, %p6653_p3 }
  0x18   :  { %6663 = shalt.err (!%p6660_p7)
}
  0x19   :  { %s7016_s30 = smov 128   ;;  %s7017_s16 = smov 8  }
  0x1a   :  { %54 = dma.hbm_to_vmem [thread:$0]  %s8341_s1, 256, %s49_s19, [#allocation6], %s7016_s30, %s7016_s30, %s7017_s16  }
  0x1b   :  { %s6664_s23 = scalar_lea.hbm %s8343_s3, 768 }
  0x1c   :  { %p6665_p8 = scmp.ne.s32.totalorder %s8343_s3, %s6664_s23  ;;  %p6668_p9 = scmp.lt.u32.totalorder %s6664_s23, %s8343_s3 }
  0x1e   :  { %p6670_p10 = pnand %p6668_p9, %p6665_p8 }
  0x20   :  { %6673 = shalt.err (!%p6670_p10)
}
  0x21   :  { %s6674_s28 = scalar_lea.vmem %s7120_s21, 768  ;;  %p6679_p12 = scmp.lt.s32.totalorder %s7120_s21, %s7120_s21 }
  0x22   :  { %p6675_p11 = scmp.ne.s32.totalorder %s7120_s21, %s6674_s28  ;;  %p6680_p13 = scmp.lt.s32.totalorder %s6674_s28, %s6674_s28 }
  0x24   :  { %p6681_p0 = por %p6680_p13, %p6679_p12 }
  0x26   :  { %p6682_p1 = pnand %p6681_p0, %p6675_p11 }
  0x28   :  { %6685 = shalt.err (!%p6682_p1)
}
  0x29   :  { %78 = dma.hbm_to_vmem [thread:$0]  %s8343_s3, 768, %s7120_s21, [#allocation9], %s7016_s30, %s7016_s30, %s7017_s16  }
  0x2a   :  { %s7018_s29 = smov [#allocation11]   ;;  %s7019_s18 = smov [#allocation14]  }
  0x2b   :  { %s97_s17 = sshll.u32 %s7018_s29, 4  ;;  %s118_s20 = sshll.u32 %s7019_s18, 4  ;;  %s98_s17 = int_to_ptr.vmem [resolvable:$true] %s97_s17  ;;  %s7157_s20 = int_to_ptr.vmem [resolvable:$true] %s118_s20 }
  0x2c   :  { %s6686_s24 = scalar_lea.hbm %s8345_s5, 16 }
  0x2d   :  { %p6687_p2 = scmp.ne.s32.totalorder %s8345_s5, %s6686_s24  ;;  %p6690_p3 = scmp.lt.u32.totalorder %s6686_s24, %s8345_s5 }
  0x2f   :  { %p6692_p4 = pnand %p6690_p3, %p6687_p2 }
  0x31   :  { %6695 = shalt.err (!%p6692_p4)
}
  0x32   :  { %s6696_s3 = scalar_lea.vmem %s98_s17, 16  ;;  %s6700_s21 = scalar_lea.vmem %s98_s17, 32 }
  0x33   :  { %p6697_p5 = scmp.ne.s32.totalorder %s98_s17, %s6696_s3  ;;  %p6701_p6 = scmp.lt.s32.totalorder %s98_s17, %s98_s17 }
  0x34   :  { %p6702_p7 = scmp.lt.s32.totalorder %s6700_s21, %s6696_s3 }
  0x36   :  { %p6703_p8 = por %p6702_p7, %p6701_p6 }
  0x38   :  { %p6704_p9 = pnand %p6703_p8, %p6697_p5 }
  0x3a   :  { %6707 = shalt.err (!%p6704_p9)
}
  0x3b   :  { %100 = dma.hbm_to_vmem [thread:$0]  %s8345_s5, 16, %s98_s17, [#allocation12]  }
  0x3c   :  { %s6708_s22 = scalar_lea.hbm %s8347_s7, 1152 }
  0x3d   :  { %p6709_p10 = scmp.ne.s32.totalorder %s8347_s7, %s6708_s22  ;;  %p6712_p11 = scmp.lt.u32.totalorder %s6708_s22, %s8347_s7 }
  0x3f   :  { %p6714_p12 = pnand %p6712_p11, %p6709_p10 }
  0x41   :  { %6717 = shalt.err (!%p6714_p12)
}
  0x42   :  { %s6718_s27 = scalar_lea.vmem %s7157_s20, 1152  ;;  %p6723_p0 = scmp.lt.s32.totalorder %s7157_s20, %s7157_s20 }
  0x43   :  { %p6719_p13 = scmp.ne.s32.totalorder %s7157_s20, %s6718_s27  ;;  %p6724_p1 = scmp.lt.s32.totalorder %s6718_s27, %s6718_s27 }
  0x45   :  { %p6725_p2 = por %p6724_p1, %p6723_p0 }
  0x47   :  { %p6726_p3 = pnand %p6725_p2, %p6719_p13 }
  0x49   :  { %6729 = shalt.err (!%p6726_p3)
}
  0x4a   :  { %s7020_s5 = smov 64   ;;  %s7021_s17 = smov 4  }
  0x4b   :  { %124 = dma.hbm_to_vmem [thread:$0]  %s8347_s7, 1152, %s7157_s20, [#allocation15], %s7020_s5, %s7020_s5, %s7021_s17  }
  0x4c   :  { %s7022_s21 = smov [#allocation17]   ;;  %s7023_s19 = smov [#allocation20]  }
  0x4d   :  { %s142_s1 = sshll.u32 %s7022_s21, 4  ;;  %s166_s29 = sshll.u32 %s7023_s19, 4  ;;  %s143_s1 = int_to_ptr.vmem [resolvable:$true] %s142_s1  ;;  %s7191_s29 = int_to_ptr.vmem [resolvable:$true] %s166_s29 }
  0x4e   :  { %s6730_s23 = scalar_lea.hbm %s8349_s9, 512 }
  0x4f   :  { %p6731_p4 = scmp.ne.s32.totalorder %s8349_s9, %s6730_s23  ;;  %p6734_p5 = scmp.lt.u32.totalorder %s6730_s23, %s8349_s9 }
  0x51   :  { %p6736_p6 = pnand %p6734_p5, %p6731_p4 }
  0x53   :  { %6739 = shalt.err (!%p6736_p6)
}
  0x54   :  { %s6740_s7 = scalar_lea.vmem %s143_s1, 512  ;;  %p6745_p8 = scmp.lt.s32.totalorder %s143_s1, %s143_s1 }
  0x55   :  { %p6741_p7 = scmp.ne.s32.totalorder %s143_s1, %s6740_s7  ;;  %p6746_p9 = scmp.lt.s32.totalorder %s6740_s7, %s6740_s7 }
  0x57   :  { %p6747_p10 = por %p6746_p9, %p6745_p8 }
  0x59   :  { %p6748_p11 = pnand %p6747_p10, %p6741_p7 }
  0x5b   :  { %6751 = shalt.err (!%p6748_p11)
}
  0x5c   :  { %148 = dma.hbm_to_vmem [thread:$0]  %s8349_s9, 512, %s143_s1, [#allocation18], %s7020_s5, %s7020_s5, %s7021_s17  }
  0x5d   :  { %s6752_s19 = scalar_lea.hbm %s8351_s11, 512 }
  0x5e   :  { %p6753_p12 = scmp.ne.s32.totalorder %s8351_s11, %s6752_s19  ;;  %p6756_p13 = scmp.lt.u32.totalorder %s6752_s19, %s8351_s11 }
  0x60   :  { %p6758_p0 = pnand %p6756_p13, %p6753_p12 }
  0x62   :  { %6761 = shalt.err (!%p6758_p0)
}
  0x63   :  { %s6762_s25 = scalar_lea.vmem %s7191_s29, 512  ;;  %p6767_p2 = scmp.lt.s32.totalorder %s7191_s29, %s7191_s29 }
  0x64   :  { %p6763_p1 = scmp.ne.s32.totalorder %s7191_s29, %s6762_s25  ;;  %p6768_p3 = scmp.lt.s32.totalorder %s6762_s25, %s6762_s25 }
  0x66   :  { %p6769_p4 = por %p6768_p3, %p6767_p2 }
  0x68   :  { %p6770_p5 = pnand %p6769_p4, %p6763_p1 }
  0x6a   :  { %6773 = shalt.err (!%p6770_p5)
}
  0x6b   :  { %172 = dma.hbm_to_vmem [thread:$0]  %s8351_s11, 512, %s7191_s29, [#allocation21], %s7020_s5, %s7020_s5, %s7021_s17  }
  0x6c   :  { %s7024_s26 = smov [#allocation2]   ;;  %s7025_s7 = smov [#allocation7]  }
  0x6d   :  { %s36_s27 = sshll.u32 %s7024_s26, 4  ;;  %s60_s20 = sshll.u32 %s7025_s7, 4  ;;  %s37_s27 = int_to_ptr.vmem [resolvable:$true] %s36_s27  ;;  %s7228_s20 = int_to_ptr.vmem [resolvable:$true] %s60_s20 }
  0x6e   :  { %s6774_s21 = scalar_lea.hbm %s8340_s0, 256 }
  0x6f   :  { %p6775_p6 = scmp.ne.s32.totalorder %s8340_s0, %s6774_s21  ;;  %p6778_p7 = scmp.lt.u32.totalorder %s6774_s21, %s8340_s0 }
  0x71   :  { %p6780_p8 = pnand %p6778_p7, %p6775_p6 }
  0x73   :  { %6783 = shalt.err (!%p6780_p8)
}
  0x74   :  { %s6784_s11 = scalar_lea.vmem %s37_s27, 256  ;;  %p6789_p10 = scmp.lt.s32.totalorder %s37_s27, %s37_s27 }
  0x75   :  { %p6785_p9 = scmp.ne.s32.totalorder %s37_s27, %s6784_s11  ;;  %p6790_p11 = scmp.lt.s32.totalorder %s6784_s11, %s6784_s11 }
  0x77   :  { %p6791_p12 = por %p6790_p11, %p6789_p10 }
  0x79   :  { %p6792_p13 = pnand %p6791_p12, %p6785_p9 }
  0x7b   :  { %6795 = shalt.err (!%p6792_p13)
}
  0x7c   :  { %42 = dma.hbm_to_vmem [thread:$0]  %s8340_s0, 256, %s37_s27, [#allocation3], %s7016_s30, %s7016_s30, %s7017_s16  }
  0x7d   :  { %s6796_s1 = scalar_lea.hbm %s8342_s2, 1536 }
  0x7e   :  { %p6797_p0 = scmp.ne.s32.totalorder %s8342_s2, %s6796_s1  ;;  %p6800_p1 = scmp.lt.u32.totalorder %s6796_s1, %s8342_s2 }
  0x80   :  { %p6802_p2 = pnand %p6800_p1, %p6797_p0 }
  0x82   :  { %6805 = shalt.err (!%p6802_p2)
}
  0x83   :  { %s6806_s21 = scalar_lea.vmem %s7228_s20, 1536  ;;  %p6811_p4 = scmp.lt.s32.totalorder %s7228_s20, %s7228_s20 }
  0x84   :  { %p6807_p3 = scmp.ne.s32.totalorder %s7228_s20, %s6806_s21  ;;  %p6812_p5 = scmp.lt.s32.totalorder %s6806_s21, %s6806_s21 }
  0x86   :  { %p6813_p6 = por %p6812_p5, %p6811_p4 }
  0x88   :  { %p6814_p7 = pnand %p6813_p6, %p6807_p3 }
  0x8a   :  { %6817 = shalt.err (!%p6814_p7)
}
  0x8b   :  { %66 = dma.hbm_to_vmem [thread:$0]  %s8342_s2, 1536, %s7228_s20, [#allocation6], %s7016_s30, %s7016_s30, %s7017_s16  }
  0x8c   :  { %s7026_s19 = smov [#allocation10]   ;;  %s7027_s22 = smov [#allocation13]  }
  0x8d   :  { %s84_s18 = sshll.u32 %s7026_s19, 4  ;;  %s106_s23 = sshll.u32 %s7027_s22, 4  ;;  %s85_s18 = int_to_ptr.vmem [resolvable:$true] %s84_s18  ;;  %s7265_s23 = int_to_ptr.vmem [resolvable:$true] %s106_s23 }
  0x8e   :  { %s6818_s24 = scalar_lea.hbm %s8344_s4, 768 }
  0x8f   :  { %p6819_p8 = scmp.ne.s32.totalorder %s8344_s4, %s6818_s24  ;;  %p6822_p9 = scmp.lt.u32.totalorder %s6818_s24, %s8344_s4 }
  0x91   :  { %p6824_p10 = pnand %p6822_p9, %p6819_p8 }
  0x93   :  { %6827 = shalt.err (!%p6824_p10)
}
  0x94   :  { %s6828_s2 = scalar_lea.vmem %s85_s18, 768  ;;  %p6833_p12 = scmp.lt.s32.totalorder %s85_s18, %s85_s18 }
  0x95   :  { %p6829_p11 = scmp.ne.s32.totalorder %s85_s18, %s6828_s2  ;;  %p6834_p13 = scmp.lt.s32.totalorder %s6828_s2, %s6828_s2 }
  0x97   :  { %p6835_p0 = por %p6834_p13, %p6833_p12 }
  0x99   :  { %p6836_p1 = pnand %p6835_p0, %p6829_p11 }
  0x9b   :  { %6839 = shalt.err (!%p6836_p1)
}
  0x9c   :  { %90 = dma.hbm_to_vmem [thread:$0]  %s8344_s4, 768, %s85_s18, [#allocation9], %s7016_s30, %s7016_s30, %s7017_s16  }
  0x9d   :  { %s6840_s21 = scalar_lea.hbm %s8346_s6, 768 }
  0x9e   :  { %p6841_p2 = scmp.ne.s32.totalorder %s8346_s6, %s6840_s21  ;;  %p6844_p3 = scmp.lt.u32.totalorder %s6840_s21, %s8346_s6 }
  0xa0   :  { %p6846_p4 = pnand %p6844_p3, %p6841_p2 }
  0xa2   :  { %6849 = shalt.err (!%p6846_p4)
}
  0xa3   :  { %s6850_s11 = scalar_lea.vmem %s7265_s23, 768  ;;  %p6855_p6 = scmp.lt.s32.totalorder %s7265_s23, %s7265_s23 }
  0xa4   :  { %p6851_p5 = scmp.ne.s32.totalorder %s7265_s23, %s6850_s11  ;;  %p6856_p7 = scmp.lt.s32.totalorder %s6850_s11, %s6850_s11 }
  0xa6   :  { %p6857_p8 = por %p6856_p7, %p6855_p6 }
  0xa8   :  { %p6858_p9 = pnand %p6857_p8, %p6851_p5 }
  0xaa   :  { %6861 = shalt.err (!%p6858_p9)
}
  0xab   :  { %112 = dma.hbm_to_vmem [thread:$0]  %s8346_s6, 768, %s7265_s23, [#allocation12], %s7016_s30, %s7016_s30, %s7017_s16  }
  0xac   :  { %s7028_s29 = smov [#allocation16]   ;;  %s7029_s25 = smov [#allocation19]  }
  0xad   :  { %s130_s24 = sshll.u32 %s7028_s29, 4  ;;  %s154_s9 = sshll.u32 %s7029_s25, 4  ;;  %s131_s24 = int_to_ptr.vmem [resolvable:$true] %s130_s24  ;;  %s7302_s9 = int_to_ptr.vmem [resolvable:$true] %s154_s9 }
  0xae   :  { %s6862_s2 = scalar_lea.hbm %s8348_s8, 512 }
  0xaf   :  { %p6863_p10 = scmp.ne.s32.totalorder %s8348_s8, %s6862_s2  ;;  %p6866_p11 = scmp.lt.u32.totalorder %s6862_s2, %s8348_s8 }
  0xb1   :  { %p6868_p12 = pnand %p6866_p11, %p6863_p10 }
  0xb3   :  { %6871 = shalt.err (!%p6868_p12)
}
  0xb4   :  { %s6872_s6 = scalar_lea.vmem %s131_s24, 512  ;;  %p6877_p0 = scmp.lt.s32.totalorder %s131_s24, %s131_s24 }
  0xb5   :  { %p6873_p13 = scmp.ne.s32.totalorder %s131_s24, %s6872_s6  ;;  %p6878_p1 = scmp.lt.s32.totalorder %s6872_s6, %s6872_s6 }
  0xb7   :  { %p6879_p2 = por %p6878_p1, %p6877_p0 }
  0xb9   :  { %p6880_p3 = pnand %p6879_p2, %p6873_p13 }
  0xbb   :  { %6883 = shalt.err (!%p6880_p3)
}
  0xbc   :  { %136 = dma.hbm_to_vmem [thread:$0]  %s8348_s8, 512, %s131_s24, [#allocation15], %s7020_s5, %s7020_s5, %s7021_s17  }
  0xbd   :  { %s6884_s19 = scalar_lea.hbm %s8350_s10, 1024 }
  0xbe   :  { %p6885_p4 = scmp.ne.s32.totalorder %s8350_s10, %s6884_s19  ;;  %p6888_p5 = scmp.lt.u32.totalorder %s6884_s19, %s8350_s10 }
  0xc0   :  { %p6890_p6 = pnand %p6888_p5, %p6885_p4 }
  0xc2   :  { %6893 = shalt.err (!%p6890_p6)
}
  0xc3   :  { %s6894_s29 = scalar_lea.vmem %s7302_s9, 1024  ;;  %p6899_p8 = scmp.lt.s32.totalorder %s7302_s9, %s7302_s9 }
  0xc4   :  { %p6895_p7 = scmp.ne.s32.totalorder %s7302_s9, %s6894_s29  ;;  %p6900_p9 = scmp.lt.s32.totalorder %s6894_s29, %s6894_s29 }
  0xc6   :  { %p6901_p10 = por %p6900_p9, %p6899_p8 }
  0xc8   :  { %p6902_p11 = pnand %p6901_p10, %p6895_p7 }
  0xca   :  { %6905 = shalt.err (!%p6902_p11)
}
  0xcb   :  { %160 = dma.hbm_to_vmem [thread:$0]  %s8350_s10, 1024, %s7302_s9, [#allocation18], %s7020_s5, %s7020_s5, %s7021_s17  }
  0xcc   :  { %s7030_s25 = smov [#allocation22]   ;;  %s6906_s20 = scalar_lea.hbm %s8352_s12, 64 }
  0xcd   :  { %s178_s1 = sshll.u32 %s7030_s25, 4  ;;  %p6907_p12 = scmp.ne.s32.totalorder %s8352_s12, %s6906_s20  ;;  %s179_s1 = int_to_ptr.vmem [resolvable:$true] %s178_s1 }
  0xce   :  { %p6910_p13 = scmp.lt.u32.totalorder %s6906_s20, %s8352_s12 }
  0xd0   :  { %p6912_p0 = pnand %p6910_p13, %p6907_p12 }
  0xd2   :  { %6915 = shalt.err (!%p6912_p0)
}
  0xd3   :  { %s6916_s23 = scalar_lea.vmem %s179_s1, 64  ;;  %p6921_p2 = scmp.lt.s32.totalorder %s179_s1, %s179_s1 }
  0xd4   :  { %p6917_p1 = scmp.ne.s32.totalorder %s179_s1, %s6916_s23  ;;  %p6922_p3 = scmp.lt.s32.totalorder %s6916_s23, %s6916_s23 }
  0xd6   :  { %p6923_p4 = por %p6922_p3, %p6921_p2 }
  0xd8   :  { %p6924_p5 = pnand %p6923_p4, %p6917_p1 }
  0xda   :  { %6927 = shalt.err (!%p6924_p5)
}
  0xdb   :  { %s7031_s10 = smov 32   ;;  %s7032_s5 = smov 2  }
  0xdc   :  { %184 = dma.hbm_to_vmem [thread:$0]  %s8352_s12, 64, %s179_s1, [#allocation21], %s7031_s10, %s7031_s10, %s7032_s5  }
  0xdd   :  { %s7033_s21 = smov [#allocation23]   ;;  %s6928_s22 = scalar_lea.hbm %s8353_s13, 256 }
  0xde   :  { %s190_s0 = sshll.u32 %s7033_s21, 4  ;;  %p6929_p6 = scmp.ne.s32.totalorder %s8353_s13, %s6928_s22  ;;  %s191_s0 = int_to_ptr.vmem [resolvable:$true] %s190_s0 }
  0xdf   :  { %p6932_p7 = scmp.lt.u32.totalorder %s6928_s22, %s8353_s13 }
  0xe1   :  { %p6934_p8 = pnand %p6932_p7, %p6929_p6 }
  0xe3   :  { %6937 = shalt.err (!%p6934_p8)
}
  0xe4   :  { %s6938_s8 = scalar_lea.vmem %s191_s0, 256  ;;  %p6943_p10 = scmp.lt.s32.totalorder %s191_s0, %s191_s0 }
  0xe5   :  { %p6939_p9 = scmp.ne.s32.totalorder %s191_s0, %s6938_s8  ;;  %p6944_p11 = scmp.lt.s32.totalorder %s6938_s8, %s6938_s8 }
  0xe7   :  { %p6945_p12 = por %p6944_p11, %p6943_p10 }
  0xe9   :  { %p6946_p13 = pnand %p6945_p12, %p6939_p9 }
  0xeb   :  { %6949 = shalt.err (!%p6946_p13)
}
  0xec   :  { %196 = dma.hbm_to_vmem [thread:$0]  %s8353_s13, 256, %s191_s0, [#allocation24], %s7016_s30, %s7016_s30, %s7017_s16  }
  0xed   :  { %6994 = dma.done.wait [#allocation3], 256  }
  0xee   :  { %6995 = vsyncadd [#allocation3], 4294967040 }
  0xef   :  { %6996 = dma.done.wait [#allocation6], 1792  }
  0xf0   :  { %6997 = vsyncadd [#allocation6], 4294965504 }
  0xf1   :  { %6998 = dma.done.wait [#allocation9], 1536  }
  0xf2   :  { %6999 = vsyncadd [#allocation9], 4294965760 }
  0xf3   :  { %7000 = dma.done.wait [#allocation12], 784  }
  0xf4   :  { %7001 = vsyncadd [#allocation12], 4294966512 }
  0xf5   :  { %7002 = dma.done.wait [#allocation15], 1664  }
  0xf6   :  { %7003 = vsyncadd [#allocation15], 4294965632 }
  0xf7   :  { %7004 = dma.done.wait [#allocation18], 1536  }
  0xf8   :  { %7005 = vsyncadd [#allocation18], 4294965760 }
  0xf9   :  { %7006 = dma.done.wait [#allocation21], 576  }
  0xfa   :  { %7007 = vsyncadd [#allocation21], 4294966720 }
  0xfb   :  { %7008 = dma.done.wait [#allocation24], 256  }
  0xfc   :  { %7009 = vsyncadd [#allocation24], 4294967040  ;;  %v7034_v0 = vmov 0   ;;  %v339_v1 = vld [vmem:[#allocation8 + $0x8] sm:$0xff]  ;;  %v338_v2 = vld [vmem:[#allocation8] sm:$0xff]  ;;  %v8357_v33 = vmov 0.0   ;;  %v8356_v45 = vlaneseq }
  0xfd   :  { %6319 = vset.pattern.permute.xlu1 %v7034_v0  ;;  %6318 = vset.pattern.permute.xlu0 %v7034_v0  ;;  %v381_v3 = vld [vmem:[#allocation10 + $0x8] sm:$0xff]  ;;  %v380_v4 = vld [vmem:[#allocation10] sm:$0xff]  ;;  %v382_v5 = vld [vmem:[#allocation10 + $0x10] sm:$0xff]  ;;  %vm479_vm2 = vcmask 130048   ;;  %s7036_s13 = smov 65   ;;  %s7038_s25 = smov [#allocation25]  }
  0xfe   :  { %348 = vperm.xlu1 %6319, %v339_v1   ;;  %345 = vperm.xlu0 %6318, %v338_v2   ;;  %v340_v6 = vld [vmem:[#allocation8 + $0x10] sm:$0xff]  ;;  %v383_v7 = vld [vmem:[#allocation10 + $0x18] sm:$0xff]  ;;  %v341_v8 = vld [vmem:[#allocation8 + $0x18] sm:$0xff]  ;;  %v7381_v46 = vand.u32 127, %v8356_v45  ;;  %s5020_s1 = sshll.u32 %s7038_s25, 4  ;;  %s5021_s1 = int_to_ptr.vmem [resolvable:$true] %s5020_s1 }
  0xff   :  { %v384_v9 = vld [vmem:[#allocation10 + $0x20] sm:$0xff]  ;;  %v342_v10 = vld [vmem:[#allocation8 + $0x20] sm:$0xff]  ;;  %v446_v12 = vld [vmem:[#allocation5 + $0x8] sm:$0xff]  ;;  %s6950_s26 = scalar_lea.vmem %s5021_s1, 256  ;;  %p6955_p1 = scmp.lt.s32.totalorder %s5021_s1, %s5021_s1 }
 0x100   :  { %v445_v11 = vld [vmem:[#allocation5] sm:$0xff]  ;;  %v601_v14 = vand.u32 4294901760, %v446_v12  ;;  %v385_v16 = vld [vmem:[#allocation10 + $0x28] sm:$0xff]  ;;  %v343_v17 = vld [vmem:[#allocation8 + $0x28] sm:$0xff]  ;;  %p6951_p0 = scmp.ne.s32.totalorder %s5021_s1, %s6950_s26  ;;  %p6956_p2 = scmp.lt.s32.totalorder %s6950_s26, %s6950_s26 }
 0x101   :  { %v598_v13 = vand.u32 4294901760, %v445_v11  ;;  %v249_v18 = vld [vmem:[#allocation7 + $0x8] sm:$0xff]  ;;  %v248_v19 = vld [vmem:[#allocation7] sm:$0xff]  ;;  %v251_v20 = vld [vmem:[#allocation7 + $0x18] sm:$0xff] }
 0x102   :  { %390 = vperm.xlu1 %6319, %v381_v3   ;;  %387 = vperm.xlu0 %6318, %v380_v4   ;;  %v250_v21 = vld [vmem:[#allocation7 + $0x10] sm:$0xff]  ;;  %v443_v22 = vld [vmem:[#allocation2] sm:$0xff]  ;;  %v444_v23 = vld [vmem:[#allocation2 + $0x8] sm:$0xff]  ;;  %v733_v25 = vsub.f32 %v446_v12, %v601_v14  ;;  %p6957_p3 = por %p6956_p2, %p6955_p1 }
 0x103   :  { %v7368_v15 = vpack.c.bf16 %v601_v14, %v598_v13  ;;  %v726_v24 = vsub.f32 %v445_v11, %v598_v13  ;;  %v478_v26 = vpack.c.bf16 %v444_v23, %v443_v22  ;;  %v253_v29 = vld [vmem:[#allocation7 + $0x28] sm:$0xff]  ;;  %v252_v30 = vld [vmem:[#allocation7 + $0x20] sm:$0xff]  ;;  %v255_v36 = vld [vmem:[#allocation7 + $0x38] sm:$0xff] }
 0x104   :  { %v734_v28 = vand.u32 4294901760, %v733_v25  ;;  %v254_v37 = vld [vmem:[#allocation7 + $0x30] sm:$0xff]  ;;  %v257_v39 = vld [vmem:[#allocation7 + $0x48] sm:$0xff]  ;;  %v256_v40 = vld [vmem:[#allocation7 + $0x40] sm:$0xff]  ;;  %p6958_p4 = pnand %p6957_p3, %p6951_p0 }
 0x105   :  { %6011 = vmatprep.subr.bf16.mxu1 %v7368_v15  ;;  %v727_v27 = vand.u32 4294901760, %v726_v24  ;;  %5478 = vmatprep.subr.bf16.mxu0 %v478_v26  ;;  %v259_v41 = vld [vmem:[#allocation7 + $0x58] sm:$0xff]  ;;  %v258_v42 = vld [vmem:[#allocation7 + $0x50] sm:$0xff]  ;;  %v7376_v43 = vpack.c.bf16 %v733_v25, %v726_v24 }
 0x106   :  { %393 = vperm.xlu1 %6319, %v382_v5   ;;  %351 = vperm.xlu0 %6318, %v340_v6   ;;  %v735_v32 = vsub.f32 %v733_v25, %v734_v28 }
 0x107   :  { %6013 = vmatpush3.bf16.msra.mxu1 %v7368_v15  ;;  %5479 = vmatpush3.bf16.msra.mxu0 %v478_v26  ;;  %v728_v31 = vsub.f32 %v726_v24, %v727_v27  ;;  %v7378_v44 = vpack.c.bf16 %v734_v28, %v727_v27 }
 0x108   :  { %5570 = vmatprep.subr.bf16.mxu0 %v8357_v33  ;;  %v736_v35 = vand.u32 4294901760, %v735_v32 }
 0x109   :  { %v729_v34 = vand.u32 4294901760, %v728_v31 }
 0x10a   :  { %396 = vperm.xlu1 %6319, %v383_v7   ;;  %354 = vperm.xlu0 %6318, %v341_v8  }
 0x10b   :  { %v7373_v38 = vpack.c.bf16 %v736_v35, %v729_v34 }
 0x10d   :  { %6015 = vmatprep.subr.bf16.mxu1 %v7373_v38 }
 0x10e   :  { %399 = vperm.xlu1 %6319, %v384_v9   ;;  %357 = vperm.xlu0 %6318, %v342_v10  }
 0x112   :  { %402 = vperm.xlu1 %6319, %v385_v16   ;;  %360 = vperm.xlu0 %6318, %v343_v17  }
 0x116   :  { %264 = vperm.xlu1 %6319, %v249_v18   ;;  %261 = vperm.xlu0 %6318, %v248_v19  }
 0x11a   :  { %270 = vperm.xlu1 %6319, %v251_v20   ;;  %267 = vperm.xlu0 %6318, %v250_v21  }
 0x11e   :  { %276 = vperm.xlu1 %6319, %v253_v29   ;;  %273 = vperm.xlu0 %6318, %v252_v30  }
 0x122   :  { %282 = vperm.xlu1 %6319, %v255_v36   ;;  %279 = vperm.xlu0 %6318, %v254_v37  }
 0x126   :  { %288 = vperm.xlu1 %6319, %v257_v39   ;;  %285 = vperm.xlu0 %6318, %v256_v40  }
 0x12a   :  { %294 = vperm.xlu1 %6319, %v259_v41   ;;  %291 = vperm.xlu0 %6318, %v258_v42  }
 0x17d   :  { %v349_v47 = vpop.permute.xlu1 %348  ;;  %v346_v48 = vpop.permute.xlu0 %345 }
 0x17e   :  { %vm363_vm0 = vcmp.eq.s32.totalorder %v349_v47, %v7381_v46  ;;  %vm362_vm1 = vcmp.eq.s32.totalorder %v346_v48, %v7381_v46 }
 0x17f   :  { %v5068_v51 = vsel %vm363_vm0, 1.0, %v8357_v33  ;;  %v5067_v52 = vsel %vm362_vm1, 1.0, %v8357_v33 }
 0x181   :  { %v391_v49 = vpop.permute.xlu1 %390  ;;  %v388_v50 = vpop.permute.xlu0 %387 }
 0x182   :  { %vm405_vm3 = vcmp.eq.s32.totalorder %v391_v49, %v7381_v46  ;;  %vm404_vm4 = vcmp.eq.s32.totalorder %v388_v50, %v7381_v46 }
 0x183   :  { %v5074_v53 = vsel %vm405_vm3, 1.0, %v8357_v33  ;;  %v5073_v54 = vsel %vm404_vm4, 1.0, %v8357_v33 }
 0x184   :  { %v423_v55 = vsub.f32 %v5068_v51, %v5074_v53  ;;  %v422_v56 = vsub.f32 %v5067_v52, %v5073_v54 }
 0x185   :  { %v394_v57 = vpop.permute.xlu1 %393  ;;  %v352_v58 = vpop.permute.xlu0 %351 }
 0x186   :  { %v583_v59 = vsel %vm479_vm2, %v423_v55, 0  ;;  %v580_v60 = vsel %vm479_vm2, %v422_v56, 0  ;;  %vm406_vm5 = vcmp.eq.s32.totalorder %v394_v57, %v7381_v46  ;;  %vm364_vm6 = vcmp.eq.s32.totalorder %v352_v58, %v7381_v46 }
 0x187   :  { %v7395_v61 = vand.u32 4294901760, %v583_v59  ;;  %v7397_v62 = vand.u32 4294901760, %v580_v60  ;;  %v5075_v63 = vsel %vm406_vm5, 1.0, %v8357_v33  ;;  %v5069_v0 = vsel %vm364_vm6, 1.0, %v8357_v33 }
 0x188   :  { %v424_v1 = vsub.f32 %v5069_v0, %v5075_v63 }
 0x189   :  { %v7402_v2 = vsub.f32 %v583_v59, %v7395_v61  ;;  %v7405_v3 = vsub.f32 %v580_v60, %v7397_v62  ;;  %v397_v4 = vpop.permute.xlu1 %396  ;;  %v355_v5 = vpop.permute.xlu0 %354 }
 0x18a   :  { %v586_v6 = vsel %vm479_vm2, %v424_v1, 0  ;;  %vm407_vm7 = vcmp.eq.s32.totalorder %v397_v4, %v7381_v46  ;;  %vm365_vm8 = vcmp.eq.s32.totalorder %v355_v5, %v7381_v46 }
 0x18b   :  { %v7410_v7 = vand.u32 4294901760, %v586_v6  ;;  %v5076_v8 = vsel %vm407_vm7, 1.0, %v8357_v33  ;;  %v5070_v9 = vsel %vm365_vm8, 1.0, %v8357_v33  ;;  %v7415_v10 = vand.u32 4294901760, %v7405_v3 }
 0x18c   :  { %v425_v11 = vsub.f32 %v5070_v9, %v5076_v8  ;;  %v7418_v12 = vand.u32 4294901760, %v7402_v2 }
 0x18d   :  { %8387 = vst [vmem:[#allocation38_spill] sm:$0xff] %v7415_v10  ;;  %v7421_v13 = vsub.f32 %v586_v6, %v7410_v7  ;;  %v400_v14 = vpop.permute.xlu1 %399  ;;  %v358_v16 = vpop.permute.xlu0 %357  ;;  %v667_v17 = vsub.f32 %v7405_v3, %v7415_v10 }
 0x18e   :  { %8388 = vst [vmem:[#allocation39_spill] sm:$0xff] %v7418_v12  ;;  %v589_v18 = vsel %vm479_vm2, %v425_v11, 0  ;;  %vm408_vm9 = vcmp.eq.s32.totalorder %v400_v14, %v7381_v46  ;;  %vm366_vm10 = vcmp.eq.s32.totalorder %v358_v16, %v7381_v46  ;;  %v677_v19 = vsub.f32 %v7402_v2, %v7418_v12 }
 0x18f   :  { %v7430_v20 = vand.u32 4294901760, %v589_v18  ;;  %v5077_v21 = vsel %vm408_vm9, 1.0, %v8357_v33  ;;  %v5071_v22 = vsel %vm366_vm10, 1.0, %v8357_v33  ;;  %v7434_v23 = vand.u32 4294901760, %v667_v17 }
 0x190   :  { %v426_v24 = vsub.f32 %v5071_v22, %v5077_v21  ;;  %v7436_v25 = vand.u32 4294901760, %v677_v19  ;;  %v7439_v26 = vand.u32 4294901760, %v7421_v13  ;;  %vm1277_vm10 = vcmask 23552  }
 0x191   :  { %v7442_v27 = vsub.f32 %v589_v18, %v7430_v20  ;;  %v403_v28 = vpop.permute.xlu1 %402  ;;  %5496 = vmatprep.mubr.f32.mxu1 %v7434_v23  ;;  %v361_v29 = vpop.permute.xlu0 %360 }
 0x192   :  { %8389 = vst [vmem:[#allocation40_spill] sm:$0xff] %v7439_v26  ;;  %v592_v30 = vsel %vm479_vm2, %v426_v24, 0  ;;  %vm409_vm11 = vcmp.eq.s32.totalorder %v403_v28, %v7381_v46  ;;  %vm367_vm12 = vcmp.eq.s32.totalorder %v361_v29, %v7381_v46  ;;  %5497 = vmatmul.mubr.f32.vlgmr.msra.gmra.mrb[0].mxu1 %v7436_v25  ;;  %v687_v31 = vsub.f32 %v7421_v13, %v7439_v26 }
 0x193   :  { %v7451_v32 = vand.u32 4294901760, %v592_v30  ;;  %v5078_v34 = vsel %vm409_vm11, 1.0, %v8357_v33  ;;  %v5072_v35 = vsel %vm367_vm12, 1.0, %v8357_v33  ;;  %v7456_v36 = vand.u32 4294901760, %v7442_v27  ;;  %6017 = vmatpush3.bf16.msra.mxu1 %v7373_v38 }
 0x194   :  { %v427_v37 = vsub.f32 %v5072_v35, %v5078_v34  ;;  %v7459_v39 = vand.u32 4294901760, %v687_v31  ;;  %6019 = vmatprep.subr.bf16.mxu1 %v7376_v43  ;;  %vm1451_vm11 = vcmask 1040384   ;;  %vm7037_vm12 = vmmov 0  }
 0x195   :  { %8390 = vst [vmem:[#allocation41_spill] sm:$0xff] %v7456_v36  ;;  %v7463_v40 = vsub.f32 %v592_v30, %v7451_v32  ;;  %v265_v41 = vpop.permute.xlu1 %264  ;;  %v262_v42 = vpop.permute.xlu0 %261  ;;  %v697_v47 = vsub.f32 %v7442_v27, %v7456_v36 }
 0x196   :  { %v595_v48 = vsel %vm479_vm2, %v427_v37, 0  ;;  %5499 = vmatprep.mubr.f32.mxu1 %v7459_v39  ;;  %vm297_vm13 = vcmp.eq.s32.totalorder %v265_v41, %v7381_v46  ;;  %vm296_vm14 = vcmp.eq.s32.totalorder %v262_v42, %v7381_v46 }
 0x197   :  { %v7471_v38 = vand.u32 4294901760, %v595_v48  ;;  %v5056_v49 = vsel %vm297_vm13, 1.0, %v8357_v33  ;;  %v5055_v50 = vsel %vm296_vm14, 1.0, %v8357_v33  ;;  %v7475_v51 = vand.u32 4294901760, %v697_v47 }
 0x198   :  { %v7477_v52 = vpack.c.bf16 %v5056_v49, %v5055_v50  ;;  %v7480_v53 = vand.u32 4294901760, %v7463_v40  ;;  %vm1386_vm13 = vcmask 261120   ;;  %vm1393_vm14 = vcmask 523264  }
 0x199   :  { %v7483_v54 = vsub.f32 %v595_v48, %v7471_v38  ;;  %5500 = vmatmul.mubr.f32.gmra.mrb[2].mxu1 %v7475_v51  ;;  %v271_v55 = vpop.permute.xlu1 %270  ;;  %v268_v56 = vpop.permute.xlu0 %267 }
 0x19a   :  { %8391 = vst [vmem:[#allocation42_spill] sm:$0xff] %v7480_v53  ;;  %vm299_vm15 = vcmp.eq.s32.totalorder %v271_v55, %v7381_v46  ;;  %vm298_vm0 = vcmp.eq.s32.totalorder %v268_v56, %v7381_v46  ;;  %5480 = vmatprep.mubr.msk.bf16.mxu0 %vm479_vm2, %v7477_v52  ;;  %v707_v57 = vsub.f32 %v7463_v40, %v7480_v53 }
 0x19b   :  { %8392 = vst [vmem:[#allocation43_spill] sm:$0xff] %v7483_v54  ;;  %v5058_v58 = vsel %vm299_vm15, 1.0, %v8357_v33  ;;  %v5057_v59 = vsel %vm298_vm0, 1.0, %v8357_v33  ;;  %v7495_v60 = vand.u32 4294901760, %v7483_v54  ;;  %vm1400_vm15 = vcmask 531456  }
 0x19c   :  { %v7497_v63 = vpack.c.bf16 %v5058_v58, %v5057_v59  ;;  %v7499_v0 = vand.u32 4294901760, %v707_v57 }
 0x19d   :  { %8393 = vst [vmem:[#allocation44_spill] sm:$0xff] %v7495_v60  ;;  %v277_v1 = vpop.permute.xlu1 %276  ;;  %v274_v4 = vpop.permute.xlu0 %273  ;;  %v717_v5 = vsub.f32 %v7483_v54, %v7495_v60 }
 0x19e   :  { %5502 = vmatprep.mubr.f32.mxu1 %v7499_v0  ;;  %vm301_vm1 = vcmp.eq.s32.totalorder %v277_v1, %v7381_v46  ;;  %vm300_vm3 = vcmp.eq.s32.totalorder %v274_v4, %v7381_v46  ;;  %5481 = vmatmul.mubr.msk.bf16.vlgmr.msra.gmra.mrb[0].mxu0 %vm479_vm2, %v7497_v63 }
 0x19f   :  { %v5060_v6 = vsel %vm301_vm1, 1.0, %v8357_v33  ;;  %v5059_v8 = vsel %vm300_vm3, 1.0, %v8357_v33  ;;  %v7510_v9 = vand.u32 4294901760, %v717_v5 }
 0x1a0   :  { %v7512_v11 = vpack.c.bf16 %v5060_v6, %v5059_v8 }
 0x1a1   :  { %5503 = vmatmul.mubr.f32.gmra.mrb[4].mxu1 %v7510_v9  ;;  %v283_v14 = vpop.permute.xlu1 %282  ;;  %v280_v16 = vpop.permute.xlu0 %279 }
 0x1a2   :  { %vm303_vm4 = vcmp.eq.s32.totalorder %v283_v14, %v7381_v46  ;;  %vm302_vm5 = vcmp.eq.s32.totalorder %v280_v16, %v7381_v46  ;;  %5484 = vmatprep.mubr.msk.bf16.mxu0 %vm479_vm2, %v7512_v11  ;;  %5509 = vmatprep.mubr.f32.mxu1 %v7397_v62 }
 0x1a3   :  { %v5062_v17 = vsel %vm303_vm4, 1.0, %v8357_v33  ;;  %v5061_v18 = vsel %vm302_vm5, 1.0, %v8357_v33  ;;  %vm1441_vm5 = vcmask 539648  }
 0x1a4   :  { %v7522_v19 = vpack.c.bf16 %v5062_v17, %v5061_v18 }
 0x1a5   :  { %5510 = vmatmul.mubr.f32.vlgmr.msra.gmra.mrb[0].mxu1 %v7395_v61  ;;  %v289_v21 = vpop.permute.xlu1 %288  ;;  %v286_v22 = vpop.permute.xlu0 %285 }
 0x1a6   :  { %vm305_vm6 = vcmp.eq.s32.totalorder %v289_v21, %v7381_v46  ;;  %vm304_vm7 = vcmp.eq.s32.totalorder %v286_v22, %v7381_v46  ;;  %5485 = vmatmul.mubr.msk.bf16.gmra.mrb[4].mxu0 %vm479_vm2, %v7522_v19  ;;  %5512 = vmatprep.mubr.f32.mxu1 %v7410_v7 }
 0x1a7   :  { %v5064_v24 = vsel %vm305_vm6, 1.0, %v8357_v33  ;;  %v5063_v28 = vsel %vm304_vm7, 1.0, %v8357_v33  ;;  %6021 = vmatpush3.bf16.msra.mxu1 %v7376_v43 }
 0x1a8   :  { %v7533_v29 = vpack.c.bf16 %v5064_v24, %v5063_v28  ;;  %6023 = vmatprep.subr.bf16.mxu1 %v7368_v15 }
 0x1a9   :  { %5513 = vmatmul.mubr.f32.gmra.mrb[2].mxu1 %v7430_v20  ;;  %v295_v30 = vpop.permute.xlu1 %294  ;;  %v292_v31 = vpop.permute.xlu0 %291 }
 0x1aa   :  { %vm307_vm8 = vcmp.eq.s32.totalorder %v295_v30, %v7381_v46  ;;  %vm306_vm9 = vcmp.eq.s32.totalorder %v292_v31, %v7381_v46  ;;  %5488 = vmatprep.mubr.msk.bf16.mxu0 %vm479_vm2, %v7533_v29  ;;  %5515 = vmatprep.mubr.f32.mxu1 %v7451_v32  ;;  %v242_v31 = vld [vmem:[#allocation13 + $0x10] sm:$0xff] }
 0x1ab   :  { %v5066_v34 = vsel %vm307_vm8, 1.0, %v8357_v33  ;;  %v5065_v43 = vsel %vm306_vm9, 1.0, %v8357_v33 }
 0x1ac   :  { %v7544_v35 = vpack.c.bf16 %v5066_v34, %v5065_v43  ;;  %v243_v34 = vld [vmem:[#allocation13 + $0x18] sm:$0xff]  ;;  %v6375_v43 = vld [vmem:[#allocation14] sm:$0xff]  }
 0x1ad   :  { %5516 = vmatmul.mubr.f32.gmra.mrb[4].mxu1 %v7471_v38  ;;  %5571 = vmatpush3.bf16.msra.mxu0 %v6375_v43 }
 0x1ae   :  { %5489 = vmatmul.mubr.msk.bf16.gmra.mrb[8].mxu0 %vm479_vm2, %v7544_v35  ;;  %5522 = vmatprep.mubr.f32.mxu1 %v7405_v3 }
 0x1af   :  { %5572 = vmatprep.subr.bf16.mxu0 %v8357_v33  ;;  %5580 = vmatprep.mubr.msk.bf16.mxu0 %vm7037_vm12, %v8357_v33 }
 0x1b1   :  { %5523 = vmatmul.mubr.f32.vlgmr.msra.gmra.mrb[0].mxu1 %v7402_v2 }
 0x1b2   :  { %5525 = vmatprep.mubr.f32.mxu1 %v7421_v13  ;;  %6025 = vmatpush3.bf16.msra.mxu1 %v7368_v15 }
 0x1b3   :  { %6027 = vmatprep.subr.bf16.mxu1 %v7378_v44 }
 0x1b5   :  { %5526 = vmatmul.mubr.f32.gmra.mrb[2].mxu1 %v7442_v27 }
 0x1b6   :  { %5528 = vmatprep.mubr.f32.mxu1 %v7463_v40 }
 0x1b9   :  { %5529 = vmatmul.mubr.f32.gmra.mrb[4].mxu1 %v7483_v54 }
 0x1ba   :  { %5535 = vmatprep.mubr.f32.mxu1 %v7415_v10 }
 0x1bd   :  { %5536 = vmatmul.mubr.f32.vlgmr.msra.gmra.mrb[0].mxu1 %v7418_v12 }
 0x1be   :  { %5538 = vmatprep.mubr.f32.mxu1 %v7439_v26  ;;  %6029 = vmatpush3.bf16.msra.mxu1 %v7378_v44 }
 0x1bf   :  { %6031 = vmatprep.subr.bf16.mxu1 %v7368_v15 }
 0x1c1   :  { %5539 = vmatmul.mubr.f32.gmra.mrb[2].mxu1 %v7456_v36 }
 0x1c2   :  { %5541 = vmatprep.mubr.f32.mxu1 %v7480_v53 }
 0x1c5   :  { %5542 = vmatmul.mubr.f32.gmra.mrb[4].mxu1 %v7495_v60 }
 0x1c6   :  { %5548 = vmatprep.mubr.f32.mxu1 %v7397_v62 }
 0x1c9   :  { %5549 = vmatmul.mubr.f32.vlgmr.msra.gmra.mrb[0].mxu1 %v7395_v61 }
 0x1ca   :  { %5551 = vmatprep.mubr.f32.mxu1 %v7410_v7  ;;  %6033 = vmatpush3.bf16.msra.mxu1 %v7368_v15 }
 0x1cb   :  { %5624 = vmatprep.subr.bf16.mxu1 %v8357_v33 }
 0x1cd   :  { %5552 = vmatmul.mubr.f32.gmra.mrb[2].mxu1 %v7430_v20 }
 0x1ce   :  { %5554 = vmatprep.mubr.f32.mxu1 %v7451_v32 }
 0x1d1   :  { %5555 = vmatmul.mubr.f32.gmra.mrb[4].mxu1 %v7471_v38 }
 0x1d2   :  { %5561 = vmatprep.mubr.f32.mxu1 %v7397_v62 }
 0x1d5   :  { %5562 = vmatmul.mubr.f32.vlgmr.msra.gmra.mrb[0].mxu1 %v7395_v61 }
 0x1d6   :  { %5564 = vmatprep.mubr.f32.mxu1 %v7410_v7 }
 0x1d9   :  { %5565 = vmatmul.mubr.f32.gmra.mrb[2].mxu1 %v7430_v20 }
 0x1da   :  { %5567 = vmatprep.mubr.f32.mxu1 %v7451_v32 }
 0x1dd   :  { %5568 = vmatmul.mubr.f32.gmra.mrb[4].mxu1 %v7471_v38 }
 0x1de   :  { %5630 = vmatprep.mubr.msk.bf16.mxu1 %vm7037_vm12, %v8357_v33 }
 0x271   :  { %v5482_v15 = vpop.f32.mrb[0].mxu0 }
 0x272   :  { %v532_v44 = vpop.f32.mrb[1].mxu0 }
 0x273   :  { %v5483_v46 = vpop.f32.mrb[2].mxu0 }
 0x274   :  { %v6330_v37 = vpack.i.bf16 %v5483_v46, %v5482_v15  ;;  %v535_v41 = vpop.f32.mrb[3].mxu0  ;;  %v6335_v15 = vpack.i.bf16 %v243_v34, %v242_v31  ;;  %v6377_v46 = vld [vmem:[#allocation14 + $0x10] sm:$0xff]   ;;  %v245_v31 = vld [vmem:[#allocation13 + $0x28] sm:$0xff] }
 0x275   :  { %v6320_v42 = vpack.i.bf16 %v535_v41, %v532_v44  ;;  %v6376_v44 = vld [vmem:[#allocation14 + $0x8] sm:$0xff]   ;;  %v240_v41 = vld [vmem:[#allocation13] sm:$0xff] }
 0x276   :  { %5573 = vmatpush3.bf16.msra.mxu0 %v6376_v44 }
 0x277   :  { %6321 = vrot.lane.b32.xlu1 %v6320_v42, %s7031_s10  ;;  %5574 = vmatprep.subr.bf16.mxu0 %v8357_v33  ;;  %v241_v42 = vld [vmem:[#allocation13 + $0x8] sm:$0xff] }
 0x279   :  { %v7580_v47 = vpop.f32.mrb[4].mxu0 }
 0x27a   :  { %v7582_v48 = vpop.f32.mrb[5].mxu0  ;;  %5575 = vmatpush3.bf16.msra.mxu0 %v6377_v46 }
 0x27b   :  { %v7584_v49 = vpop.f32.mrb[6].mxu0  ;;  %5576 = vmatprep.subr.bf16.mxu0 %v8357_v33 }
 0x27c   :  { %v7586_v50 = vpop.f32.mrb[7].mxu0 }
 0x27d   :  { %v6340_v55 = vpack.i.bf16 %v7586_v50, %v7582_v48 }
 0x281   :  { %v7590_v56 = vpop.f32.mrb[8].mxu0 }
 0x282   :  { %v7592_v57 = vpop.f32.mrb[9].mxu0 }
 0x283   :  { %v7594_v58 = vpop.f32.mrb[10].mxu0 }
 0x284   :  { %v7596_v59 = vpop.f32.mrb[11].mxu0 }
 0x2a8   :  { %v7598_v1 = vpop.f32.mrb[0].mxu1 }
 0x2a9   :  { %v1272_v4 = vmul.f32 %v7598_v1, %v7598_v1  ;;  %v7602_v5 = vpop.f32.mrb[1].mxu1 }
 0x2aa   :  { %v1271_v6 = vmul.f32 %v7602_v5, %v7602_v5 }
 0x2ab   :  { %v1281_v8 = vsel %vm1277_vm10, %v1272_v4, 0.0  ;;  %v6378_v4 = vld [vmem:[#allocation14 + $0x18] sm:$0xff]  }
 0x2ac   :  { %v7607_v14 = vpop.f32.mrb[2].mxu1  ;;  %1282 = vadd.xlane.f32.xlu1 %v1281_v8  ;;  %v1278_v16 = vsel %vm1277_vm10, %v1271_v6, 0.0  ;;  %v6325_v6 = vpack.i.bf16 %v241_v42, %v240_v41  ;;  %5577 = vmatpush3.bf16.msra.mxu0 %v6378_v4 }
 0x2ad   :  { %v1274_v17 = vmul.f32 %v7607_v14, %v7607_v14  ;;  %v7612_v18 = vpop.f32.mrb[3].mxu1  ;;  %1279 = vadd.xlane.f32.xlu0 %v1278_v16  ;;  %5578 = vmatprep.subr.bf16.mxu0 %v8357_v33 }
 0x2ae   :  { %v1273_v22 = vmul.f32 %v7612_v18, %v7612_v18 }
 0x2af   :  { %v1287_v21 = vsel %vm1277_vm10, %v1274_v17, 0.0 }
 0x2b0   :  { %v7617_v24 = vpop.f32.mrb[4].mxu1  ;;  %v1284_v30 = vsel %vm1277_vm10, %v1273_v22, 0.0 }
 0x2b1   :  { %v7619_v28 = vpop.f32.mrb[5].mxu1  ;;  %1288 = vadd.xlane.f32.xlu0 %v1287_v21  ;;  %v1276_v21 = vmul.f32 %v7617_v24, %v7617_v24 }
 0x2b2   :  { %v1275_v16 = vmul.f32 %v7619_v28, %v7619_v28 }
 0x2b3   :  { %v1293_v22 = vsel %vm1277_vm10, %v1276_v21, 0.0 }
 0x2b4   :  { %v1290_v17 = vsel %vm1277_vm10, %v1275_v16, 0.0 }
 0x2b5   :  { %1285 = vadd.xlane.f32.xlu0 %v1284_v30  ;;  %v244_v30 = vld [vmem:[#allocation13 + $0x20] sm:$0xff] }
 0x2b6   :  { %v6345_v34 = vpack.i.bf16 %v245_v31, %v244_v30 }
 0x2bd   :  { %6331 = vrot.lane.b32.xlu1 %v6330_v37, %s7031_s10  ;;  %v6379_v37 = vld [vmem:[#allocation14 + $0x20] ss:$0 sps:$4 sm:$0x11]  }
 0x2be   :  { %v1453_v8 = vsel %vm1451_vm11, %v6379_v37, 0 }
 0x2bf   :  { %5579 = vmatpush3.bf16.msra.mxu0 %v1453_v8 }
 0x2c0   :  { %5592 = vmatprep.subr.bf16.mxu0 %v8357_v33 }
 0x2c1   :  { %6336 = vrot.lane.b32.xlu1 %v6335_v15, %s7036_s13 }
 0x2cb   :  { %6326 = vrot.lane.b32.xlu0 %v6325_v6, %s7036_s13 }
 0x2e5   :  { %1291 = vadd.xlane.f32.xlu1 %v1290_v17 }
 0x2e9   :  { %v6322_v43 = vpop.permute.xlu1 %6321 }
 0x2ea   :  { %1294 = vadd.xlane.f32.xlu0 %v1293_v22  ;;  %v6324_v4 = vunpack.i.h.bf16 %v6322_v43  ;;  %v6323_v37 = vunpack.i.l.bf16 %v6322_v43 }
 0x2ec   :  { %v1388_v22 = vsel %vm1386_vm13, %v7584_v49, %v6324_v4 }
 0x2f6   :  { %6346 = vrot.lane.b32.xlu1 %v6345_v34, %s7036_s13 }
 0x300   :  { %6341 = vrot.lane.b32.xlu0 %v6340_v55, %s7031_s10 }
 0x339   :  { %v1283_v15 = vpop.xlane.xlu1 %1282 }
 0x33a   :  { %6405 = vrsqrt.f32 %v1283_v15  ;;  %v1280_v44 = vpop.xlane.xlu0 %1279  ;;  %vm1305_vm0 = vcmp.eq.f32.partialorder %v1283_v15, inf  ;;  %vm1307_vm1 = vcmp.eq.f32.partialorder %v1283_v15, 0.0  ;;  %v1308_v48 = vand.u32 2147483648, %v1283_v15 }
 0x33b   :  { %6407 = vrsqrt.f32 %v1280_v44  ;;  %vm1298_vm3 = vcmp.eq.f32.partialorder %v1280_v44, inf  ;;  %v1301_v17 = vand.u32 2147483648, %v1280_v44  ;;  %vm1300_vm4 = vcmp.eq.f32.partialorder %v1280_v44, 0.0 }
 0x33d   :  { %v6332_v31 = vpop.permute.xlu1 %6331 }
 0x33e   :  { %v1289_v46 = vpop.xlane.xlu0 %1288 }
 0x33f   :  { %6409 = vrsqrt.f32 %v1289_v46  ;;  %vm1319_vm6 = vcmp.eq.f32.partialorder %v1289_v46, inf  ;;  %v1322_v4 = vand.u32 2147483648, %v1289_v46  ;;  %vm1321_vm7 = vcmp.eq.f32.partialorder %v1289_v46, 0.0 }
 0x342   :  { %v1286_v41 = vpop.xlane.xlu0 %1285 }
 0x343   :  { %6411 = vrsqrt.f32 %v1286_v41  ;;  %vm1312_vm8 = vcmp.eq.f32.partialorder %v1286_v41, inf  ;;  %vm1314_vm9 = vcmp.eq.f32.partialorder %v1286_v41, 0.0 }
 0x344   :  { %v6406_v42 = vpop.eup %6405 }
 0x345   :  { %v6408_v6 = vpop.eup %6407  ;;  %v1304_v8 = vmul.f32 %v6406_v42, %v1283_v15  ;;  %v1387_v42 = vsel %vm1386_vm13, %v7580_v47, %v6323_v37 }
 0x346   :  { %v1297_v50 = vmul.f32 %v6408_v6, %v1280_v44  ;;  %v7643_v55 = vpop.permute.xlu0 %6326 }
 0x347   :  { %8394 = vst [vmem:[#allocation45_spill] sm:$0xff] %v7643_v55  ;;  %v1306_v16 = vsel %vm1305_vm0, %v1283_v15, %v1304_v8  ;;  %v8364_v21 = vunpack.i.h.bf16 %v7643_v55  ;;  %v8363_v15 = vunpack.i.l.bf16 %v7643_v55 }
 0x348   :  { %v1299_v30 = vsel %vm1298_vm3, %v1280_v44, %v1297_v50  ;;  %v1309_v34 = vsel %vm1307_vm1, %v1308_v48, %v1306_v16  ;;  %v6334_v44 = vunpack.i.h.bf16 %v6332_v31  ;;  %v6333_v16 = vunpack.i.l.bf16 %v6332_v31 }
 0x349   :  { %v6410_v43 = vpop.eup %6409  ;;  %v1302_v45 = vsel %vm1300_vm4, %v1301_v17, %v1299_v30  ;;  %v1395_v6 = vsel %vm1393_vm14, %v1388_v22, %v1309_v34  ;;  %v7659_v22 = vpop.permute.xlu1 %6336  ;;  %v1315_v34 = vand.u32 2147483648, %v1286_v41 }
 0x34a   :  { %v1318_v8 = vmul.f32 %v6410_v43, %v1289_v46  ;;  %v1394_v33 = vsel %vm1393_vm14, %v1387_v42, %v1302_v45  ;;  %v1402_v49 = vsel %vm1400_vm15, %v1395_v6, %v8364_v21  ;;  %8395 = vst [vmem:[#allocation46_spill] sm:$0xff] %v7659_v22  ;;  %v1390_v30 = vsel %vm1386_vm13, %v7596_v59, %v6334_v44 }
 0x34b   :  { %v1401_v47 = vsel %vm1400_vm15, %v1394_v33, %v8363_v15  ;;  %v8396_v43 = vmov 0.0   ;;  %v1389_v31 = vsel %vm1386_vm13, %v7592_v57, %v6333_v16  ;;  %v8362_v42 = vunpack.i.h.bf16 %v7659_v22 }
 0x34c   :  { %v1320_v37 = vsel %vm1319_vm6, %v1289_v46, %v1318_v8  ;;  %v1407_v48 = vpack.c.bf16 %v1402_v49, %v1401_v47  ;;  %v8361_v6 = vunpack.i.l.bf16 %v7659_v22 }
 0x34d   :  { %v6412_v50 = vpop.eup %6411  ;;  %v1323_v17 = vsel %vm1321_vm7, %v1322_v4, %v1320_v37 }
 0x34e   :  { %v1311_v45 = vmul.f32 %v6412_v50, %v1286_v41  ;;  %5581 = vmatmul.mubr.msk.bf16.vlgmr.msra.gmra.mrb[12].mxu0 %vm1441_vm5, %v1407_v48  ;;  %v1397_v33 = vsel %vm1393_vm14, %v1390_v30, %v1323_v17 }
 0x34f   :  { %5584 = vmatprep.mubr.msk.bf16.mxu0 %vm7037_vm12, %v8396_v43  ;;  %v1404_v59 = vsel %vm1400_vm15, %v1397_v33, %v8362_v42 }
 0x350   :  { %v1313_v46 = vsel %vm1312_vm8, %v1286_v41, %v1311_v45  ;;  %vm1959_vm8 = vcmask 392192  }
 0x351   :  { %v1316_v8 = vsel %vm1314_vm9, %v1315_v34, %v1313_v46 }
 0x352   :  { %v1396_v49 = vsel %vm1393_vm14, %v1389_v31, %v1316_v8 }
 0x353   :  { %v1403_v44 = vsel %vm1400_vm15, %v1396_v49, %v8361_v6 }
 0x354   :  { %v1408_v4 = vpack.c.bf16 %v1404_v59, %v1403_v44 }
 0x356   :  { %5585 = vmatmul.mubr.msk.bf16.gmra.mrb[16].mxu0 %vm1441_vm5, %v1408_v4 }
 0x357   :  { %5588 = vmatprep.mubr.msk.bf16.mxu0 %vm7037_vm12, %v8396_v43 }
 0x372   :  { %v1292_v57 = vpop.xlane.xlu1 %1291 }
 0x373   :  { %6413 = vrsqrt.f32 %v1292_v57  ;;  %vm1326_vm0 = vcmp.eq.f32.partialorder %v1292_v57, inf  ;;  %v1329_v16 = vand.u32 2147483648, %v1292_v57  ;;  %vm1328_vm1 = vcmp.eq.f32.partialorder %v1292_v57, 0.0 }
 0x376   :  { %v7681_v45 = vpop.permute.xlu1 %6346 }
 0x377   :  { %v1295_v41 = vpop.xlane.xlu0 %1294  ;;  %8397 = vst [vmem:[#allocation47_spill] sm:$0xff] %v7681_v45  ;;  %v8360_v31 = vunpack.i.h.bf16 %v7681_v45  ;;  %v8359_v59 = vunpack.i.l.bf16 %v7681_v45 }
 0x378   :  { %6415 = vrsqrt.f32 %v1295_v41  ;;  %vm1333_vm3 = vcmp.eq.f32.partialorder %v1295_v41, inf  ;;  %v1336_v8 = vand.u32 2147483648, %v1295_v41  ;;  %vm1335_vm4 = vcmp.eq.f32.partialorder %v1295_v41, 0.0 }
 0x37b   :  { %v6342_v37 = vpop.permute.xlu0 %6341 }
 0x37c   :  { %v6343_v17 = vunpack.i.l.bf16 %v6342_v37  ;;  %v6344_v34 = vunpack.i.h.bf16 %v6342_v37 }
 0x37d   :  { %v6414_v47 = vpop.eup %6413 }
 0x37e   :  { %v1325_v48 = vmul.f32 %v6414_v47, %v1292_v57  ;;  %v1391_v49 = vsel %vm1386_vm13, %v7590_v56, %v6343_v17 }
 0x380   :  { %v1327_v50 = vsel %vm1326_vm0, %v1292_v57, %v1325_v48  ;;  %v1392_v57 = vsel %vm1386_vm13, %v7594_v58, %v6344_v34  ;;  %v6381_v58 = vld [vmem:[#allocation16 + $0x8] sm:$0xff]  }
 0x381   :  { %v1330_v33 = vsel %vm1328_vm1, %v1329_v16, %v1327_v50  ;;  %v8398_v16 = vlaneseq  ;;  %v7708_v34 = vld [vmem:[#allocation23] sm:$0x7f] }
 0x382   :  { %v6416_v30 = vpop.eup %6415  ;;  %v1398_v4 = vsel %vm1393_vm14, %v1391_v49, %v1330_v33 }
 0x383   :  { %v1332_v46 = vmul.f32 %v6416_v30, %v1295_v41  ;;  %v1405_v48 = vsel %vm1400_vm15, %v1398_v4, %v8359_v59  ;;  %v7703_v17 = vshrl.u32 %v8398_v16, 7 }
 0x385   :  { %v1334_v44 = vsel %vm1333_vm3, %v1295_v41, %v1332_v46  ;;  %v6380_v41 = vld [vmem:[#allocation16] sm:$0xff]   ;;  %v7706_v30 = vsub.s32 0, %v7703_v17 }
 0x386   :  { %v1337_v47 = vsel %vm1335_vm4, %v1336_v8, %v1334_v44  ;;  %5593 = vmatpush3.bf16.msra.mxu0 %v6380_v41 }
 0x387   :  { %v1399_v37 = vsel %vm1393_vm14, %v1392_v57, %v1337_v47  ;;  %5594 = vmatprep.subr.bf16.mxu0 %v8396_v43  ;;  %8399 = vst [vmem:[#allocation48_spill] sm:$0xff] %v7706_v30  ;;  %v1413_v33 = vrot.slane %v7708_v34, %v7706_v30 }
 0x388   :  { %v1406_v56 = vsel %vm1400_vm15, %v1399_v37, %v8360_v31 }
 0x389   :  { %v1409_v50 = vpack.c.bf16 %v1406_v56, %v1405_v48 }
 0x38a   :  { %5595 = vmatpush3.bf16.msra.mxu0 %v6381_v58 }
 0x38b   :  { %5589 = vmatmul.mubr.msk.bf16.gmra.mrb[20].mxu0 %vm1441_vm5, %v1409_v50  ;;  %5608 = vmatprep.subr.bf16.mxu0 %v8396_v43 }
 0x38c   :  { %5596 = vmatprep.mubr.msk.bf16.mxu0 %vm7037_vm12, %v8396_v43 }
 0x421   :  { %v1489_v46 = vpop.f32.mrb[12].mxu0 }
 0x422   :  { %v1490_v8 = vadd.f32 %v1489_v46, %v1413_v33  ;;  %v5582_v49 = vpop.f32.mrb[13].mxu0 }
 0x423   :  { %v1492_v44 = vpop.f32.mrb[14].mxu0 }
 0x424   :  { %v5096_v4 = vmul.f32 -1.442695, %v1490_v8  ;;  %v1493_v57 = vadd.f32 %v1492_v44, %v1413_v33  ;;  %v5583_v47 = vpop.f32.mrb[15].mxu0 }
 0x426   :  { %6417 = vpow2.f32 %v5096_v4  ;;  %v5097_v37 = vmul.f32 -1.442695, %v1493_v57 }
 0x428   :  { %6419 = vpow2.f32 %v5097_v37 }
 0x429   :  { %v1497_v48 = vpop.f32.mrb[16].mxu0 }
 0x42a   :  { %v1498_v56 = vadd.f32 %v1497_v48, %v1413_v33  ;;  %v5586_v50 = vpop.f32.mrb[17].mxu0 }
 0x42b   :  { %v1500_v41 = vpop.f32.mrb[18].mxu0 }
 0x42c   :  { %v5098_v58 = vmul.f32 -1.442695, %v1498_v56  ;;  %v1501_v16 = vadd.f32 %v1500_v41, %v1413_v33  ;;  %v5587_v59 = vpop.f32.mrb[19].mxu0 }
 0x42e   :  { %6421 = vpow2.f32 %v5098_v58  ;;  %v5099_v31 = vmul.f32 -1.442695, %v1501_v16 }
 0x430   :  { %v6418_v6 = vpop.eup %6417  ;;  %6423 = vpow2.f32 %v5099_v31 }
 0x431   :  { %v1530_v46 = vadd.f32 1.0, %v6418_v6 }
 0x432   :  { %v6420_v49 = vpop.eup %6419 }
 0x433   :  { %6425 = vrcp.f32 %v1530_v46  ;;  %v1531_v42 = vadd.f32 1.0, %v6420_v49 }
 0x435   :  { %6427 = vrcp.f32 %v1531_v42 }
 0x438   :  { %v6422_v44 = vpop.eup %6421 }
 0x439   :  { %v1532_v4 = vadd.f32 1.0, %v6422_v44 }
 0x43a   :  { %v6424_v47 = vpop.eup %6423 }
 0x43b   :  { %6429 = vrcp.f32 %v1532_v4  ;;  %v1533_v37 = vadd.f32 1.0, %v6424_v47 }
 0x43d   :  { %v6426_v48 = vpop.eup %6425  ;;  %6431 = vrcp.f32 %v1533_v37 }
 0x43e   :  { %v1548_v15 = vmul.f32 %v6426_v48, %v1490_v8 }
 0x43f   :  { %v6428_v50 = vpop.eup %6427 }
 0x440   :  { %v1549_v41 = vmul.f32 %v6428_v50, %v1493_v57 }
 0x442   :  { %v1554_v59 = vpack.c.bf16 %v1549_v41, %v1548_v15 }
 0x444   :  { %5597 = vmatmul.mubr.msk.bf16.vlgmr.msra.gmra.mrb[24].mxu0 %vm1386_vm13, %v1554_v59 }
 0x445   :  { %v6430_v58 = vpop.eup %6429  ;;  %5600 = vmatprep.mubr.msk.bf16.mxu0 %vm7037_vm12, %v8396_v43 }
 0x446   :  { %v1550_v31 = vmul.f32 %v6430_v58, %v1498_v56 }
 0x447   :  { %v6432_v6 = vpop.eup %6431 }
 0x448   :  { %v1551_v42 = vmul.f32 %v6432_v6, %v1501_v16 }
 0x44a   :  { %v1555_v46 = vpack.c.bf16 %v1551_v42, %v1550_v31  ;;  %v6383_v42 = vld [vmem:[#allocation17 + $0x8] sm:$0xff]  }
 0x44c   :  { %5601 = vmatmul.mubr.msk.bf16.gmra.mrb[28].mxu0 %vm1386_vm13, %v1555_v46  ;;  %v7724_v46 = vsub.s32 1, %v7703_v17 }
 0x44d   :  { %5604 = vmatprep.mubr.msk.bf16.mxu0 %vm7037_vm12, %v8396_v43 }
 0x44e   :  { %8400 = vst [vmem:[#allocation49_spill] sm:$0xff] %v7724_v46 }
 0x45e   :  { %v1505_v49 = vpop.f32.mrb[20].mxu0 }
 0x45f   :  { %v1506_v44 = vadd.f32 %v1505_v49, %v1413_v33  ;;  %v5590_v8 = vpop.f32.mrb[21].mxu0  ;;  %v7728_v49 = vrot.slane %v7708_v34, %v7724_v46 }
 0x460   :  { %v1508_v57 = vpop.f32.mrb[22].mxu0 }
 0x461   :  { %v5100_v15 = vmul.f32 -1.442695, %v1506_v44  ;;  %v1509_v4 = vadd.f32 %v1508_v57, %v1413_v33  ;;  %v5591_v47 = vpop.f32.mrb[23].mxu0  ;;  %v6382_v33 = vld [vmem:[#allocation17] sm:$0xff]  }
 0x462   :  { %5609 = vmatpush3.bf16.msra.mxu0 %v6382_v33 }
 0x463   :  { %6433 = vpow2.f32 %v5100_v15  ;;  %v5101_v37 = vmul.f32 -1.442695, %v1509_v4  ;;  %5610 = vmatprep.subr.bf16.mxu0 %v8396_v43 }
 0x465   :  { %6435 = vpow2.f32 %v5101_v37 }
 0x466   :  { %5611 = vmatpush3.bf16.msra.mxu0 %v6383_v42 }
 0x467   :  { %5724 = vmatprep.subr.bf16.mxu0 %v8396_v43 }
 0x46d   :  { %v6434_v48 = vpop.eup %6433 }
 0x46e   :  { %v1534_v50 = vadd.f32 1.0, %v6434_v48 }
 0x46f   :  { %v6436_v56 = vpop.eup %6435 }
 0x470   :  { %6437 = vrcp.f32 %v1534_v50  ;;  %v1535_v16 = vadd.f32 1.0, %v6436_v56 }
 0x472   :  { %6439 = vrcp.f32 %v1535_v16 }
 0x47a   :  { %v6438_v41 = vpop.eup %6437 }
 0x47b   :  { %v1552_v58 = vmul.f32 %v6438_v41, %v1506_v44 }
 0x47c   :  { %v6440_v59 = vpop.eup %6439 }
 0x47d   :  { %v1553_v6 = vmul.f32 %v6440_v59, %v1509_v4 }
 0x47f   :  { %v1556_v31 = vpack.c.bf16 %v1553_v6, %v1552_v58 }
 0x481   :  { %5605 = vmatmul.mubr.msk.bf16.gmra.mrb[32].mxu0 %vm1386_vm13, %v1556_v31 }
 0x482   :  { %5612 = vmatprep.mubr.msk.bf16.mxu0 %vm7037_vm12, %v8396_v43 }
 0x517   :  { %v1616_v44 = vpop.f32.mrb[24].mxu0 }
 0x518   :  { %v1617_v8 = vadd.f32 %v1616_v44, %v7728_v49  ;;  %v5598_v57 = vpop.f32.mrb[25].mxu0 }
 0x519   :  { %v1619_v15 = vpop.f32.mrb[26].mxu0 }
 0x51a   :  { %v5107_v4 = vmul.f32 -1.442695, %v1617_v8  ;;  %v1620_v47 = vadd.f32 %v1619_v15, %v7728_v49  ;;  %v5599_v37 = vpop.f32.mrb[27].mxu0 }
 0x51b   :  { %v7734_v37 = vld [vmem:[#allocation22] sm:$0x3] }
 0x51c   :  { %6441 = vpow2.f32 %v5107_v4  ;;  %v5108_v48 = vmul.f32 -1.442695, %v1620_v47 }
 0x51e   :  { %6443 = vpow2.f32 %v5108_v48 }
 0x51f   :  { %v1624_v50 = vpop.f32.mrb[28].mxu0 }
 0x520   :  { %v1625_v56 = vadd.f32 %v1624_v50, %v7728_v49  ;;  %v5602_v16 = vpop.f32.mrb[29].mxu0 }
 0x521   :  { %v1627_v41 = vpop.f32.mrb[30].mxu0  ;;  %v1849_v16 = vrot.slane %v7734_v37, %v7706_v30 }
 0x522   :  { %v5109_v59 = vmul.f32 -1.442695, %v1625_v56  ;;  %v1628_v58 = vadd.f32 %v1627_v41, %v7728_v49  ;;  %v5603_v6 = vpop.f32.mrb[31].mxu0 }
 0x524   :  { %6445 = vpow2.f32 %v5109_v59  ;;  %v5110_v31 = vmul.f32 -1.442695, %v1628_v58 }
 0x526   :  { %v6442_v33 = vpop.eup %6441  ;;  %6447 = vpow2.f32 %v5110_v31 }
 0x527   :  { %v1657_v42 = vadd.f32 1.0, %v6442_v33 }
 0x528   :  { %v6444_v44 = vpop.eup %6443 }
 0x529   :  { %6449 = vrcp.f32 %v1657_v42  ;;  %v1658_v57 = vadd.f32 1.0, %v6444_v44 }
 0x52b   :  { %6451 = vrcp.f32 %v1658_v57 }
 0x52e   :  { %v6446_v15 = vpop.eup %6445 }
 0x52f   :  { %v1659_v4 = vadd.f32 1.0, %v6446_v15 }
 0x530   :  { %v6448_v48 = vpop.eup %6447 }
 0x531   :  { %6453 = vrcp.f32 %v1659_v4  ;;  %v1660_v50 = vadd.f32 1.0, %v6448_v48 }
 0x533   :  { %v6450_v41 = vpop.eup %6449  ;;  %6455 = vrcp.f32 %v1660_v50 }
 0x534   :  { %v7738_v59 = vmul.f32 %v6450_v41, %v1617_v8 }
 0x535   :  { %v6452_v6 = vpop.eup %6451 }
 0x536   :  { %v7740_v31 = vmul.f32 %v6452_v6, %v1620_v47  ;;  %v1850_v33 = vmul.f32 %v1849_v16, %v7738_v59 }
 0x538   :  { %v1681_v42 = vpack.c.bf16 %v7740_v31, %v7738_v59  ;;  %v1856_v44 = vsel %vm1386_vm13, %v1850_v33, 0.0  ;;  %v1851_v57 = vmul.f32 %v1849_v16, %v7740_v31 }
 0x539   :  { %1857 = vadd.xlane.f32.xlu0 %v1856_v44 }
 0x53a   :  { %5613 = vmatmul.mubr.msk.bf16.vlgmr.msra.gmra.mrb[36].mxu0 %vm1386_vm13, %v1681_v42  ;;  %v1859_v15 = vsel %vm1386_vm13, %v1851_v57, 0.0 }
 0x53b   :  { %v6454_v4 = vpop.eup %6453  ;;  %1860 = vadd.xlane.f32.xlu1 %v1859_v15  ;;  %5616 = vmatprep.mubr.msk.bf16.mxu0 %vm7037_vm12, %v8396_v43 }
 0x53c   :  { %v7751_v8 = vmul.f32 %v6454_v4, %v1625_v56 }
 0x53d   :  { %v6456_v47 = vpop.eup %6455 }
 0x53e   :  { %v7753_v48 = vmul.f32 %v6456_v47, %v1628_v58  ;;  %v1852_v50 = vmul.f32 %v1849_v16, %v7751_v8 }
 0x540   :  { %v1682_v41 = vpack.c.bf16 %v7753_v48, %v7751_v8  ;;  %v1862_v6 = vsel %vm1386_vm13, %v1852_v50, 0.0  ;;  %v1853_v33 = vmul.f32 %v1849_v16, %v7753_v48 }
 0x541   :  { %1863 = vadd.xlane.f32.xlu0 %v1862_v6 }
 0x542   :  { %5617 = vmatmul.mubr.msk.bf16.gmra.mrb[40].mxu0 %vm1386_vm13, %v1682_v41  ;;  %v1865_v56 = vsel %vm1386_vm13, %v1853_v33, 0.0 }
 0x543   :  { %5620 = vmatprep.mubr.msk.bf16.mxu0 %vm7037_vm12, %v8396_v43 }
 0x545   :  { %1866 = vadd.xlane.f32.xlu0 %v1865_v56 }
 0x554   :  { %v1632_v58 = vpop.f32.mrb[32].mxu0 }
 0x555   :  { %v1633_v42 = vadd.f32 %v1632_v58, %v7728_v49  ;;  %v5606_v44 = vpop.f32.mrb[33].mxu0 }
 0x556   :  { %v1635_v57 = vpop.f32.mrb[34].mxu0 }
 0x557   :  { %v5111_v15 = vmul.f32 -1.442695, %v1633_v42  ;;  %v1636_v4 = vadd.f32 %v1635_v57, %v7728_v49  ;;  %v5607_v47 = vpop.f32.mrb[35].mxu0 }
 0x559   :  { %6457 = vpow2.f32 %v5111_v15  ;;  %v5112_v50 = vmul.f32 -1.442695, %v1636_v4 }
 0x55b   :  { %6459 = vpow2.f32 %v5112_v50 }
 0x563   :  { %v6458_v6 = vpop.eup %6457 }
 0x564   :  { %v1661_v41 = vadd.f32 1.0, %v6458_v6 }
 0x565   :  { %v6460_v21 = vpop.eup %6459 }
 0x566   :  { %6461 = vrcp.f32 %v1661_v41  ;;  %v1662_v30 = vadd.f32 1.0, %v6460_v21 }
 0x568   :  { %6463 = vrcp.f32 %v1662_v30 }
 0x570   :  { %v6462_v33 = vpop.eup %6461 }
 0x571   :  { %v7766_v56 = vmul.f32 %v6462_v33, %v1633_v42 }
 0x572   :  { %v6464_v45 = vpop.eup %6463 }
 0x573   :  { %v7768_v58 = vmul.f32 %v6464_v45, %v1636_v4  ;;  %v1854_v44 = vmul.f32 %v1849_v16, %v7766_v56  ;;  %v8373_v45 = vsub.s32 5, %v7703_v17 }
 0x575   :  { %v1683_v49 = vpack.c.bf16 %v7768_v58, %v7766_v56  ;;  %v1868_v57 = vsel %vm1386_vm13, %v1854_v44, 0.0  ;;  %v1855_v15 = vmul.f32 %v1849_v16, %v7768_v58  ;;  %v1877_v30 = vrot.slane %v7708_v34, %v8373_v45 }
 0x576   :  { %1869 = vadd.xlane.f32.xlu1 %v1868_v57 }
 0x577   :  { %5621 = vmatmul.mubr.msk.bf16.gmra.mrb[44].mxu0 %vm1386_vm13, %v1683_v49  ;;  %v1871_v21 = vsel %vm1386_vm13, %v1855_v15, 0.0 }
 0x578   :  { %1872 = vadd.xlane.f32.xlu0 %v1871_v21  ;;  %5732 = vmatprep.mubr.msk.bf16.mxu0 %vm7037_vm12, %v8396_v43 }
 0x5c6   :  { %v1858_v42 = vpop.xlane.xlu0 %1857 }
 0x5c7   :  { %v1878_v4 = vadd.f32 %v1877_v30, %v1858_v42 }
 0x5c8   :  { %v1861_v47 = vpop.xlane.xlu1 %1860 }
 0x5c9   :  { %v5124_v50 = vmul.f32 -1.442695, %v1878_v4  ;;  %v1879_v16 = vadd.f32 %v1877_v30, %v1861_v47 }
 0x5cb   :  { %6465 = vpow2.f32 %v5124_v50  ;;  %v5125_v6 = vmul.f32 -1.442695, %v1879_v16 }
 0x5cd   :  { %6467 = vpow2.f32 %v5125_v6 }
 0x5ce   :  { %v1864_v41 = vpop.xlane.xlu0 %1863 }
 0x5cf   :  { %v1880_v33 = vadd.f32 %v1877_v30, %v1864_v41 }
 0x5d1   :  { %v5126_v44 = vmul.f32 -1.442695, %v1880_v33 }
 0x5d2   :  { %v1867_v49 = vpop.xlane.xlu0 %1866 }
 0x5d3   :  { %6469 = vpow2.f32 %v5126_v44  ;;  %v1881_v57 = vadd.f32 %v1877_v30, %v1867_v49 }
 0x5d5   :  { %v6466_v15 = vpop.eup %6465  ;;  %v5127_v21 = vmul.f32 -1.442695, %v1881_v57 }
 0x5d6   :  { %v1902_v22 = vadd.f32 1.0, %v6466_v15  ;;  %v8374_v15 = vsub.s32 2, %v7703_v17 }
 0x5d7   :  { %v6468_v55 = vpop.eup %6467  ;;  %6471 = vpow2.f32 %v5127_v21 }
 0x5d8   :  { %6473 = vrcp.f32 %v1902_v22  ;;  %v1903_v45 = vadd.f32 1.0, %v6468_v55 }
 0x5da   :  { %6475 = vrcp.f32 %v1903_v45 }
 0x5dd   :  { %v6470_v42 = vpop.eup %6469 }
 0x5de   :  { %v1904_v4 = vadd.f32 1.0, %v6470_v42  ;;  %v7787_v42 = vrot.slane %v7708_v34, %v8374_v15 }
 0x5e0   :  { %6477 = vrcp.f32 %v1904_v4 }
 0x5e1   :  { %v6472_v47 = vpop.eup %6471 }
 0x5e2   :  { %v6474_v50 = vpop.eup %6473  ;;  %v1905_v16 = vadd.f32 1.0, %v6472_v47 }
 0x5e3   :  { %1922 = vperm.xlu1 %6319, %v6474_v50  }
 0x5e4   :  { %v6476_v6 = vpop.eup %6475  ;;  %6479 = vrcp.f32 %v1905_v16 }
 0x5e5   :  { %1927 = vperm.xlu0 %6318, %v6476_v6  }
 0x5ea   :  { %v6478_v41 = vpop.eup %6477 }
 0x5eb   :  { %1932 = vperm.xlu1 %6319, %v6478_v41  }
 0x5ee   :  { %v6480_v33 = vpop.eup %6479 }
 0x5ef   :  { %1937 = vperm.xlu1 %6319, %v6480_v33  }
 0x603   :  { %v1870_v44 = vpop.xlane.xlu1 %1869 }
 0x604   :  { %v1882_v49 = vadd.f32 %v1877_v30, %v1870_v44 }
 0x605   :  { %v1873_v57 = vpop.xlane.xlu0 %1872 }
 0x606   :  { %v5128_v22 = vmul.f32 -1.442695, %v1882_v49  ;;  %v1883_v55 = vadd.f32 %v1877_v30, %v1873_v57 }
 0x608   :  { %6481 = vpow2.f32 %v5128_v22  ;;  %v5129_v45 = vmul.f32 -1.442695, %v1883_v55 }
 0x60a   :  { %6483 = vpow2.f32 %v5129_v45 }
 0x60d   :  { %v1743_v21 = vpop.f32.mrb[36].mxu0 }
 0x60e   :  { %v5614_v4 = vpop.f32.mrb[37].mxu0  ;;  %v1744_v55 = vadd.f32 %v1743_v21, %v7787_v42 }
 0x60f   :  { %v1746_v47 = vpop.f32.mrb[38].mxu0 }
 0x610   :  { %v1747_v50 = vadd.f32 %v1746_v47, %v7787_v42  ;;  %v5615_v16 = vpop.f32.mrb[39].mxu0  ;;  %v5118_v47 = vmul.f32 -1.442695, %v1744_v55 }
 0x612   :  { %v6482_v6 = vpop.eup %6481  ;;  %v5119_v41 = vmul.f32 -1.442695, %v1747_v50 }
 0x613   :  { %v1906_v33 = vadd.f32 1.0, %v6482_v6 }
 0x614   :  { %v6484_v30 = vpop.eup %6483  ;;  %6485 = vpow2.f32 %v5119_v41 }
 0x615   :  { %6487 = vrcp.f32 %v1906_v33  ;;  %v1907_v44 = vadd.f32 1.0, %v6484_v30  ;;  %v1751_v49 = vpop.f32.mrb[40].mxu0 }
 0x616   :  { %v1752_v57 = vadd.f32 %v1751_v49, %v7787_v42  ;;  %v5618_v22 = vpop.f32.mrb[41].mxu0 }
 0x617   :  { %6489 = vrcp.f32 %v1907_v44  ;;  %v1754_v45 = vpop.f32.mrb[42].mxu0 }
 0x618   :  { %v5120_v4 = vmul.f32 -1.442695, %v1752_v57  ;;  %v5619_v15 = vpop.f32.mrb[43].mxu0  ;;  %v1755_v16 = vadd.f32 %v1754_v45, %v7787_v42  ;;  %v1811_v45 = vrot.slane %v7734_v37, %v7724_v46 }
 0x61a   :  { %6491 = vpow2.f32 %v5120_v4  ;;  %v5121_v33 = vmul.f32 -1.442695, %v1755_v16 }
 0x61b   :  { %6493 = vpow2.f32 %v5118_v47 }
 0x61e   :  { %v6486_v60 = vpop.eup %6485 }
 0x61f   :  { %v6488_v6 = vpop.eup %6487  ;;  %v1785_v41 = vadd.f32 1.0, %v6486_v60 }
 0x620   :  { %1942 = vperm.xlu0 %6318, %v6488_v6  }
 0x621   :  { %v6490_v30 = vpop.eup %6489  ;;  %6495 = vrcp.f32 %v1785_v41 }
 0x622   :  { %1947 = vperm.xlu1 %6319, %v6490_v30   ;;  %6497 = vpow2.f32 %v5121_v33 }
 0x624   :  { %v6492_v44 = vpop.eup %6491 }
 0x625   :  { %v1786_v49 = vadd.f32 1.0, %v6492_v44  ;;  %v6494_v21 = vpop.eup %6493 }
 0x626   :  { %v1784_v15 = vadd.f32 1.0, %v6494_v21 }
 0x627   :  { %6499 = vrcp.f32 %v1786_v49 }
 0x628   :  { %6501 = vrcp.f32 %v1784_v15 }
 0x62b   :  { %v6496_v22 = vpop.eup %6495 }
 0x62c   :  { %v1803_v4 = vmul.f32 %v6496_v22, %v1747_v50  ;;  %v6498_v53 = vpop.eup %6497 }
 0x62d   :  { %v1787_v60 = vadd.f32 1.0, %v6498_v53 }
 0x62e   :  { %v7795_v36 = vmul.f32 %v1811_v45, %v1803_v4 }
 0x62f   :  { %6503 = vrcp.f32 %v1787_v60 }
 0x631   :  { %v6500_v47 = vpop.eup %6499 }
 0x632   :  { %v1804_v6 = vmul.f32 %v6500_v47, %v1752_v57  ;;  %v6502_v33 = vpop.eup %6501 }
 0x633   :  { %v1802_v30 = vmul.f32 %v6502_v33, %v1744_v55 }
 0x634   :  { %v7797_v41 = vmul.f32 %v1811_v45, %v1804_v6 }
 0x635   :  { %v1812_v26 = vmul.f32 %v1811_v45, %v1802_v30 }
 0x637   :  { %v1818_v50 = vsel %vm1386_vm13, %v1812_v26, 0.0 }
 0x639   :  { %v6504_v44 = vpop.eup %6503 }
 0x63a   :  { %v1805_v49 = vmul.f32 %v6504_v44, %v1755_v16 }
 0x63c   :  { %v1815_v21 = vmul.f32 %v1811_v45, %v1805_v49 }
 0x63e   :  { %v1827_v37 = vsel %vm1386_vm13, %v1815_v21, 0.0 }
 0x646   :  { %1819 = vadd.xlane.f32.xlu1 %v1818_v50 }
 0x64a   :  { %1828 = vadd.xlane.f32.xlu1 %v1827_v37  ;;  %v1759_v22 = vpop.f32.mrb[44].mxu0 }
 0x64b   :  { %v1760_v53 = vadd.f32 %v1759_v22, %v7787_v42  ;;  %v5622_v15 = vpop.f32.mrb[45].mxu0 }
 0x64c   :  { %v1762_v57 = vpop.f32.mrb[46].mxu0 }
 0x64d   :  { %v5122_v4 = vmul.f32 -1.442695, %v1760_v53  ;;  %v1763_v60 = vadd.f32 %v1762_v57, %v7787_v42  ;;  %v5623_v47 = vpop.f32.mrb[47].mxu0 }
 0x64f   :  { %6505 = vpow2.f32 %v5122_v4  ;;  %v5123_v55 = vmul.f32 -1.442695, %v1763_v60 }
 0x651   :  { %6507 = vpow2.f32 %v5123_v55 }
 0x659   :  { %v6506_v16 = vpop.eup %6505 }
 0x65a   :  { %v1788_v6 = vadd.f32 1.0, %v6506_v16 }
 0x65b   :  { %v6508_v26 = vpop.eup %6507 }
 0x65c   :  { %6509 = vrcp.f32 %v1788_v6  ;;  %v1789_v33 = vadd.f32 1.0, %v6508_v26 }
 0x65e   :  { %6511 = vrcp.f32 %v1789_v33 }
 0x662   :  { %v1923_v30 = vpop.permute.xlu1 %1922 }
 0x663   :  { %v1950_v49 = vmul.f32 %v1923_v30, %v7738_v59 }
 0x664   :  { %v1928_v44 = vpop.permute.xlu0 %1927 }
 0x665   :  { %v1951_v50 = vmul.f32 %v1928_v44, %v7740_v31 }
 0x666   :  { %v6510_v21 = vpop.eup %6509 }
 0x667   :  { %v1806_v37 = vmul.f32 %v6510_v21, %v1760_v53  ;;  %v1956_v22 = vpack.c.bf16 %v1951_v50, %v1950_v49  ;;  %v430_v53 = vadd.s32 8, %v7703_v17  ;;  %v6384_v50 = vld [vmem:[#allocation19] sm:$0xff]   ;;  %v6387_v21 = vld [vmem:[#allocation19 + $0x18] sm:$0xff]  }
 0x668   :  { %v6512_v42 = vpop.eup %6511  ;;  %5725 = vmatpush3.bf16.msra.mxu0 %v6384_v50  ;;  %v7844_v50 = vld [vmem:[#allocation2] sm:$0xff] }
 0x669   :  { %v1807_v15 = vmul.f32 %v6512_v42, %v1763_v60  ;;  %5625 = vmatpush3.bf16.msra.mxu1 %v1956_v22  ;;  %v1816_v57 = vmul.f32 %v1811_v45, %v1806_v37  ;;  %v5079_v60 = vld [vmem:[#allocation11] ss:$0 sm:$0xff]  ;;  %5726 = vmatprep.subr.bf16.mxu0 %v8396_v43 }
 0x66a   :  { %v1933_v4 = vpop.permute.xlu1 %1932  ;;  %5626 = vmatprep.subr.bf16.mxu1 %v8396_v43  ;;  %vm436_vm6 = vcmp.eq.s32.totalorder %v5079_v60, %v7703_v17  ;;  %vm437_vm7 = vcmp.eq.s32.totalorder %v5079_v60, %v430_v53 }
 0x66b   :  { %v1817_v47 = vmul.f32 %v1811_v45, %v1807_v15  ;;  %v1952_v6 = vmul.f32 %v1933_v4, %v7751_v8  ;;  %v7815_v8 = vsel %vm436_vm6, 1.0, %v8396_v43 }
 0x66d   :  { %v1833_v55 = vsel %vm1386_vm13, %v1817_v47, 0.0  ;;  %v1821_v47 = vsel %vm1386_vm13, %v7795_v36, 0.0 }
 0x66e   :  { %v1938_v16 = vpop.permute.xlu1 %1937  ;;  %1834 = vadd.xlane.f32.xlu1 %v1833_v55  ;;  %v1824_v55 = vsel %vm1386_vm13, %v7797_v41, 0.0 }
 0x66f   :  { %v1953_v59 = vmul.f32 %v1938_v16, %v7753_v48  ;;  %v7818_v48 = vsel %vm437_vm7, 1.0, %v8396_v43  ;;  %v1830_v16 = vsel %vm1386_vm13, %v1816_v57, 0.0  ;;  %v7840_v57 = vld [vmem:[#allocation2 + $0x8] sm:$0xff] }
 0x670   :  { %v7822_v49 = vpack.c.bf16 %v7818_v48, %v7815_v8 }
 0x671   :  { %v1957_v31 = vpack.c.bf16 %v1953_v59, %v1952_v6  ;;  %v8379_v6 = vsub.s32 6, %v7703_v17 }
 0x672   :  { %8401 = vst [vmem:[#allocation50_spill] sm:$0xff] %v7822_v49 }
 0x673   :  { %5627 = vmatpush3.bf16.msra.mxu1 %v1957_v31  ;;  %v1839_v31 = vrot.slane %v7708_v34, %v8379_v6 }
 0x674   :  { %5628 = vmatprep.subr.bf16.mxu1 %v8396_v43 }
 0x69f   :  { %v1943_v26 = vpop.permute.xlu0 %1942 }
 0x6a0   :  { %v1954_v33 = vmul.f32 %v1943_v26, %v7766_v56  ;;  %v6385_v56 = vld [vmem:[#allocation19 + $0x8] sm:$0xff]  }
 0x6a1   :  { %v1948_v45 = vpop.permute.xlu1 %1947  ;;  %5727 = vmatpush3.bf16.msra.mxu0 %v6385_v56 }
 0x6a2   :  { %v1955_v30 = vmul.f32 %v1948_v45, %v7768_v58  ;;  %v6386_v58 = vld [vmem:[#allocation19 + $0x10] sm:$0xff]   ;;  %5728 = vmatprep.subr.bf16.mxu0 %v8396_v43 }
 0x6a4   :  { %v1958_v44 = vpack.c.bf16 %v1955_v30, %v1954_v33 }
 0x6a5   :  { %5729 = vmatpush3.bf16.msra.mxu0 %v6386_v58 }
 0x6a6   :  { %5629 = vmatpush3.bf16.msra.mxu1 %v1958_v44  ;;  %5730 = vmatprep.subr.bf16.mxu0 %v8396_v43 }
 0x6a9   :  { %5631 = vmatmul.mubr.msk.bf16.vlgmr.msra.gmra.mrb[8].mxu1 %vm1959_vm8, %v7822_v49  ;;  %5731 = vmatpush3.bf16.msra.mxu0 %v6387_v21 }
 0x6aa   :  { %5736 = vmatprep.subr.bf16.mxu0 %v8396_v43 }
 0x6d3   :  { %v1820_v59 = vpop.xlane.xlu1 %1819 }
 0x6d4   :  { %v1840_v53 = vadd.f32 %v1839_v31, %v1820_v59 }
 0x6d7   :  { %v1829_v60 = vpop.xlane.xlu1 %1828 }
 0x6d8   :  { %v1843_v26 = vadd.f32 %v1839_v31, %v1829_v60  ;;  %v6388_v60 = vld [vmem:[#allocation20] sm:$0xff]  }
 0x6fb   :  { %v1835_v36 = vpop.xlane.xlu1 %1834 }
 0x6fc   :  { %v1845_v45 = vadd.f32 %v1839_v31, %v1835_v36 }
 0x77c   :  { %v1997_v37 = vpop.f32.mrb[8].mxu1 }
 0x77d   :  { %v5632_v22 = vpop.f32.mrb[9].mxu1 }
 0x77e   :  { %v2000_v42 = vpop.f32.mrb[10].mxu1 }
 0x77f   :  { %v6350_v15 = vpack.i.bf16 %v2000_v42, %v1997_v37  ;;  %v5633_v4 = vpop.f32.mrb[11].mxu1 }
 0x781   :  { %6351 = vrot.lane.b32.xlu0 %v6350_v15, %s7031_s10 }
 0x7a0   :  { %1822 = vadd.xlane.f32.xlu0 %v1821_v47  ;;  %v2041_v47 = vsel %vm1959_vm8, %v7815_v8, 0 }
 0x7a4   :  { %1825 = vadd.xlane.f32.xlu0 %v1824_v55  ;;  %v7853_v55 = vsub.f32 %v2041_v47, %v2041_v47 }
 0x7a8   :  { %1831 = vadd.xlane.f32.xlu0 %v1830_v16  ;;  %v7856_v16 = vand.u32 4294901760, %v7853_v55 }
 0x7aa   :  { %v2120_v59 = vsub.f32 %v7853_v55, %v7856_v16 }
 0x7be   :  { %2006 = vperm.xlu0 %6318, %v1840_v53   ;;  %v7860_v53 = vand.u32 4294901760, %v2120_v59 }
 0x7c0   :  { %8402 = vst [vmem:[#allocation51_spill] sm:$0xff] %v7860_v53  ;;  %5646 = vmatprep.mubr.f32.mxu1 %v7860_v53 }
 0x7c2   :  { %2021 = vperm.xlu0 %6318, %v1843_v26  }
 0x7c6   :  { %2031 = vperm.xlu0 %6318, %v1845_v45  }
 0x7f3   :  { %v6352_v41 = vpop.permute.xlu0 %6351 }
 0x7f4   :  { %v6354_v33 = vunpack.i.h.bf16 %v6352_v41  ;;  %v6353_v30 = vunpack.i.l.bf16 %v6352_v41 }
 0x7f6   :  { %v2611_v44 = vsel %vm1386_vm13, %v7840_v57, %v6354_v33  ;;  %v2610_v56 = vsel %vm1386_vm13, %v7844_v50, %v6353_v30 }
 0x7f7   :  { %v2612_v58 = vpack.c.bf16 %v2611_v44, %v2610_v56  ;;  %v2044_v44 = vsel %vm1959_vm8, %v7818_v48, 0 }
 0x7f9   :  { %5733 = vmatmul.mubr.msk.bf16.vlgmr.msra.gmra.mrb[48].mxu0 %vm1393_vm14, %v2612_v58 }
 0x7fa   :  { %5740 = vmatprep.mubr.msk.bf16.mxu0 %vm7037_vm12, %v8396_v43  ;;  %5737 = vmatpush3.bf16.msra.mxu0 %v6388_v60 }
 0x7fb   :  { %5738 = vmatprep.subr.bf16.mxu0 %v8396_v43 }
 0x82d   :  { %v1823_v21 = vpop.xlane.xlu0 %1822 }
 0x82e   :  { %v1841_v37 = vadd.f32 %v1839_v31, %v1823_v21 }
 0x830   :  { %2011 = vperm.xlu1 %6319, %v1841_v37  }
 0x831   :  { %v1826_v22 = vpop.xlane.xlu0 %1825 }
 0x832   :  { %v1842_v42 = vadd.f32 %v1839_v31, %v1826_v22  ;;  %v7869_v22 = vsub.f32 %v2044_v44, %v2044_v44 }
 0x834   :  { %2016 = vperm.xlu1 %6319, %v1842_v42  }
 0x835   :  { %v1832_v15 = vpop.xlane.xlu0 %1831 }
 0x836   :  { %v1844_v4 = vadd.f32 %v1839_v31, %v1832_v15  ;;  %v6389_v31 = vld [vmem:[#allocation20 + $0x8] sm:$0xff]  }
 0x837   :  { %5739 = vmatpush3.bf16.msra.mxu0 %v6389_v31 }
 0x838   :  { %2026 = vperm.xlu1 %6319, %v1844_v4  }
 0x83d   :  { %v2007_v26 = vpop.permute.xlu0 %2006 }
 0x83e   :  { %v2034_v45 = vmul.f32 %v2007_v26, %v7602_v5 }
 0x840   :  { %v2047_v41 = vand.u32 4294901760, %v2034_v45 }
 0x841   :  { %v2022_v36 = vpop.permute.xlu0 %2021 }
 0x842   :  { %v2037_v33 = vmul.f32 %v7607_v14, %v2022_v36  ;;  %v2139_v56 = vsub.f32 %v2034_v45, %v2047_v41  ;;  %v7873_v14 = vand.u32 4294901760, %v7869_v22 }
 0x844   :  { %v2056_v58 = vand.u32 4294901760, %v2037_v33  ;;  %v2140_v15 = vand.u32 4294901760, %v2139_v56 }
 0x845   :  { %v2032_v30 = vpop.permute.xlu0 %2031 }
 0x846   :  { %v2039_v21 = vmul.f32 %v7617_v24, %v2032_v30  ;;  %v2160_v4 = vsub.f32 %v2037_v33, %v2056_v58  ;;  %v2141_v45 = vsub.f32 %v2139_v56, %v2140_v15 }
 0x848   :  { %v2062_v47 = vand.u32 4294901760, %v2039_v21  ;;  %v2161_v36 = vand.u32 4294901760, %v2160_v4 }
 0x84a   :  { %v2174_v24 = vsub.f32 %v2039_v21, %v2062_v47  ;;  %v2142_v21 = vand.u32 4294901760, %v2141_v45 }
 0x8af   :  { %v2012_v37 = vpop.permute.xlu1 %2011 }
 0x8b0   :  { %v2035_v42 = vmul.f32 %v7598_v1, %v2012_v37  ;;  %v2130_v37 = vsub.f32 %v7869_v22, %v7873_v14 }
 0x8b2   :  { %v2050_v5 = vand.u32 4294901760, %v2035_v42 }
 0x8b3   :  { %v2017_v59 = vpop.permute.xlu1 %2016 }
 0x8b4   :  { %v7875_v60 = vpack.c.bf16 %v2050_v5, %v2047_v41  ;;  %v2146_v31 = vsub.f32 %v2035_v42, %v2050_v5  ;;  %v2036_v26 = vmul.f32 %v2017_v59, %v7612_v18  ;;  %v2175_v5 = vand.u32 4294901760, %v2174_v24 }
 0x8b5   :  { %v2162_v59 = vsub.f32 %v2160_v4, %v2161_v36 }
 0x8b6   :  { %v2147_v30 = vand.u32 4294901760, %v2146_v31  ;;  %v2053_v44 = vand.u32 4294901760, %v2036_v26  ;;  %6035 = vmatprep.subr.bf16.mxu1 %v7875_v60  ;;  %v6058_v1 = vpack.c.bf16 %v2146_v31, %v2139_v56 }
 0x8b7   :  { %6037 = vmatpush3.bf16.msra.mxu1 %v7875_v60  ;;  %v2027_v33 = vpop.permute.xlu1 %2026 }
 0x8b8   :  { %v7882_v6 = vpack.c.bf16 %v2056_v58, %v2053_v44  ;;  %v2153_v41 = vsub.f32 %v2036_v26, %v2053_v44  ;;  %v2038_v42 = vmul.f32 %v2027_v33, %v7619_v28  ;;  %v2148_v18 = vsub.f32 %v2146_v31, %v2147_v30 }
 0x8b9   :  { %v7885_v53 = vpack.c.bf16 %v2147_v30, %v2140_v15  ;;  %v7891_v28 = vand.u32 4294901760, %v2130_v37  ;;  %v2163_v31 = vand.u32 4294901760, %v2162_v59  ;;  %v2176_v33 = vsub.f32 %v2174_v24, %v2175_v5 }
 0x8ba   :  { %v2154_v49 = vand.u32 4294901760, %v2153_v41  ;;  %v2059_v46 = vand.u32 4294901760, %v2038_v42  ;;  %6039 = vmatprep.subr.bf16.mxu1 %v7882_v6  ;;  %v2149_v56 = vand.u32 4294901760, %v2148_v18  ;;  %v6062_v12 = vpack.c.bf16 %v2160_v4, %v2153_v41 }
 0x8bb   :  { %6041 = vmatpush3.bf16.msra.mxu1 %v7882_v6  ;;  %v2177_v37 = vand.u32 4294901760, %v2176_v33 }
 0x8bc   :  { %v7889_v10 = vpack.c.bf16 %v2062_v47, %v2059_v46  ;;  %v2167_v58 = vsub.f32 %v2038_v42, %v2059_v46  ;;  %v6046_v26 = vpack.c.bf16 %v2149_v56, %v2142_v21  ;;  %v2155_v44 = vsub.f32 %v2153_v41, %v2154_v49 }
 0x8bd   :  { %v7893_v45 = vpack.c.bf16 %v2161_v36, %v2154_v49  ;;  %v2615_v36 = vsub.s32 3, %v7703_v17 }
 0x8be   :  { %v2168_v15 = vand.u32 4294901760, %v2167_v58  ;;  %6043 = vmatprep.subr.bf16.mxu1 %v7889_v10  ;;  %v2156_v30 = vand.u32 4294901760, %v2155_v44  ;;  %v6066_v54 = vpack.c.bf16 %v2174_v24, %v2167_v58 }
 0x8bf   :  { %6045 = vmatpush3.bf16.msra.mxu1 %v7889_v10  ;;  %v2616_v24 = vrot.slane %v7708_v34, %v2615_v36 }
 0x8c0   :  { %6047 = vmatprep.subr.bf16.mxu1 %v6046_v26  ;;  %v6050_v4 = vpack.c.bf16 %v2163_v31, %v2156_v30  ;;  %v2169_v47 = vsub.f32 %v2167_v58, %v2168_v15  ;;  %v6090_v18 = vpack.c.bf16 %v2175_v5, %v2168_v15 }
 0x8c2   :  { %5647 = vmatmul.mubr.f32.vlgmr.msra.gmra.mrb[6].mxu1 %v7891_v28  ;;  %v2170_v46 = vand.u32 4294901760, %v2169_v47 }
 0x8c3   :  { %6049 = vmatpush3.bf16.msra.mxu1 %v6046_v26  ;;  %5661 = vmatprep.mubr.msk.f32.mxu1 %vm1959_vm8, %v7815_v8 }
 0x8c4   :  { %6051 = vmatprep.subr.bf16.mxu1 %v6050_v4  ;;  %v6054_v49 = vpack.c.bf16 %v2177_v37, %v2170_v46 }
 0x8c7   :  { %6053 = vmatpush3.bf16.msra.mxu1 %v6050_v4 }
 0x8c8   :  { %6055 = vmatprep.subr.bf16.mxu1 %v6054_v49 }
 0x8cb   :  { %6057 = vmatpush3.bf16.msra.mxu1 %v6054_v49 }
 0x8cc   :  { %6059 = vmatprep.subr.bf16.mxu1 %v6058_v1  ;;  %v2678_v41 = vpop.f32.mrb[48].mxu0 }
 0x8cd   :  { %v2679_v42 = vadd.f32 %v2678_v41, %v2616_v24  ;;  %v5734_v5 = vpop.f32.mrb[49].mxu0 }
 0x8ce   :  { %v2681_v21 = vpop.f32.mrb[50].mxu0  ;;  %5662 = vmatmul.mubr.msk.f32.vlgmr.msra.gmra.mrb[6].mxu1 %vm1959_vm8, %v7818_v48 }
 0x8cf   :  { %v5142_v59 = vmul.f32 -1.442695, %v2679_v42  ;;  %v2682_v56 = vadd.f32 %v2681_v21, %v2616_v24  ;;  %6061 = vmatpush3.bf16.msra.mxu1 %v6058_v1  ;;  %v5735_v58 = vpop.f32.mrb[51].mxu0  ;;  %5676 = vmatprep.mubr.f32.mxu1 %v7853_v55  ;;  %v6640_v24 = vld [vmem:[#allocation5 + $0x8] sm:$0xff] }
 0x8d0   :  { %6063 = vmatprep.subr.bf16.mxu1 %v6062_v12 }
 0x8d1   :  { %6513 = vpow2.f32 %v5142_v59  ;;  %v5143_v26 = vmul.f32 -1.442695, %v2682_v56 }
 0x8d3   :  { %6515 = vpow2.f32 %v5143_v26  ;;  %6065 = vmatpush3.bf16.msra.mxu1 %v6062_v12 }
 0x8d4   :  { %6067 = vmatprep.subr.bf16.mxu1 %v6066_v54 }
 0x8d7   :  { %6069 = vmatpush3.bf16.msra.mxu1 %v6066_v54 }
 0x8d8   :  { %6071 = vmatprep.subr.bf16.mxu1 %v7875_v60 }
 0x8da   :  { %5677 = vmatmul.mubr.f32.vlgmr.msra.gmra.mrb[6].mxu1 %v7869_v22 }
 0x8db   :  { %v6514_v34 = vpop.eup %6513  ;;  %6073 = vmatpush3.bf16.msra.mxu1 %v7875_v60  ;;  %5691 = vmatprep.mubr.f32.mxu1 %v7856_v16 }
 0x8dc   :  { %v2691_v1 = vadd.f32 1.0, %v6514_v34  ;;  %6075 = vmatprep.subr.bf16.mxu1 %v7882_v6 }
 0x8dd   :  { %v6516_v44 = vpop.eup %6515 }
 0x8de   :  { %6517 = vrcp.f32 %v2691_v1  ;;  %v2692_v31 = vadd.f32 1.0, %v6516_v44 }
 0x8df   :  { %6077 = vmatpush3.bf16.msra.mxu1 %v7882_v6 }
 0x8e0   :  { %6519 = vrcp.f32 %v2692_v31  ;;  %6079 = vmatprep.subr.bf16.mxu1 %v7889_v10 }
 0x8e3   :  { %6081 = vmatpush3.bf16.msra.mxu1 %v7889_v10 }
 0x8e4   :  { %6083 = vmatprep.subr.bf16.mxu1 %v7885_v53 }
 0x8e6   :  { %5692 = vmatmul.mubr.f32.vlgmr.msra.gmra.mrb[6].mxu1 %v7873_v14 }
 0x8e7   :  { %6085 = vmatpush3.bf16.msra.mxu1 %v7885_v53  ;;  %5706 = vmatprep.mubr.msk.f32.mxu1 %vm1959_vm8, %v7815_v8 }
 0x8e8   :  { %v6518_v12 = vpop.eup %6517  ;;  %6087 = vmatprep.subr.bf16.mxu1 %v7893_v45 }
 0x8e9   :  { %v2697_v15 = vmul.f32 %v6518_v12, %v2679_v42  ;;  %v6641_v42 = vld [vmem:[#allocation5] sm:$0xff] }
 0x8ea   :  { %v6520_v54 = vpop.eup %6519 }
 0x8eb   :  { %v2698_v30 = vmul.f32 %v6520_v54, %v2682_v56  ;;  %6089 = vmatpush3.bf16.msra.mxu1 %v7893_v45  ;;  %v6639_v45 = vld [vmem:[#allocation23] sm:$0x7f] }
 0x8ec   :  { %6091 = vmatprep.subr.bf16.mxu1 %v6090_v18 }
 0x8ed   :  { %v2699_v33 = vpack.c.bf16 %v2698_v30, %v2697_v15 }
 0x8ef   :  { %6093 = vmatpush3.bf16.msra.mxu1 %v6090_v18  ;;  %5741 = vmatmul.mubr.msk.bf16.vlgmr.msra.gmra.mrb[52].mxu0 %vm1386_vm13, %v2699_v33 }
 0x8f0   :  { %6095 = vmatprep.subr.bf16.mxu1 %v7875_v60  ;;  %5746 = vmatprep.mubr.msk.bf16.mxu0 %vm479_vm2, %v7477_v52  ;;  %v2760_v52 = vsub.s32 4, %v7703_v17 }
 0x8f2   :  { %5707 = vmatmul.mubr.msk.f32.vlgmr.msra.gmra.mrb[6].mxu1 %vm1959_vm8, %v7818_v48 }
 0x8f3   :  { %6097 = vmatpush3.bf16.msra.mxu1 %v7875_v60  ;;  %5721 = vmatprep.mubr.msk.f32.mxu1 %vm1959_vm8, %v7815_v8 }
 0x8f4   :  { %6099 = vmatprep.subr.bf16.mxu1 %v7882_v6 }
 0x8f7   :  { %6101 = vmatpush3.bf16.msra.mxu1 %v7882_v6  ;;  %v2761_v6 = vrot.slane %v6639_v45, %v2760_v52 }
 0x8f8   :  { %6103 = vmatprep.subr.bf16.mxu1 %v7889_v10 }
 0x8fb   :  { %6105 = vmatpush3.bf16.msra.mxu1 %v7889_v10 }
 0x8fc   :  { %6202 = vmatprep.subr.bf16.mxu1 %v8396_v43 }
 0x8fe   :  { %5722 = vmatmul.mubr.msk.f32.vlgmr.msra.gmra.mrb[6].mxu1 %vm1959_vm8, %v7818_v48 }
 0x8ff   :  { %5854 = vmatprep.mubr.msk.bf16.mxu1 %vm7037_vm12, %v8396_v43 }
 0x9c2   :  { %v2749_v53 = vpop.f32.mrb[52].mxu0 }
 0x9c3   :  { %v2756_v60 = vadd.f32 %v7844_v50, %v2749_v53  ;;  %v5742_v4 = vpop.f32.mrb[53].mxu0 }
 0x9c4   :  { %v2752_v47 = vpop.f32.mrb[54].mxu0 }
 0x9c5   :  { %v2757_v10 = vadd.f32 %v7840_v57, %v2752_v47  ;;  %v5743_v18 = vpop.f32.mrb[55].mxu0  ;;  %v7945_v46 = vadd.f32 %v2761_v6, %v2756_v60 }
 0x9c7   :  { %v7947_v37 = vadd.f32 %v2761_v6, %v2757_v10 }
 0x9c9   :  { %v2802_v49 = vpack.c.bf16 %v7947_v37, %v7945_v46 }
 0x9cb   :  { %5744 = vmatprep.subr.bf16.mxu0 %v2802_v49 }
 0x9cc   :  { %5745 = vmatpush3.bf16.msra.mxu0 %v2802_v49 }
 0x9cf   :  { %5747 = vmatmul.mubr.msk.bf16.vlgmr.msra.gmra.mrb[56].mxu0 %vm479_vm2, %v7497_v63 }
 0x9d0   :  { %5750 = vmatprep.mubr.msk.bf16.mxu0 %vm479_vm2, %v7512_v11 }
 0x9d1   :  { %v5723_v50 = vpop.f32.mrb[6].mxu1 }
 0x9d2   :  { %v7955_v41 = vadd.f32 %v6640_v24, %v5723_v50  ;;  %v2590_v57 = vpop.f32.mrb[7].mxu1 }
 0x9d3   :  { %v7957_v5 = vadd.f32 %v6641_v42, %v2590_v57 }
 0x9d4   :  { %v2888_v21 = vand.u32 4294901760, %v7955_v41 }
 0x9d5   :  { %v2885_v59 = vand.u32 4294901760, %v7957_v5 }
 0x9d6   :  { %v3020_v56 = vsub.f32 %v7955_v41, %v2888_v21 }
 0x9d7   :  { %v6106_v58 = vpack.c.bf16 %v2888_v21, %v2885_v59  ;;  %v3013_v63 = vsub.f32 %v7957_v5, %v2885_v59  ;;  %5751 = vmatmul.mubr.msk.bf16.gmra.mrb[60].mxu0 %vm479_vm2, %v7522_v19 }
 0x9d8   :  { %5754 = vmatprep.mubr.msk.bf16.mxu0 %vm479_vm2, %v7533_v29  ;;  %v3021_v11 = vand.u32 4294901760, %v3020_v56 }
 0x9d9   :  { %6107 = vmatprep.subr.bf16.mxu0 %v6106_v58  ;;  %v3014_v26 = vand.u32 4294901760, %v3013_v63  ;;  %v6114_v19 = vpack.c.bf16 %v3020_v56, %v3013_v63 }
 0x9da   :  { %6109 = vmatpush3.bf16.msra.mxu0 %v6106_v58  ;;  %v3022_v34 = vsub.f32 %v3020_v56, %v3021_v11 }
 0x9db   :  { %v3015_v1 = vsub.f32 %v3013_v63, %v3014_v26 }
 0x9dc   :  { %v3023_v44 = vand.u32 4294901760, %v3022_v34  ;;  %v6392_v34 = vld [vmem:[#allocation14 + $0x34] sm:$0xff]  }
 0x9dd   :  { %v3016_v31 = vand.u32 4294901760, %v3015_v1  ;;  %v6393_v1 = vld [vmem:[#allocation14 + $0x3c] sm:$0xff]  }
 0x9df   :  { %5755 = vmatmul.mubr.msk.bf16.gmra.mrb[64].mxu0 %vm479_vm2, %v7544_v35  ;;  %v6110_v12 = vpack.c.bf16 %v3023_v44, %v3016_v31  ;;  %v6394_v44 = vld [vmem:[#allocation14 + $0x44] ss:$0 sps:$4 sm:$0x11]  }
 0x9e0   :  { %5762 = vmatprep.mubr.f32.mxu0 %v7434_v23  ;;  %v6122_v23 = vpack.c.bf16 %v3021_v11, %v3014_v26  ;;  %v6390_v11 = vld [vmem:[#allocation14 + $0x24] sm:$0xff]   ;;  %v6391_v26 = vld [vmem:[#allocation14 + $0x2c] sm:$0xff]   ;;  %v3710_v31 = vsel %vm1451_vm11, %v6394_v44, 0 }
 0x9e1   :  { %6111 = vmatprep.subr.bf16.mxu0 %v6110_v12  ;;  %6207 = vmatpush3.bf16.msra.mxu1 %v6390_v11 }
 0x9e2   :  { %6203 = vmatprep.subr.bf16.mxu1 %v8396_v43 }
 0x9e5   :  { %6208 = vmatpush3.bf16.msra.mxu1 %v6391_v26 }
 0x9e6   :  { %6204 = vmatprep.subr.bf16.mxu1 %v8396_v43 }
 0x9e7   :  { %5763 = vmatmul.mubr.f32.vlgmr.msra.gmra.mrb[68].mxu0 %v7436_v25  ;;  %v8403_v25 = vld [vmem:[#allocation43_spill] sm:$0xff] }
 0x9e8   :  { %6113 = vmatpush3.bf16.msra.mxu0 %v6110_v12  ;;  %5765 = vmatprep.mubr.f32.mxu0 %v7459_v39  ;;  %v8404_v39 = vld [vmem:[#allocation38_spill] sm:$0xff] }
 0x9e9   :  { %6115 = vmatprep.subr.bf16.mxu0 %v6114_v19  ;;  %6209 = vmatpush3.bf16.msra.mxu1 %v6392_v34 }
 0x9ea   :  { %6205 = vmatprep.subr.bf16.mxu1 %v8396_v43 }
 0x9eb   :  { %5766 = vmatmul.mubr.f32.gmra.mrb[70].mxu0 %v7475_v51  ;;  %v8405_v51 = vld [vmem:[#allocation39_spill] sm:$0xff] }
 0x9ec   :  { %5768 = vmatprep.mubr.f32.mxu0 %v7499_v0  ;;  %v8406_v0 = vld [vmem:[#allocation40_spill] sm:$0xff] }
 0x9ed   :  { %6210 = vmatpush3.bf16.msra.mxu1 %v6393_v1 }
 0x9ee   :  { %6206 = vmatprep.subr.bf16.mxu1 %v8396_v43 }
 0x9ef   :  { %5769 = vmatmul.mubr.f32.gmra.mrb[72].mxu0 %v7510_v9 }
 0x9f0   :  { %5775 = vmatprep.mubr.f32.mxu0 %v7397_v62 }
 0x9f1   :  { %6211 = vmatpush3.bf16.msra.mxu1 %v3710_v31 }
 0x9f2   :  { %5858 = vmatprep.subr.bf16.mxu1 %v8396_v43 }
 0x9f3   :  { %5776 = vmatmul.mubr.f32.vlgmr.msra.gmra.mrb[68].mxu0 %v7395_v61 }
 0x9f4   :  { %6117 = vmatpush3.bf16.msra.mxu0 %v6114_v19  ;;  %5778 = vmatprep.mubr.f32.mxu0 %v7410_v7 }
 0x9f5   :  { %6119 = vmatprep.subr.bf16.mxu0 %v6106_v58 }
 0x9f7   :  { %5779 = vmatmul.mubr.f32.gmra.mrb[70].mxu0 %v7430_v20 }
 0x9f8   :  { %5781 = vmatprep.mubr.f32.mxu0 %v7451_v32 }
 0x9fb   :  { %5782 = vmatmul.mubr.f32.gmra.mrb[72].mxu0 %v7471_v38 }
 0x9fc   :  { %5788 = vmatprep.mubr.f32.mxu0 %v7405_v3  ;;  %v8408_v3 = vld [vmem:[#allocation42_spill] sm:$0xff] }
 0x9ff   :  { %5789 = vmatmul.mubr.f32.vlgmr.msra.gmra.mrb[68].mxu0 %v7402_v2  ;;  %v8407_v2 = vld [vmem:[#allocation41_spill] sm:$0xff] }
 0xa00   :  { %6121 = vmatpush3.bf16.msra.mxu0 %v6106_v58  ;;  %5791 = vmatprep.mubr.f32.mxu0 %v7421_v13  ;;  %v8409_v13 = vld [vmem:[#allocation44_spill] sm:$0xff] }
 0xa01   :  { %6123 = vmatprep.subr.bf16.mxu0 %v6122_v23 }
 0xa03   :  { %5792 = vmatmul.mubr.f32.gmra.mrb[70].mxu0 %v7442_v27 }
 0xa04   :  { %5794 = vmatprep.mubr.f32.mxu0 %v7463_v40 }
 0xa07   :  { %5795 = vmatmul.mubr.f32.gmra.mrb[72].mxu0 %v8403_v25 }
 0xa08   :  { %5801 = vmatprep.mubr.f32.mxu0 %v8404_v39 }
 0xa0b   :  { %5802 = vmatmul.mubr.f32.vlgmr.msra.gmra.mrb[68].mxu0 %v8405_v51 }
 0xa0c   :  { %6125 = vmatpush3.bf16.msra.mxu0 %v6122_v23  ;;  %5804 = vmatprep.mubr.f32.mxu0 %v8406_v0 }
 0xa0d   :  { %6127 = vmatprep.subr.bf16.mxu0 %v6106_v58 }
 0xa0f   :  { %5805 = vmatmul.mubr.f32.gmra.mrb[70].mxu0 %v8407_v2 }
 0xa10   :  { %5807 = vmatprep.mubr.f32.mxu0 %v8408_v3 }
 0xa13   :  { %5808 = vmatmul.mubr.f32.gmra.mrb[72].mxu0 %v8409_v13 }
 0xa14   :  { %5814 = vmatprep.mubr.f32.mxu0 %v7397_v62 }
 0xa17   :  { %5815 = vmatmul.mubr.f32.vlgmr.msra.gmra.mrb[68].mxu0 %v7395_v61 }
 0xa18   :  { %6129 = vmatpush3.bf16.msra.mxu0 %v6106_v58  ;;  %5817 = vmatprep.mubr.f32.mxu0 %v7410_v7 }
 0xa19   :  { %5836 = vmatprep.subr.bf16.mxu0 %v8396_v43 }
 0xa1b   :  { %5818 = vmatmul.mubr.f32.gmra.mrb[70].mxu0 %v7430_v20 }
 0xa1c   :  { %5820 = vmatprep.mubr.f32.mxu0 %v7451_v32 }
 0xa1f   :  { %5821 = vmatmul.mubr.f32.gmra.mrb[72].mxu0 %v7471_v38 }
 0xa20   :  { %5827 = vmatprep.mubr.f32.mxu0 %v7397_v62 }
 0xa23   :  { %5828 = vmatmul.mubr.f32.vlgmr.msra.gmra.mrb[68].mxu0 %v7395_v61 }
 0xa24   :  { %5830 = vmatprep.mubr.f32.mxu0 %v7410_v7  ;;  %5837 = vmatpush3.bf16.msra.mxu0 %v6390_v11 }
 0xa25   :  { %5838 = vmatprep.subr.bf16.mxu0 %v8396_v43 }
 0xa27   :  { %5831 = vmatmul.mubr.f32.gmra.mrb[70].mxu0 %v7430_v20 }
 0xa28   :  { %5833 = vmatprep.mubr.f32.mxu0 %v7451_v32  ;;  %5839 = vmatpush3.bf16.msra.mxu0 %v6391_v26 }
 0xa29   :  { %5840 = vmatprep.subr.bf16.mxu0 %v8396_v43 }
 0xa2b   :  { %5834 = vmatmul.mubr.f32.gmra.mrb[72].mxu0 %v7471_v38 }
 0xa2c   :  { %5846 = vmatprep.mubr.msk.bf16.mxu0 %vm7037_vm12, %v8396_v43  ;;  %5841 = vmatpush3.bf16.msra.mxu0 %v6392_v34  ;;  %v8410_v34 = vld [vmem:[#allocation45_spill] sm:$0xff] }
 0xa2d   :  { %5842 = vmatprep.subr.bf16.mxu0 %v8396_v43 }
 0xa30   :  { %5843 = vmatpush3.bf16.msra.mxu0 %v6393_v1  ;;  %v8411_v1 = vunpack.i.h.bf16 %v8410_v34 }
 0xa31   :  { %5844 = vmatprep.subr.bf16.mxu0 %v8396_v43 }
 0xa34   :  { %5845 = vmatpush3.bf16.msra.mxu0 %v3710_v31 }
 0xa35   :  { %5874 = vmatprep.subr.bf16.mxu0 %v8396_v43 }
 0xaa2   :  { %v5748_v27 = vpop.f32.mrb[56].mxu0 }
 0xaa3   :  { %v2837_v40 = vpop.f32.mrb[57].mxu0 }
 0xaa4   :  { %v5749_v9 = vpop.f32.mrb[58].mxu0 }
 0xaa5   :  { %v6360_v29 = vpack.i.bf16 %v5749_v9, %v5748_v27  ;;  %v2840_v35 = vpop.f32.mrb[59].mxu0 }
 0xaa6   :  { %v6355_v54 = vpack.i.bf16 %v2840_v35, %v2837_v40 }
 0xaaa   :  { %v8008_v62 = vpop.f32.mrb[60].mxu0 }
 0xaab   :  { %v2853_v61 = vpop.f32.mrb[61].mxu0 }
 0xaac   :  { %v8010_v15 = vpop.f32.mrb[62].mxu0 }
 0xaad   :  { %v2856_v7 = vpop.f32.mrb[63].mxu0 }
 0xaae   :  { %v6365_v20 = vpack.i.bf16 %v2856_v7, %v2853_v61 }
 0xab2   :  { %v8012_v30 = vpop.f32.mrb[64].mxu0 }
 0xab3   :  { %v8014_v32 = vpop.f32.mrb[65].mxu0 }
 0xab4   :  { %v8016_v38 = vpop.f32.mrb[66].mxu0 }
 0xab5   :  { %v8018_v33 = vpop.f32.mrb[67].mxu0 }
 0xaf6   :  { %v8020_v53 = vpop.f32.mrb[68].mxu0 }
 0xaf7   :  { %v3559_v60 = vmul.f32 %v8020_v53, %v8020_v53  ;;  %v8024_v45 = vpop.f32.mrb[69].mxu0 }
 0xaf8   :  { %v3558_v6 = vmul.f32 %v8024_v45, %v8024_v45 }
 0xaf9   :  { %v3567_v4 = vsel %vm1277_vm10, %v3559_v60, 0.0 }
 0xafa   :  { %3568 = vadd.xlane.f32.xlu0 %v3567_v4  ;;  %v8029_v47 = vpop.f32.mrb[70].mxu0  ;;  %v3564_v10 = vsel %vm1277_vm10, %v3558_v6, 0.0 }
 0xafb   :  { %v3561_v18 = vmul.f32 %v8029_v47, %v8029_v47  ;;  %3565 = vadd.xlane.f32.xlu1 %v3564_v10  ;;  %v8034_v49 = vpop.f32.mrb[71].mxu0 }
 0xafc   :  { %v3560_v50 = vmul.f32 %v8034_v49, %v8034_v49 }
 0xafd   :  { %v3573_v24 = vsel %vm1277_vm10, %v3561_v18, 0.0 }
 0xafe   :  { %v8039_v57 = vpop.f32.mrb[72].mxu0  ;;  %v3570_v42 = vsel %vm1277_vm10, %v3560_v50, 0.0 }
 0xaff   :  { %v3563_v21 = vmul.f32 %v8039_v57, %v8039_v57  ;;  %3574 = vadd.xlane.f32.xlu1 %v3573_v24  ;;  %3571 = vadd.xlane.f32.xlu0 %v3570_v42  ;;  %v8044_v59 = vpop.f32.mrb[73].mxu0 }
 0xb00   :  { %v3562_v56 = vmul.f32 %v8044_v59, %v8044_v59 }
 0xb01   :  { %v3579_v58 = vsel %vm1277_vm10, %v3563_v21, 0.0 }
 0xb02   :  { %v3576_v63 = vsel %vm1277_vm10, %v3562_v56, 0.0 }
 0xb03   :  { %3580 = vadd.xlane.f32.xlu1 %v3579_v58  ;;  %3577 = vadd.xlane.f32.xlu0 %v3576_v63 }
 0xb14   :  { %6361 = vrot.lane.b32.xlu1 %v6360_v29, %s7031_s10 }
 0xb18   :  { %6366 = vrot.lane.b32.xlu1 %v6365_v20, %s7031_s10 }
 0xb19   :  { %6356 = vrot.lane.b32.xlu0 %v6355_v54, %s7031_s10 }
 0xb87   :  { %v3569_v12 = vpop.xlane.xlu0 %3568 }
 0xb88   :  { %6521 = vrsqrt.f32 %v3569_v12  ;;  %v3566_v19 = vpop.xlane.xlu1 %3565  ;;  %vm3591_vm2 = vcmp.eq.f32.partialorder %v3569_v12, inf  ;;  %vm3593_vm11 = vcmp.eq.f32.partialorder %v3569_v12, 0.0  ;;  %v3594_v2 = vand.u32 2147483648, %v3569_v12 }
 0xb89   :  { %6523 = vrsqrt.f32 %v3566_v19  ;;  %vm3584_vm9 = vcmp.eq.f32.partialorder %v3566_v19, inf  ;;  %vm3586_vm0 = vcmp.eq.f32.partialorder %v3566_v19, 0.0  ;;  %v3587_v27 = vand.u32 2147483648, %v3566_v19 }
 0xb8c   :  { %v3575_v23 = vpop.xlane.xlu1 %3574  ;;  %v3572_v25 = vpop.xlane.xlu0 %3571 }
 0xb8d   :  { %6525 = vrsqrt.f32 %v3575_v23  ;;  %vm3605_vm1 = vcmp.eq.f32.partialorder %v3575_v23, inf  ;;  %vm3607_vm3 = vcmp.eq.f32.partialorder %v3575_v23, 0.0  ;;  %v3608_v9 = vand.u32 2147483648, %v3575_v23 }
 0xb8e   :  { %6527 = vrsqrt.f32 %v3572_v25  ;;  %vm3598_vm4 = vcmp.eq.f32.partialorder %v3572_v25, inf  ;;  %vm3600_vm6 = vcmp.eq.f32.partialorder %v3572_v25, 0.0  ;;  %v3601_v18 = vand.u32 2147483648, %v3572_v25 }
 0xb90   :  { %v8064_v39 = vpop.xlane.xlu1 %3580  ;;  %v8066_v51 = vpop.xlane.xlu0 %3577 }
 0xb91   :  { %6529 = vrsqrt.f32 %v8064_v39  ;;  %vm3619_vm7 = vcmp.eq.f32.partialorder %v8064_v39, inf  ;;  %v3622_v26 = vand.u32 2147483648, %v8064_v39 }
 0xb92   :  { %v6522_v0 = vpop.eup %6521  ;;  %6531 = vrsqrt.f32 %v8066_v51 }
 0xb93   :  { %v6524_v3 = vpop.eup %6523  ;;  %v3590_v13 = vmul.f32 %v6522_v0, %v3569_v12 }
 0xb94   :  { %v3583_v40 = vmul.f32 %v6524_v3, %v3566_v19  ;;  %v6362_v29 = vpop.permute.xlu1 %6361  ;;  %v6357_v35 = vpop.permute.xlu0 %6356 }
 0xb95   :  { %v3592_v54 = vsel %vm3591_vm2, %v3569_v12, %v3590_v13  ;;  %v6364_v61 = vunpack.i.h.bf16 %v6362_v29  ;;  %v6359_v7 = vunpack.i.h.bf16 %v6357_v35  ;;  %v6363_v60 = vunpack.i.l.bf16 %v6362_v29 }
 0xb96   :  { %v3585_v20 = vsel %vm3584_vm9, %v3566_v19, %v3583_v40  ;;  %v3595_v6 = vsel %vm3593_vm11, %v3594_v2, %v3592_v54  ;;  %v6358_v4 = vunpack.i.l.bf16 %v6357_v35  ;;  %vm3621_vm2 = vcmp.eq.f32.partialorder %v8064_v39, 0.0 }
 0xb97   :  { %v6526_v10 = vpop.eup %6525  ;;  %v3588_v50 = vsel %vm3586_vm0, %v3587_v27, %v3585_v20  ;;  %v3649_v24 = vsel %vm1386_vm13, %v8010_v15, %v6359_v7  ;;  %v3651_v12 = vsel %vm1386_vm13, %v8018_v33, %v6364_v61  ;;  %v3650_v19 = vsel %vm1386_vm13, %v8014_v32, %v6363_v60 }
 0xb98   :  { %v6528_v42 = vpop.eup %6527  ;;  %v3604_v21 = vmul.f32 %v6526_v10, %v3575_v23  ;;  %v3655_v56 = vsel %vm1393_vm14, %v3649_v24, %v3595_v6  ;;  %v3648_v58 = vsel %vm1386_vm13, %v8008_v62, %v6358_v4  ;;  %v6367_v63 = vpop.permute.xlu1 %6366  ;;  %v8412_v62 = vunpack.i.l.bf16 %v8410_v34 }
 0xb99   :  { %v3597_v11 = vmul.f32 %v6528_v42, %v3572_v25  ;;  %v3661_v44 = vsel %vm1400_vm15, %v3655_v56, %v8411_v1  ;;  %v3654_v31 = vsel %vm1393_vm14, %v3648_v58, %v3588_v50  ;;  %v6369_v40 = vunpack.i.h.bf16 %v6367_v63  ;;  %v8416_v58 = vld [vmem:[#allocation47_spill] sm:$0xff]  ;;  %v8139_v1 = vld [vmem:[#allocation23 + $0x8] sm:$0x7f] }
 0xb9a   :  { %v3606_v15 = vsel %vm3605_vm1, %v3575_v23, %v3604_v21  ;;  %v3660_v0 = vsel %vm1400_vm15, %v3654_v31, %v8412_v62  ;;  %v6368_v61 = vunpack.i.l.bf16 %v6367_v63  ;;  %vm3612_vm11 = vcmp.eq.f32.partialorder %v8066_v51, inf  ;;  %v8413_v23 = vld [vmem:[#allocation46_spill] sm:$0xff] }
 0xb9b   :  { %v6530_v2 = vpop.eup %6529  ;;  %v3599_v3 = vsel %vm3598_vm4, %v3572_v25, %v3597_v11  ;;  %v3609_v13 = vsel %vm3607_vm3, %v3608_v9, %v3606_v15  ;;  %v3666_v27 = vpack.c.bf16 %v3661_v44, %v3660_v0  ;;  %v8414_v9 = vunpack.i.h.bf16 %v8413_v23  ;;  %v8419_v44 = vld [vmem:[#allocation48_spill] sm:$0xff] }
 0xb9c   :  { %v6532_v29 = vpop.eup %6531  ;;  %v3618_v35 = vmul.f32 %v6530_v2, %v8064_v39  ;;  %v3602_v54 = vsel %vm3600_vm6, %v3601_v18, %v3599_v3  ;;  %v3657_v33 = vsel %vm1393_vm14, %v3651_v12, %v3609_v13  ;;  %vm3614_vm9 = vcmp.eq.f32.partialorder %v8066_v51, 0.0 }
 0xb9d   :  { %v3611_v32 = vmul.f32 %v6532_v29, %v8066_v51  ;;  %v3656_v7 = vsel %vm1393_vm14, %v3650_v19, %v3602_v54  ;;  %5847 = vmatmul.mubr.msk.bf16.vlgmr.msra.gmra.mrb[76].mxu0 %vm1441_vm5, %v3666_v27  ;;  %v3663_v20 = vsel %vm1400_vm15, %v3657_v33, %v8414_v9  ;;  %v3615_v60 = vand.u32 2147483648, %v8066_v51 }
 0xb9e   :  { %v3620_v25 = vsel %vm3619_vm7, %v8064_v39, %v3618_v35  ;;  %5850 = vmatprep.mubr.msk.bf16.mxu0 %vm7037_vm12, %v8396_v43  ;;  %v8415_v6 = vunpack.i.l.bf16 %v8413_v23  ;;  %v3653_v50 = vsel %vm1386_vm13, %v8016_v38, %v6369_v40  ;;  %v3652_v56 = vsel %vm1386_vm13, %v8012_v30, %v6368_v61  ;;  %v6395_v30 = vld [vmem:[#allocation16 + $0x10] sm:$0xff]   ;;  %v6396_v38 = vld [vmem:[#allocation16 + $0x18] sm:$0xff]  }
 0xb9f   :  { %v3613_v10 = vsel %vm3612_vm11, %v8066_v51, %v3611_v32  ;;  %v3623_v18 = vsel %vm3621_vm2, %v3622_v26, %v3620_v25  ;;  %v8417_v63 = vunpack.i.h.bf16 %v8416_v58  ;;  %v8418_v51 = vunpack.i.l.bf16 %v8416_v58 }
 0xba0   :  { %v3662_v4 = vsel %vm1400_vm15, %v3656_v7, %v8415_v6  ;;  %v3659_v42 = vsel %vm1393_vm14, %v3653_v50, %v3623_v18  ;;  %v3616_v21 = vsel %vm3614_vm9, %v3615_v60, %v3613_v10  ;;  %v3672_v31 = vrot.slane %v8139_v1, %v8419_v44 }
 0xba1   :  { %v3667_v24 = vpack.c.bf16 %v3663_v20, %v3662_v4  ;;  %v3665_v11 = vsel %vm1400_vm15, %v3659_v42, %v8417_v63  ;;  %v3658_v34 = vsel %vm1393_vm14, %v3652_v56, %v3616_v21 }
 0xba2   :  { %v3664_v39 = vsel %vm1400_vm15, %v3658_v34, %v8418_v51 }
 0xba3   :  { %v3668_v26 = vpack.c.bf16 %v3665_v11, %v3664_v39 }
 0xba5   :  { %5851 = vmatmul.mubr.msk.bf16.gmra.mrb[80].mxu0 %vm1441_vm5, %v3667_v24  ;;  %5855 = vmatmul.mubr.msk.bf16.vlgmr.msra.gmra.mrb[12].mxu1 %vm1441_vm5, %v3668_v26 }
 0xba6   :  { %5862 = vmatprep.mubr.msk.bf16.mxu1 %vm7037_vm12, %v8396_v43  ;;  %5878 = vmatprep.mubr.msk.bf16.mxu0 %vm7037_vm12, %v8396_v43 }
 0xba7   :  { %5859 = vmatpush3.bf16.msra.mxu1 %v6395_v30 }
 0xba8   :  { %5860 = vmatprep.subr.bf16.mxu1 %v8396_v43 }
 0xbab   :  { %5861 = vmatpush3.bf16.msra.mxu1 %v6396_v38 }
 0xbac   :  { %5890 = vmatprep.subr.bf16.mxu1 %v8396_v43 }
 0xc70   :  { %v3746_v15 = vpop.f32.mrb[76].mxu0 }
 0xc71   :  { %v3747_v12 = vadd.f32 %v3746_v15, %v3672_v31  ;;  %v5848_v19 = vpop.f32.mrb[77].mxu0 }
 0xc72   :  { %v3749_v62 = vpop.f32.mrb[78].mxu0 }
 0xc73   :  { %v5161_v0 = vmul.f32 -1.442695, %v3747_v12  ;;  %v3750_v2 = vadd.f32 %v3749_v62, %v3672_v31  ;;  %v5849_v3 = vpop.f32.mrb[79].mxu0 }
 0xc75   :  { %6533 = vpow2.f32 %v5161_v0  ;;  %v5162_v13 = vmul.f32 -1.442695, %v3750_v2 }
 0xc77   :  { %6535 = vpow2.f32 %v5162_v13 }
 0xc78   :  { %v3754_v27 = vpop.f32.mrb[80].mxu0  ;;  %v3762_v40 = vpop.f32.mrb[12].mxu1 }
 0xc79   :  { %v3755_v29 = vadd.f32 %v3754_v27, %v3672_v31  ;;  %v3763_v35 = vadd.f32 %v3762_v40, %v3672_v31  ;;  %v5852_v54 = vpop.f32.mrb[81].mxu0  ;;  %v5856_v33 = vpop.f32.mrb[13].mxu1 }
 0xc7a   :  { %v3757_v61 = vpop.f32.mrb[82].mxu0  ;;  %v3765_v32 = vpop.f32.mrb[14].mxu1 }
 0xc7b   :  { %v5163_v7 = vmul.f32 -1.442695, %v3755_v29  ;;  %v5165_v23 = vmul.f32 -1.442695, %v3763_v35  ;;  %v3758_v9 = vadd.f32 %v3757_v61, %v3672_v31  ;;  %v3766_v20 = vadd.f32 %v3765_v32, %v3672_v31  ;;  %v5853_v25 = vpop.f32.mrb[83].mxu0  ;;  %v5857_v60 = vpop.f32.mrb[15].mxu1 }
 0xc7d   :  { %6537 = vpow2.f32 %v5163_v7  ;;  %v5164_v6 = vmul.f32 -1.442695, %v3758_v9  ;;  %v5166_v4 = vmul.f32 -1.442695, %v3766_v20 }
 0xc7e   :  { %6539 = vpow2.f32 %v5165_v23 }
 0xc7f   :  { %v6534_v10 = vpop.eup %6533  ;;  %6541 = vpow2.f32 %v5164_v6 }
 0xc80   :  { %v3787_v18 = vadd.f32 1.0, %v6534_v10  ;;  %6543 = vpow2.f32 %v5166_v4 }
 0xc81   :  { %v6536_v50 = vpop.eup %6535 }
 0xc82   :  { %6545 = vrcp.f32 %v3787_v18  ;;  %v3788_v24 = vadd.f32 1.0, %v6536_v50 }
 0xc84   :  { %6547 = vrcp.f32 %v3788_v24 }
 0xc87   :  { %v6538_v42 = vpop.eup %6537 }
 0xc88   :  { %v6540_v21 = vpop.eup %6539  ;;  %v3789_v56 = vadd.f32 1.0, %v6538_v42 }
 0xc89   :  { %v6542_v58 = vpop.eup %6541  ;;  %v3791_v63 = vadd.f32 1.0, %v6540_v21 }
 0xc8a   :  { %v6544_v11 = vpop.eup %6543  ;;  %6549 = vrcp.f32 %v3789_v56  ;;  %v3790_v34 = vadd.f32 1.0, %v6542_v58 }
 0xc8b   :  { %6551 = vrcp.f32 %v3791_v63  ;;  %v3792_v51 = vadd.f32 1.0, %v6544_v11 }
 0xc8c   :  { %v6546_v39 = vpop.eup %6545  ;;  %6553 = vrcp.f32 %v3790_v34 }
 0xc8d   :  { %6555 = vrcp.f32 %v3792_v51  ;;  %v3805_v30 = vmul.f32 %v6546_v39, %v3747_v12  ;;  %v6397_v12 = vld [vmem:[#allocation17 + $0x10] sm:$0xff]  }
 0xc8e   :  { %v6548_v26 = vpop.eup %6547  ;;  %5875 = vmatpush3.bf16.msra.mxu0 %v6397_v12 }
 0xc8f   :  { %v3806_v38 = vmul.f32 %v6548_v26, %v3750_v2  ;;  %5876 = vmatprep.subr.bf16.mxu0 %v8396_v43  ;;  %v6398_v2 = vld [vmem:[#allocation17 + $0x18] sm:$0xff]  }
 0xc91   :  { %v3811_v31 = vpack.c.bf16 %v3806_v38, %v3805_v30 }
 0xc92   :  { %5877 = vmatpush3.bf16.msra.mxu0 %v6398_v2 }
 0xc93   :  { %5863 = vmatmul.mubr.msk.bf16.vlgmr.msra.gmra.mrb[16].mxu1 %vm1386_vm13, %v3811_v31  ;;  %5990 = vmatprep.subr.bf16.mxu0 %v8396_v43 }
 0xc94   :  { %v6550_v15 = vpop.eup %6549  ;;  %5866 = vmatprep.mubr.msk.bf16.mxu1 %vm7037_vm12, %v8396_v43 }
 0xc95   :  { %v6552_v19 = vpop.eup %6551  ;;  %v3807_v3 = vmul.f32 %v6550_v15, %v3755_v29  ;;  %v8420_v29 = vld [vmem:[#allocation49_spill] sm:$0xff] }
 0xc96   :  { %v6554_v62 = vpop.eup %6553  ;;  %v3809_v27 = vmul.f32 %v6552_v19, %v3763_v35  ;;  %v3817_v35 = vrot.slane %v8139_v1, %v8420_v29 }
 0xc97   :  { %v6556_v0 = vpop.eup %6555  ;;  %v3808_v13 = vmul.f32 %v6554_v62, %v3758_v9 }
 0xc98   :  { %v3810_v40 = vmul.f32 %v6556_v0, %v3766_v20  ;;  %v8156_v0 = vld [vmem:[#allocation22 + $0x2] sm:$0x3] }
 0xc99   :  { %v3812_v54 = vpack.c.bf16 %v3808_v13, %v3807_v3 }
 0xc9a   :  { %v3813_v33 = vpack.c.bf16 %v3810_v40, %v3809_v27  ;;  %v4106_v27 = vrot.slane %v8156_v0, %v8419_v44 }
 0xc9b   :  { %5867 = vmatmul.mubr.msk.bf16.gmra.mrb[20].mxu1 %vm1386_vm13, %v3812_v54 }
 0xc9c   :  { %5870 = vmatprep.mubr.msk.bf16.mxu1 %vm7037_vm12, %v8396_v43 }
 0xca3   :  { %5871 = vmatmul.mubr.msk.bf16.gmra.mrb[24].mxu1 %vm1386_vm13, %v3813_v33 }
 0xca4   :  { %5896 = vmatprep.mubr.msk.bf16.mxu1 %vm7037_vm12, %v8396_v43 }
 0xd66   :  { %v3873_v61 = vpop.f32.mrb[16].mxu1 }
 0xd67   :  { %v3874_v32 = vadd.f32 %v3873_v61, %v3817_v35  ;;  %v5864_v7 = vpop.f32.mrb[17].mxu1 }
 0xd68   :  { %v3876_v23 = vpop.f32.mrb[18].mxu1 }
 0xd69   :  { %v5172_v9 = vmul.f32 -1.442695, %v3874_v32  ;;  %v3877_v20 = vadd.f32 %v3876_v23, %v3817_v35  ;;  %v5865_v25 = vpop.f32.mrb[19].mxu1 }
 0xd6b   :  { %6557 = vpow2.f32 %v5172_v9  ;;  %v5173_v60 = vmul.f32 -1.442695, %v3877_v20 }
 0xd6d   :  { %6559 = vpow2.f32 %v5173_v60 }
 0xd6e   :  { %v3881_v6 = vpop.f32.mrb[20].mxu1 }
 0xd6f   :  { %v3882_v4 = vadd.f32 %v3881_v6, %v3817_v35  ;;  %v5868_v10 = vpop.f32.mrb[21].mxu1 }
 0xd70   :  { %v3884_v18 = vpop.f32.mrb[22].mxu1 }
 0xd71   :  { %v5174_v50 = vmul.f32 -1.442695, %v3882_v4  ;;  %v3885_v24 = vadd.f32 %v3884_v18, %v3817_v35  ;;  %v5869_v42 = vpop.f32.mrb[23].mxu1 }
 0xd73   :  { %6561 = vpow2.f32 %v5174_v50  ;;  %v5175_v21 = vmul.f32 -1.442695, %v3885_v24 }
 0xd75   :  { %v6558_v56 = vpop.eup %6557  ;;  %6563 = vpow2.f32 %v5175_v21 }
 0xd76   :  { %v3914_v58 = vadd.f32 1.0, %v6558_v56  ;;  %v3889_v63 = vpop.f32.mrb[24].mxu1 }
 0xd77   :  { %v6560_v11 = vpop.eup %6559  ;;  %v3890_v34 = vadd.f32 %v3889_v63, %v3817_v35  ;;  %v5872_v51 = vpop.f32.mrb[25].mxu1 }
 0xd78   :  { %6565 = vrcp.f32 %v3914_v58  ;;  %v3915_v39 = vadd.f32 1.0, %v6560_v11  ;;  %v3892_v26 = vpop.f32.mrb[26].mxu1 }
 0xd79   :  { %v5176_v30 = vmul.f32 -1.442695, %v3890_v34  ;;  %v3893_v38 = vadd.f32 %v3892_v26, %v3817_v35  ;;  %v5873_v31 = vpop.f32.mrb[27].mxu1 }
 0xd7a   :  { %6567 = vrcp.f32 %v3915_v39 }
 0xd7b   :  { %6569 = vpow2.f32 %v5176_v30  ;;  %v5177_v15 = vmul.f32 -1.442695, %v3893_v38  ;;  %v8421_v30 = vsub.s32 5, %v7703_v17 }
 0xd7d   :  { %v6562_v19 = vpop.eup %6561  ;;  %6571 = vpow2.f32 %v5177_v15 }
 0xd7e   :  { %v3916_v62 = vadd.f32 1.0, %v6562_v19 }
 0xd7f   :  { %v6564_v3 = vpop.eup %6563 }
 0xd80   :  { %6573 = vrcp.f32 %v3916_v62  ;;  %v3917_v13 = vadd.f32 1.0, %v6564_v3 }
 0xd82   :  { %v6566_v40 = vpop.eup %6565  ;;  %6575 = vrcp.f32 %v3917_v13 }
 0xd83   :  { %v8160_v54 = vmul.f32 %v6566_v40, %v3874_v32 }
 0xd84   :  { %v6568_v33 = vpop.eup %6567 }
 0xd85   :  { %v6570_v12 = vpop.eup %6569  ;;  %v8162_v2 = vmul.f32 %v6568_v33, %v3877_v20  ;;  %v4107_v35 = vmul.f32 %v4106_v27, %v8160_v54 }
 0xd86   :  { %v3918_v61 = vadd.f32 1.0, %v6570_v12 }
 0xd87   :  { %v6572_v7 = vpop.eup %6571  ;;  %v3938_v23 = vpack.c.bf16 %v8162_v2, %v8160_v54  ;;  %v4113_v9 = vsel %vm1386_vm13, %v4107_v35, 0.0  ;;  %v4108_v25 = vmul.f32 %v4106_v27, %v8162_v2 }
 0xd88   :  { %6577 = vrcp.f32 %v3918_v61  ;;  %v3919_v44 = vadd.f32 1.0, %v6572_v7  ;;  %4114 = vadd.xlane.f32.xlu0 %v4113_v9 }
 0xd89   :  { %5879 = vmatmul.mubr.msk.bf16.vlgmr.msra.gmra.mrb[84].mxu0 %vm1386_vm13, %v3938_v23  ;;  %v4116_v32 = vsel %vm1386_vm13, %v4108_v25, 0.0 }
 0xd8a   :  { %v6574_v20 = vpop.eup %6573  ;;  %6579 = vrcp.f32 %v3919_v44  ;;  %4117 = vadd.xlane.f32.xlu1 %v4116_v32  ;;  %5882 = vmatprep.mubr.msk.bf16.mxu0 %vm7037_vm12, %v8396_v43 }
 0xd8b   :  { %v8173_v60 = vmul.f32 %v6574_v20, %v3882_v4 }
 0xd8c   :  { %v6576_v6 = vpop.eup %6575 }
 0xd8d   :  { %v8175_v10 = vmul.f32 %v6576_v6, %v3885_v24  ;;  %v4109_v18 = vmul.f32 %v4106_v27, %v8173_v60 }
 0xd8f   :  { %v3939_v50 = vpack.c.bf16 %v8175_v10, %v8173_v60  ;;  %v4119_v42 = vsel %vm1386_vm13, %v4109_v18, 0.0  ;;  %v4110_v21 = vmul.f32 %v4106_v27, %v8175_v10 }
 0xd90   :  { %4120 = vadd.xlane.f32.xlu0 %v4119_v42 }
 0xd91   :  { %5883 = vmatmul.mubr.msk.bf16.gmra.mrb[88].mxu0 %vm1386_vm13, %v3939_v50  ;;  %v4122_v24 = vsel %vm1386_vm13, %v4110_v21, 0.0 }
 0xd92   :  { %v6578_v56 = vpop.eup %6577  ;;  %5886 = vmatprep.mubr.msk.bf16.mxu0 %vm7037_vm12, %v8396_v43 }
 0xd93   :  { %v8185_v4 = vmul.f32 %v6578_v56, %v3890_v34 }
 0xd94   :  { %v6580_v58 = vpop.eup %6579  ;;  %4123 = vadd.xlane.f32.xlu0 %v4122_v24 }
 0xd95   :  { %v8188_v63 = vmul.f32 %v6580_v58, %v3893_v38  ;;  %v4111_v11 = vmul.f32 %v4106_v27, %v8185_v4  ;;  %v4134_v38 = vrot.slane %v8139_v1, %v8421_v30 }
 0xd97   :  { %v3940_v51 = vpack.c.bf16 %v8188_v63, %v8185_v4  ;;  %v4125_v39 = vsel %vm1386_vm13, %v4111_v11, 0.0  ;;  %v4112_v26 = vmul.f32 %v4106_v27, %v8188_v63 }
 0xd98   :  { %4126 = vadd.xlane.f32.xlu1 %v4125_v39 }
 0xd99   :  { %5887 = vmatmul.mubr.msk.bf16.gmra.mrb[92].mxu0 %vm1386_vm13, %v3940_v51  ;;  %v4128_v34 = vsel %vm1386_vm13, %v4112_v26, 0.0 }
 0xd9a   :  { %4129 = vadd.xlane.f32.xlu0 %v4128_v34  ;;  %5998 = vmatprep.mubr.msk.bf16.mxu0 %vm7037_vm12, %v8396_v43 }
 0xe15   :  { %v4115_v31 = vpop.xlane.xlu0 %4114 }
 0xe16   :  { %v4135_v15 = vadd.f32 %v4134_v38, %v4115_v31 }
 0xe17   :  { %v4118_v19 = vpop.xlane.xlu1 %4117 }
 0xe18   :  { %v5189_v62 = vmul.f32 -1.442695, %v4135_v15  ;;  %v4136_v3 = vadd.f32 %v4134_v38, %v4118_v19  ;;  %v8422_v19 = vsub.s32 2, %v7703_v17 }
 0xe1a   :  { %6581 = vpow2.f32 %v5189_v62  ;;  %v5190_v13 = vmul.f32 -1.442695, %v4136_v3  ;;  %v3944_v62 = vrot.slane %v8139_v1, %v8422_v19  ;;  %v4068_v19 = vrot.slane %v8156_v0, %v8420_v29 }
 0xe1c   :  { %6583 = vpow2.f32 %v5190_v13 }
 0xe1d   :  { %v4121_v27 = vpop.xlane.xlu0 %4120 }
 0xe1e   :  { %v4137_v40 = vadd.f32 %v4134_v38, %v4121_v27 }
 0xe20   :  { %v5191_v33 = vmul.f32 -1.442695, %v4137_v40 }
 0xe21   :  { %v4124_v12 = vpop.xlane.xlu0 %4123 }
 0xe22   :  { %6585 = vpow2.f32 %v5191_v33  ;;  %v4138_v35 = vadd.f32 %v4134_v38, %v4124_v12 }
 0xe24   :  { %v6582_v61 = vpop.eup %6581  ;;  %v5192_v7 = vmul.f32 -1.442695, %v4138_v35 }
 0xe25   :  { %v4159_v23 = vadd.f32 1.0, %v6582_v61  ;;  %v4127_v9 = vpop.xlane.xlu1 %4126 }
 0xe26   :  { %v6584_v25 = vpop.eup %6583  ;;  %6587 = vpow2.f32 %v5192_v7  ;;  %v4139_v44 = vadd.f32 %v4134_v38, %v4127_v9 }
 0xe27   :  { %6589 = vrcp.f32 %v4159_v23  ;;  %v4160_v32 = vadd.f32 1.0, %v6584_v25  ;;  %v4130_v20 = vpop.xlane.xlu0 %4129 }
 0xe28   :  { %v5193_v6 = vmul.f32 -1.442695, %v4139_v44  ;;  %v4140_v18 = vadd.f32 %v4134_v38, %v4130_v20 }
 0xe29   :  { %6591 = vrcp.f32 %v4160_v32 }
 0xe2a   :  { %6593 = vpow2.f32 %v5193_v6  ;;  %v5194_v50 = vmul.f32 -1.442695, %v4140_v18 }
 0xe2c   :  { %v6586_v42 = vpop.eup %6585  ;;  %6595 = vpow2.f32 %v5194_v50 }
 0xe2d   :  { %v4161_v21 = vadd.f32 1.0, %v6586_v42 }
 0xe2f   :  { %6597 = vrcp.f32 %v4161_v21 }
 0xe30   :  { %v6588_v56 = vpop.eup %6587 }
 0xe31   :  { %v6590_v24 = vpop.eup %6589  ;;  %v4162_v58 = vadd.f32 1.0, %v6588_v56 }
 0xe32   :  { %4179 = vperm.xlu1 %6319, %v6590_v24  }
 0xe33   :  { %v6592_v11 = vpop.eup %6591  ;;  %6599 = vrcp.f32 %v4162_v58 }
 0xe34   :  { %v6594_v51 = vpop.eup %6593  ;;  %4184 = vperm.xlu0 %6318, %v6592_v11  }
 0xe35   :  { %v4163_v39 = vadd.f32 1.0, %v6594_v51 }
 0xe36   :  { %v6596_v26 = vpop.eup %6595 }
 0xe37   :  { %6601 = vrcp.f32 %v4163_v39  ;;  %v4164_v34 = vadd.f32 1.0, %v6596_v26 }
 0xe39   :  { %v6598_v30 = vpop.eup %6597  ;;  %6603 = vrcp.f32 %v4164_v34 }
 0xe3a   :  { %4189 = vperm.xlu1 %6319, %v6598_v30  }
 0xe3d   :  { %v6600_v38 = vpop.eup %6599 }
 0xe3e   :  { %4194 = vperm.xlu1 %6319, %v6600_v38  }
 0xe41   :  { %v6602_v31 = vpop.eup %6601 }
 0xe42   :  { %4199 = vperm.xlu0 %6318, %v6602_v31  }
 0xe43   :  { %v6604_v15 = vpop.eup %6603 }
 0xe44   :  { %4204 = vperm.xlu1 %6319, %v6604_v15  }
 0xe5c   :  { %v4000_v3 = vpop.f32.mrb[84].mxu0 }
 0xe5d   :  { %v4001_v13 = vadd.f32 %v4000_v3, %v3944_v62  ;;  %v5880_v27 = vpop.f32.mrb[85].mxu0 }
 0xe5e   :  { %v4003_v40 = vpop.f32.mrb[86].mxu0 }
 0xe5f   :  { %v5183_v33 = vmul.f32 -1.442695, %v4001_v13  ;;  %v4004_v12 = vadd.f32 %v4003_v40, %v3944_v62  ;;  %v5881_v35 = vpop.f32.mrb[87].mxu0 }
 0xe61   :  { %6605 = vpow2.f32 %v5183_v33  ;;  %v5184_v61 = vmul.f32 -1.442695, %v4004_v12 }
 0xe63   :  { %6607 = vpow2.f32 %v5184_v61 }
 0xe64   :  { %v4008_v7 = vpop.f32.mrb[88].mxu0 }
 0xe65   :  { %v4009_v23 = vadd.f32 %v4008_v7, %v3944_v62  ;;  %v5884_v9 = vpop.f32.mrb[89].mxu0 }
 0xe66   :  { %v4011_v25 = vpop.f32.mrb[90].mxu0 }
 0xe67   :  { %v5185_v44 = vmul.f32 -1.442695, %v4009_v23  ;;  %v4012_v32 = vadd.f32 %v4011_v25, %v3944_v62  ;;  %v5885_v20 = vpop.f32.mrb[91].mxu0 }
 0xe69   :  { %6609 = vpow2.f32 %v5185_v44  ;;  %v5186_v6 = vmul.f32 -1.442695, %v4012_v32 }
 0xe6b   :  { %v6606_v18 = vpop.eup %6605  ;;  %6611 = vpow2.f32 %v5186_v6 }
 0xe6c   :  { %v4041_v50 = vadd.f32 1.0, %v6606_v18  ;;  %v4016_v42 = vpop.f32.mrb[92].mxu0 }
 0xe6d   :  { %v6608_v21 = vpop.eup %6607  ;;  %v4017_v56 = vadd.f32 %v4016_v42, %v3944_v62  ;;  %v5888_v24 = vpop.f32.mrb[93].mxu0 }
 0xe6e   :  { %6613 = vrcp.f32 %v4041_v50  ;;  %v4042_v58 = vadd.f32 1.0, %v6608_v21  ;;  %v4019_v11 = vpop.f32.mrb[94].mxu0 }
 0xe6f   :  { %v5187_v51 = vmul.f32 -1.442695, %v4017_v56  ;;  %v4020_v39 = vadd.f32 %v4019_v11, %v3944_v62  ;;  %v5889_v26 = vpop.f32.mrb[95].mxu0 }
 0xe70   :  { %6615 = vrcp.f32 %v4042_v58 }
 0xe71   :  { %6617 = vpow2.f32 %v5187_v51  ;;  %v5188_v34 = vmul.f32 -1.442695, %v4020_v39 }
 0xe73   :  { %v6610_v30 = vpop.eup %6609  ;;  %6619 = vpow2.f32 %v5188_v34 }
 0xe74   :  { %v4043_v38 = vadd.f32 1.0, %v6610_v30 }
 0xe75   :  { %v6612_v31 = vpop.eup %6611 }
 0xe76   :  { %6621 = vrcp.f32 %v4043_v38  ;;  %v4044_v15 = vadd.f32 1.0, %v6612_v31 }
 0xe78   :  { %v6614_v3 = vpop.eup %6613  ;;  %6623 = vrcp.f32 %v4044_v15 }
 0xe79   :  { %v4059_v27 = vmul.f32 %v6614_v3, %v4001_v13 }
 0xe7a   :  { %v6616_v40 = vpop.eup %6615 }
 0xe7b   :  { %v6618_v33 = vpop.eup %6617  ;;  %v4060_v35 = vmul.f32 %v6616_v40, %v4004_v12  ;;  %v4069_v62 = vmul.f32 %v4068_v19, %v4059_v27  ;;  %v8423_v40 = vld [vmem:[#allocation50_spill] sm:$0xff] }
 0xe7c   :  { %v4045_v61 = vadd.f32 1.0, %v6618_v33  ;;  %v8424_v33 = vld [vmem:[#allocation51_spill] sm:$0xff] }
 0xe7d   :  { %v6620_v7 = vpop.eup %6619  ;;  %v4075_v9 = vsel %vm1386_vm13, %v4069_v62, 0.0  ;;  %v4070_v25 = vmul.f32 %v4068_v19, %v4060_v35  ;;  %v6401_v35 = vld [vmem:[#allocation19 + $0x30] sm:$0xff]  }
 0xe7e   :  { %6625 = vrcp.f32 %v4045_v61  ;;  %v4046_v44 = vadd.f32 1.0, %v6620_v7  ;;  %4076 = vadd.xlane.f32.xlu1 %v4075_v9 }
 0xe80   :  { %v6622_v20 = vpop.eup %6621  ;;  %6627 = vrcp.f32 %v4046_v44  ;;  %v4078_v44 = vsel %vm1386_vm13, %v4070_v25, 0.0 }
 0xe81   :  { %v4061_v6 = vmul.f32 %v6622_v20, %v4009_v23 }
 0xe82   :  { %v6624_v18 = vpop.eup %6623 }
 0xe83   :  { %v4062_v29 = vmul.f32 %v6624_v18, %v4012_v32  ;;  %v4071_v0 = vmul.f32 %v4068_v19, %v4061_v6  ;;  %v8425_v18 = vsub.s32 6, %v7703_v17 }
 0xe85   :  { %v4072_v50 = vmul.f32 %v4068_v19, %v4062_v29  ;;  %v4081_v20 = vsel %vm1386_vm13, %v4071_v0, 0.0  ;;  %v4096_v29 = vrot.slane %v8139_v1, %v8425_v18 }
 0xe87   :  { %v4084_v13 = vsel %vm1386_vm13, %v4072_v50, 0.0 }
 0xe88   :  { %v6626_v42 = vpop.eup %6625  ;;  %4085 = vadd.xlane.f32.xlu1 %v4084_v13 }
 0xe89   :  { %v4063_v12 = vmul.f32 %v6626_v42, %v4017_v56 }
 0xe8a   :  { %v6628_v21 = vpop.eup %6627 }
 0xe8b   :  { %v4064_v24 = vmul.f32 %v6628_v21, %v4020_v39  ;;  %v4073_v58 = vmul.f32 %v4068_v19, %v4063_v12 }
 0xe8d   :  { %v4074_v11 = vmul.f32 %v4068_v19, %v4064_v24  ;;  %v4087_v6 = vsel %vm1386_vm13, %v4073_v58, 0.0 }
 0xe8f   :  { %v4090_v51 = vsel %vm1386_vm13, %v4074_v11, 0.0 }
 0xe90   :  { %4091 = vadd.xlane.f32.xlu1 %v4090_v51 }
 0xeb1   :  { %v4180_v26 = vpop.permute.xlu1 %4179 }
 0xeb2   :  { %v4207_v23 = vmul.f32 %v4180_v26, %v8160_v54 }
 0xeb3   :  { %v4185_v34 = vpop.permute.xlu0 %4184 }
 0xeb4   :  { %v4208_v32 = vmul.f32 %v4185_v34, %v8162_v2 }
 0xeb6   :  { %v4213_v30 = vpack.c.bf16 %v4208_v32, %v4207_v23 }
 0xeb8   :  { %5891 = vmatpush3.bf16.msra.mxu1 %v4213_v30 }
 0xeb9   :  { %v4190_v38 = vpop.permute.xlu1 %4189  ;;  %5892 = vmatprep.subr.bf16.mxu1 %v8396_v43 }
 0xeba   :  { %v4209_v56 = vmul.f32 %v4190_v38, %v8173_v60  ;;  %v6399_v60 = vld [vmem:[#allocation19 + $0x20] sm:$0xff]  }
 0xebb   :  { %5991 = vmatpush3.bf16.msra.mxu0 %v6399_v60 }
 0xebc   :  { %5992 = vmatprep.subr.bf16.mxu0 %v8396_v43 }
 0xebd   :  { %v4195_v31 = vpop.permute.xlu1 %4194 }
 0xebe   :  { %v4210_v39 = vmul.f32 %v4195_v31, %v8175_v10  ;;  %v6400_v10 = vld [vmem:[#allocation19 + $0x28] sm:$0xff]  }
 0xebf   :  { %5993 = vmatpush3.bf16.msra.mxu0 %v6400_v10 }
 0xec0   :  { %v4214_v15 = vpack.c.bf16 %v4210_v39, %v4209_v56  ;;  %5994 = vmatprep.subr.bf16.mxu0 %v8396_v43  ;;  %v6403_v56 = vld [vmem:[#allocation20 + $0x10] sm:$0xff]   ;;  %v6404_v39 = vld [vmem:[#allocation20 + $0x18] sm:$0xff]  }
 0xec1   :  { %v4200_v19 = vpop.permute.xlu0 %4199 }
 0xec2   :  { %5893 = vmatpush3.bf16.msra.mxu1 %v4214_v15  ;;  %v4211_v54 = vmul.f32 %v4200_v19, %v8185_v4  ;;  %v6402_v4 = vld [vmem:[#allocation19 + $0x38] sm:$0xff]  }
 0xec3   :  { %v4205_v3 = vpop.permute.xlu1 %4204  ;;  %5894 = vmatprep.subr.bf16.mxu1 %v8396_v43  ;;  %5995 = vmatpush3.bf16.msra.mxu0 %v6401_v35 }
 0xec4   :  { %v4212_v2 = vmul.f32 %v4205_v3, %v8188_v63  ;;  %5996 = vmatprep.subr.bf16.mxu0 %v8396_v43 }
 0xec6   :  { %v4215_v27 = vpack.c.bf16 %v4212_v2, %v4211_v54 }
 0xec7   :  { %5997 = vmatpush3.bf16.msra.mxu0 %v6402_v4 }
 0xec8   :  { %5895 = vmatpush3.bf16.msra.mxu1 %v4215_v27  ;;  %6002 = vmatprep.subr.bf16.mxu0 %v8396_v43 }
 0xecb   :  { %5897 = vmatmul.mubr.msk.bf16.vlgmr.msra.gmra.mrb[28].mxu1 %vm1959_vm8, %v8423_v40 }
 0xecc   :  { %5912 = vmatprep.mubr.f32.mxu1 %v8424_v33 }
 0xf0b   :  { %v4077_v50 = vpop.xlane.xlu1 %4076 }
 0xf0c   :  { %v4097_v13 = vadd.f32 %v4096_v29, %v4077_v50 }
 0xf15   :  { %v4086_v42 = vpop.xlane.xlu1 %4085 }
 0xf16   :  { %v4100_v12 = vadd.f32 %v4096_v29, %v4086_v42 }
 0xf1d   :  { %v4092_v21 = vpop.xlane.xlu1 %4091 }
 0xf1e   :  { %v4102_v24 = vadd.f32 %v4096_v29, %v4092_v21 }
 0xf9e   :  { %v4250_v63 = vpop.f32.mrb[28].mxu1 }
 0xf9f   :  { %v5898_v62 = vpop.f32.mrb[29].mxu1 }
 0xfa0   :  { %v4253_v61 = vpop.f32.mrb[30].mxu1 }
 0xfa1   :  { %v6370_v7 = vpack.i.bf16 %v4253_v61, %v4250_v63  ;;  %v5899_v9 = vpop.f32.mrb[31].mxu1 }
 0xfa3   :  { %6371 = vrot.lane.b32.xlu0 %v6370_v7, %s7031_s10 }
 0xfc2   :  { %4079 = vadd.xlane.f32.xlu0 %v4078_v44 }
 0xfc6   :  { %4082 = vadd.xlane.f32.xlu0 %v4081_v20 }
 0xfca   :  { %4088 = vadd.xlane.f32.xlu0 %v4087_v6 }
 0xfe0   :  { %4259 = vperm.xlu0 %6318, %v4097_v13  }
 0xfe4   :  { %4274 = vperm.xlu0 %6318, %v4100_v12  }
 0xfe8   :  { %4284 = vperm.xlu0 %6318, %v4102_v24  }
0x1015   :  { %v6372_v25 = vpop.permute.xlu0 %6371 }
0x1016   :  { %v6374_v11 = vunpack.i.h.bf16 %v6372_v25  ;;  %v6373_v0 = vunpack.i.l.bf16 %v6372_v25 }
0x1018   :  { %v4858_v58 = vsel %vm1386_vm13, %v7947_v37, %v6374_v11  ;;  %v4857_v51 = vsel %vm1386_vm13, %v7945_v46, %v6373_v0 }
0x1019   :  { %v4859_v26 = vpack.c.bf16 %v4858_v58, %v4857_v51 }
0x101b   :  { %5999 = vmatmul.mubr.msk.bf16.vlgmr.msra.gmra.mrb[96].mxu0 %vm1393_vm14, %v4859_v26 }
0x101c   :  { %6006 = vmatprep.mubr.msk.bf16.mxu0 %vm7037_vm12, %v8396_v43  ;;  %6003 = vmatpush3.bf16.msra.mxu0 %v6403_v56 }
0x101d   :  { %6004 = vmatprep.subr.bf16.mxu0 %v8396_v43 }
0x1020   :  { %6005 = vmatpush3.bf16.msra.mxu0 %v6404_v39 }
0x104f   :  { %v4080_v34 = vpop.xlane.xlu0 %4079 }
0x1050   :  { %v4098_v23 = vadd.f32 %v4096_v29, %v4080_v34 }
0x1052   :  { %4264 = vperm.xlu1 %6319, %v4098_v23  }
0x1053   :  { %v4083_v32 = vpop.xlane.xlu0 %4082 }
0x1054   :  { %v4099_v30 = vadd.f32 %v4096_v29, %v4083_v32 }
0x1056   :  { %4269 = vperm.xlu1 %6319, %v4099_v30  }
0x1057   :  { %v4089_v38 = vpop.xlane.xlu0 %4088 }
0x1058   :  { %v4101_v31 = vadd.f32 %v4096_v29, %v4089_v38 }
0x105a   :  { %4279 = vperm.xlu1 %6319, %v4101_v31  }
0x105f   :  { %v4260_v15 = vpop.permute.xlu0 %4259 }
0x1060   :  { %v4287_v3 = vmul.f32 %v4260_v15, %v8024_v45 }
0x1062   :  { %v4294_v54 = vand.u32 4294901760, %v4287_v3 }
0x1063   :  { %v4275_v19 = vpop.permute.xlu0 %4274 }
0x1064   :  { %v4290_v2 = vmul.f32 %v8029_v47, %v4275_v19  ;;  %v4386_v40 = vsub.f32 %v4287_v3, %v4294_v54 }
0x1066   :  { %v4303_v33 = vand.u32 4294901760, %v4290_v2  ;;  %v4387_v4 = vand.u32 4294901760, %v4386_v40 }
0x1067   :  { %v4285_v27 = vpop.permute.xlu0 %4284 }
0x1068   :  { %v4292_v60 = vmul.f32 %v8039_v57, %v4285_v27  ;;  %v4407_v63 = vsub.f32 %v4290_v2, %v4303_v33  ;;  %v4388_v20 = vsub.f32 %v4386_v40, %v4387_v4  ;;  %v4863_v27 = vrot.slane %v8139_v1, %v2615_v36 }
0x106a   :  { %v4309_v43 = vand.u32 4294901760, %v4292_v60  ;;  %v4408_v44 = vand.u32 4294901760, %v4407_v63  ;;  %v4389_v21 = vand.u32 4294901760, %v4388_v20 }
0x106c   :  { %v4421_v47 = vsub.f32 %v4292_v60, %v4309_v43 }
0x106e   :  { %v4422_v12 = vand.u32 4294901760, %v4421_v47 }
0x1070   :  { %v4423_v31 = vsub.f32 %v4421_v47, %v4422_v12 }
0x10d1   :  { %v4265_v10 = vpop.permute.xlu1 %4264 }
0x10d2   :  { %v4288_v35 = vmul.f32 %v8020_v53, %v4265_v10 }
0x10d4   :  { %v4297_v62 = vand.u32 4294901760, %v4288_v35 }
0x10d5   :  { %v4270_v61 = vpop.permute.xlu1 %4269 }
0x10d6   :  { %v8244_v7 = vpack.c.bf16 %v4297_v62, %v4294_v54  ;;  %v4393_v9 = vsub.f32 %v4288_v35, %v4297_v62  ;;  %v4289_v45 = vmul.f32 %v4270_v61, %v8034_v49  ;;  %v4409_v49 = vsub.f32 %v4407_v63, %v4408_v44 }
0x10d7   :  { %v4424_v54 = vand.u32 4294901760, %v4423_v31 }
0x10d8   :  { %v4394_v6 = vand.u32 4294901760, %v4393_v9  ;;  %v4300_v18 = vand.u32 4294901760, %v4289_v45  ;;  %6131 = vmatprep.subr.bf16.mxu1 %v8244_v7  ;;  %v6154_v57 = vpack.c.bf16 %v4393_v9, %v4386_v40 }
0x10d9   :  { %6133 = vmatpush3.bf16.msra.mxu1 %v8244_v7  ;;  %v4280_v53 = vpop.permute.xlu1 %4279 }
0x10da   :  { %v8249_v29 = vpack.c.bf16 %v4303_v33, %v4300_v18  ;;  %v4400_v50 = vsub.f32 %v4289_v45, %v4300_v18  ;;  %v4291_v13 = vmul.f32 %v4280_v53, %v8044_v59  ;;  %v4395_v42 = vsub.f32 %v4393_v9, %v4394_v6 }
0x10db   :  { %v8252_v24 = vpack.c.bf16 %v4394_v6, %v4387_v4  ;;  %v4410_v59 = vand.u32 4294901760, %v4409_v49 }
0x10dc   :  { %v4401_v25 = vand.u32 4294901760, %v4400_v50  ;;  %v4306_v11 = vand.u32 4294901760, %v4291_v13  ;;  %6135 = vmatprep.subr.bf16.mxu1 %v8249_v29  ;;  %v4396_v0 = vand.u32 4294901760, %v4395_v42  ;;  %v6158_v58 = vpack.c.bf16 %v4407_v63, %v4400_v50 }
0x10dd   :  { %6137 = vmatpush3.bf16.msra.mxu1 %v8249_v29 }
0x10de   :  { %v8256_v51 = vpack.c.bf16 %v4309_v43, %v4306_v11  ;;  %v4414_v26 = vsub.f32 %v4291_v13, %v4306_v11  ;;  %v6142_v34 = vpack.c.bf16 %v4396_v0, %v4389_v21  ;;  %v4402_v23 = vsub.f32 %v4400_v50, %v4401_v25 }
0x10df   :  { %v8258_v32 = vpack.c.bf16 %v4408_v44, %v4401_v25 }
0x10e0   :  { %v4415_v30 = vand.u32 4294901760, %v4414_v26  ;;  %6139 = vmatprep.subr.bf16.mxu1 %v8256_v51  ;;  %v4403_v38 = vand.u32 4294901760, %v4402_v23  ;;  %v6162_v56 = vpack.c.bf16 %v4421_v47, %v4414_v26 }
0x10e1   :  { %6141 = vmatpush3.bf16.msra.mxu1 %v8256_v51 }
0x10e2   :  { %6143 = vmatprep.subr.bf16.mxu1 %v6142_v34  ;;  %v6146_v39 = vpack.c.bf16 %v4410_v59, %v4403_v38  ;;  %v4416_v15 = vsub.f32 %v4414_v26, %v4415_v30  ;;  %v6186_v19 = vpack.c.bf16 %v4422_v12, %v4415_v30 }
0x10e4   :  { %5913 = vmatmul.mubr.f32.vlgmr.msra.gmra.mrb[32].mxu1 %v7891_v28  ;;  %v4417_v3 = vand.u32 4294901760, %v4416_v15 }
0x10e5   :  { %6145 = vmatpush3.bf16.msra.mxu1 %v6142_v34  ;;  %5927 = vmatprep.mubr.msk.f32.mxu1 %vm1959_vm8, %v7815_v8 }
0x10e6   :  { %6147 = vmatprep.subr.bf16.mxu1 %v6146_v39  ;;  %v6150_v2 = vpack.c.bf16 %v4424_v54, %v4417_v3 }
0x10e9   :  { %6149 = vmatpush3.bf16.msra.mxu1 %v6146_v39 }
0x10ea   :  { %6151 = vmatprep.subr.bf16.mxu1 %v6150_v2 }
0x10ed   :  { %6153 = vmatpush3.bf16.msra.mxu1 %v6150_v2 }
0x10ee   :  { %6155 = vmatprep.subr.bf16.mxu1 %v6154_v57  ;;  %v4925_v40 = vpop.f32.mrb[96].mxu0 }
0x10ef   :  { %v4926_v33 = vadd.f32 %v4925_v40, %v4863_v27  ;;  %v6000_v60 = vpop.f32.mrb[97].mxu0 }
0x10f0   :  { %v4928_v28 = vpop.f32.mrb[98].mxu0  ;;  %5928 = vmatmul.mubr.msk.f32.vlgmr.msra.gmra.mrb[32].mxu1 %vm1959_vm8, %v7818_v48 }
0x10f1   :  { %v5207_v10 = vmul.f32 -1.442695, %v4926_v33  ;;  %v4929_v35 = vadd.f32 %v4928_v28, %v4863_v27  ;;  %6157 = vmatpush3.bf16.msra.mxu1 %v6154_v57  ;;  %v6001_v4 = vpop.f32.mrb[99].mxu0  ;;  %5942 = vmatprep.mubr.f32.mxu1 %v7853_v55 }
0x10f2   :  { %6159 = vmatprep.subr.bf16.mxu1 %v6158_v58 }
0x10f3   :  { %6629 = vpow2.f32 %v5207_v10  ;;  %v5208_v63 = vmul.f32 -1.442695, %v4929_v35 }
0x10f5   :  { %6631 = vpow2.f32 %v5208_v63  ;;  %6161 = vmatpush3.bf16.msra.mxu1 %v6158_v58 }
0x10f6   :  { %6163 = vmatprep.subr.bf16.mxu1 %v6162_v56 }
0x10f9   :  { %6165 = vmatpush3.bf16.msra.mxu1 %v6162_v56 }
0x10fa   :  { %6167 = vmatprep.subr.bf16.mxu1 %v8244_v7 }
0x10fc   :  { %5943 = vmatmul.mubr.f32.vlgmr.msra.gmra.mrb[32].mxu1 %v7869_v22 }
0x10fd   :  { %v6630_v36 = vpop.eup %6629  ;;  %6169 = vmatpush3.bf16.msra.mxu1 %v8244_v7  ;;  %5957 = vmatprep.mubr.f32.mxu1 %v7856_v16 }
0x10fe   :  { %v4938_v43 = vadd.f32 1.0, %v6630_v36  ;;  %6171 = vmatprep.subr.bf16.mxu1 %v8249_v29 }
0x10ff   :  { %v6632_v55 = vpop.eup %6631 }
0x1100   :  { %6633 = vrcp.f32 %v4938_v43  ;;  %v4939_v62 = vadd.f32 1.0, %v6632_v55 }
0x1101   :  { %6173 = vmatpush3.bf16.msra.mxu1 %v8249_v29 }
0x1102   :  { %6635 = vrcp.f32 %v4939_v62  ;;  %6175 = vmatprep.subr.bf16.mxu1 %v8256_v51 }
0x1105   :  { %6177 = vmatpush3.bf16.msra.mxu1 %v8256_v51 }
0x1106   :  { %6179 = vmatprep.subr.bf16.mxu1 %v8252_v24 }
0x1108   :  { %5958 = vmatmul.mubr.f32.vlgmr.msra.gmra.mrb[32].mxu1 %v7873_v14  ;;  %v5008_v14 = vrot.slane %v8139_v1, %v2760_v52 }
0x1109   :  { %6181 = vmatpush3.bf16.msra.mxu1 %v8252_v24  ;;  %5972 = vmatprep.mubr.msk.f32.mxu1 %vm1959_vm8, %v7815_v8 }
0x110a   :  { %v6634_v16 = vpop.eup %6633  ;;  %6183 = vmatprep.subr.bf16.mxu1 %v8258_v32 }
0x110b   :  { %v4944_v61 = vmul.f32 %v6634_v16, %v4926_v33 }
0x110c   :  { %v6636_v22 = vpop.eup %6635 }
0x110d   :  { %v4945_v9 = vmul.f32 %v6636_v22, %v4929_v35  ;;  %6185 = vmatpush3.bf16.msra.mxu1 %v8258_v32 }
0x110e   :  { %6187 = vmatprep.subr.bf16.mxu1 %v6186_v19 }
0x110f   :  { %v4946_v45 = vpack.c.bf16 %v4945_v9, %v4944_v61 }
0x1111   :  { %6189 = vmatpush3.bf16.msra.mxu1 %v6186_v19  ;;  %6007 = vmatmul.mubr.msk.bf16.vlgmr.msra.gmra.mrb[100].mxu0 %vm1386_vm13, %v4946_v45 }
0x1112   :  { %6191 = vmatprep.subr.bf16.mxu1 %v8244_v7 }
0x1114   :  { %5973 = vmatmul.mubr.msk.f32.vlgmr.msra.gmra.mrb[32].mxu1 %vm1959_vm8, %v7818_v48 }
0x1115   :  { %6193 = vmatpush3.bf16.msra.mxu1 %v8244_v7  ;;  %5987 = vmatprep.mubr.msk.f32.mxu1 %vm1959_vm8, %v7815_v8 }
0x1116   :  { %6195 = vmatprep.subr.bf16.mxu1 %v8249_v29 }
0x1119   :  { %6197 = vmatpush3.bf16.msra.mxu1 %v8249_v29 }
0x111a   :  { %6199 = vmatprep.subr.bf16.mxu1 %v8256_v51 }
0x111d   :  { %6201 = vmatpush3.bf16.msra.mxu1 %v8256_v51 }
0x1120   :  { %5988 = vmatmul.mubr.msk.f32.vlgmr.msra.gmra.mrb[32].mxu1 %vm1959_vm8, %v7818_v48 }
0x11e4   :  { %v4996_v44 = vpop.f32.mrb[100].mxu0 }
0x11e5   :  { %v5003_v7 = vadd.f32 %v4996_v44, %v7945_v46  ;;  %v6008_v47 = vpop.f32.mrb[101].mxu0 }
0x11e6   :  { %v4999_v8 = vpop.f32.mrb[102].mxu0 }
0x11e7   :  { %v5009_v20 = vadd.f32 %v5008_v14, %v5003_v7  ;;  %v5004_v6 = vadd.f32 %v4999_v8, %v7947_v37  ;;  %v6009_v18 = vpop.f32.mrb[103].mxu0 }
0x11e9   :  { %5011 = vst.msk [vmem:[#allocation25] sm:$0xff] %vm1386_vm13, %v5009_v20  ;;  %v5010_v57 = vadd.f32 %v5008_v14, %v5004_v6 }
0x11eb   :  { %5012 = vst.msk [vmem:[#allocation25 + $0x8] sm:$0xff] %vm1386_vm13, %v5010_v57 }
0x11ec   :  { %6961 = shalt.err (!%p6958_p4)
}
0x11ed   :  { %s6962_s7 = scalar_lea.hbm %s8354_s14, 256 }
0x11ee   :  { %p6963_p5 = scmp.ne.s32.totalorder %s8354_s14, %s6962_s7  ;;  %p6966_p6 = scmp.lt.u32.totalorder %s6962_s7, %s8354_s14 }
0x11f0   :  { %p6968_p7 = pnand %p6966_p6, %p6963_p5 }
0x11f2   :  { %6971 = shalt.err (!%p6968_p7)
}
0x11f3   :  { %5026 = dma.vmem_to_hbm [thread:$0]  %s5021_s1, 256, %s8354_s14, [#allocation4], %s7016_s30, %s7016_s30, %s7017_s16   ;;  %v5989_v17 = vpop.f32.mrb[32].mxu1 }
0x11f4   :  { %s7039_s17 = smov [#allocation26]   ;;  %v4848_v48 = vadd.f32 %v5989_v17, %v7955_v41  ;;  %v4837_v52 = vpop.f32.mrb[33].mxu1 }
0x11f5   :  { %s5032_s9 = sshll.u32 %s7039_s17, 4  ;;  %v4847_v46 = vadd.f32 %v4837_v52, %v7957_v5  ;;  %s5033_s9 = int_to_ptr.vmem [resolvable:$true] %s5032_s9 }
0x11f6   :  { %5014 = vst.msk [vmem:[#allocation26 + $0x8] sm:$0xff] %vm1277_vm10, %v4848_v48  ;;  %s6972_s21 = scalar_lea.vmem %s5033_s9, 256  ;;  %p6977_p9 = scmp.lt.s32.totalorder %s5033_s9, %s5033_s9 }
0x11f7   :  { %5013 = vst.msk [vmem:[#allocation26] sm:$0xff] %vm1277_vm10, %v4847_v46  ;;  %p6973_p8 = scmp.ne.s32.totalorder %s5033_s9, %s6972_s21  ;;  %p6978_p10 = scmp.lt.s32.totalorder %s6972_s21, %s6972_s21 }
0x11f9   :  { %p6979_p11 = por %p6978_p10, %p6977_p9 }
0x11fb   :  { %p6980_p12 = pnand %p6979_p11, %p6973_p8 }
0x11fd   :  { %6983 = shalt.err (!%p6980_p12)
}
0x11fe   :  { %s6984_s27 = scalar_lea.hbm %s8355_s15, 256 }
0x11ff   :  { %p6985_p13 = scmp.ne.s32.totalorder %s8355_s15, %s6984_s27  ;;  %p6988_p0 = scmp.lt.u32.totalorder %s6984_s27, %s8355_s15 }
0x1201   :  { %p6990_p1 = pnand %p6988_p0, %p6985_p13 }
0x1203   :  { %6993 = shalt.err (!%p6990_p1)
}
0x1204   :  { %5038 = dma.vmem_to_hbm [thread:$0]  %s5033_s9, 256, %s8355_s15, [#allocation27], %s7016_s30, %s7016_s30, %s7017_s16  }
0x1205   :  { %7010 = dma.done.wait [#allocation4], 256  }
0x1206   :  { %7011 = vsyncadd [#allocation4], 4294967040 }
0x1207   :  { %7012 = dma.done.wait [#allocation27], 256  }
0x1208   :  { %7013 = vsyncadd [#allocation27], 4294967040 }
0x1209   :  { %5045 = vsyncpa [#allocation3], 1 }
0x120a   :  { %5046 = vsyncpa [#allocation6], 1 }
0x120b   :  { %5047 = vsyncpa [#allocation9], 1 }
0x120c   :  { %5048 = vsyncpa [#allocation12], 1 }
0x120d   :  { %5049 = vsyncpa [#allocation15], 1 }
0x120e   :  { %5050 = vsyncpa [#allocation18], 1 }
0x120f   :  { %5051 = vsyncpa [#allocation21], 1 }
0x1210   :  { %5052 = vsyncpa [#allocation24], 1 }
0x1211   :  { %5053 = vsyncpa [#allocation4], 1 }
0x1212   :  { %5054 = vsyncpa [#allocation27], 1 }

</bundles_post_ra>
